<compile_context>
chip_gen: v7x
topology: tpu7x:2x2x1
jax: 0.10.0
libtpu: 0.0.40
codegen_flags: <defaults>
</compile_context>

<pallas_src>
import jax
import jax.numpy as jnp
from jax.experimental import pallas as pl
from jax.experimental.pallas import tpu as pltpu  # noqa: F401  (kept for parity)

B = 8        # batch (fills all 8 vreg sublanes; recurrence latency unchanged)
S_ENC = 8    # encoder sequence length
T_DEC = 8    # decoder sequence length
E = 32       # embedding dim
H = 32       # LSTM hidden dim
V_ENC = 64   # encoder vocab size
V_DEC = 64   # decoder vocab size
V_PAD = 128  # lane-padded vocab -> unmasked output store


# ----------------------------------------------------------------------------
# Fused encoder+decoder kernel (single invocation, everything VMEM/vreg-resident)
# ----------------------------------------------------------------------------
def seq2seq_kernel(enc_x_ref, dec_x_ref,
                   enc_wih_ref, enc_whh_ref, enc_b_ref,
                   dec_wih_ref, dec_whh_ref, dec_b_ref,
                   wc_h_ref, wc_ctx_ref, wout_ref, bout_ref,
                   out_ref):
    f32 = jnp.float32
    bf16 = jnp.bfloat16

    # Hoisted non-recurrent input projections: one MXU matmul per stream,
    # bf16 operands with f32 accumulation.
    enc_gin = (jnp.dot(enc_x_ref[...].astype(bf16),
                       enc_wih_ref[...].astype(bf16),
                       preferred_element_type=f32) + enc_b_ref[...])
    dec_gin = (jnp.dot(dec_x_ref[...].astype(bf16),
                       dec_wih_ref[...].astype(bf16),
                       preferred_element_type=f32) + dec_b_ref[...])
    # (T*B, 4H) -> (T, B, 4H): per-step access is a leading-axis index
    # (layout no-op; avoids sublane slicing inside the serial loops).
    enc_gin = enc_gin.reshape(S_ENC, B, 4 * H)
    dec_gin = dec_gin.reshape(T_DEC, B, 4 * H)

    # Loop-invariant recurrent weights, cast once for the MXU.
    enc_whh = enc_whh_ref[...].astype(bf16)
    dec_whh = dec_whh_ref[...].astype(bf16)

    # Gate-lane helpers, hoisted.  PyTorch gate order i,f,g,o; g = [2H, 3H).
    lane = jax.lax.broadcasted_iota(jnp.int32, (B, 4 * H), 1)
    g_mask = (lane >= 2 * H) & (lane < 3 * H)
    gate_scale = jnp.where(g_mask, 1.0, 0.5).astype(f32)   # tanh(x) vs tanh(x/2)

    def lstm_step(gin, h, c, whh_bf):
        # bias already folded into gin; recurrent matmul on the MXU in bf16.
        gates = gin + jnp.dot(h.astype(bf16), whh_bf,
                              preferred_element_type=f32)
        # Single EUP pass over the full (B, 4H) gates tile:
        #   sigmoid(x) = 0.5*(tanh(x/2) + 1)   (exact up to rounding).
        t = jnp.tanh(gates * gate_scale)
        act = jnp.where(g_mask, t, 0.5 * t + 0.5)
        i = act[:, 0 * H:1 * H]
        f = act[:, 1 * H:2 * H]
        g = act[:, 2 * H:3 * H]
        o = act[:, 3 * H:4 * H]
        c_new = f * c + i * g
        h_new = o * jnp.tanh(c_new)
        return h_new, c_new

    h = jnp.zeros((B, H), f32)
    c = jnp.zeros((B, H), f32)

    # ---------------- encoder recurrence (fully unrolled) --------------------
    enc_hs = []
    for t in range(S_ENC):
        h, c = lstm_step(enc_gin[t], h, c, enc_whh)
        enc_hs.append(h)
    enc = jnp.stack(enc_hs, axis=1)            # (B, S, H), stays in vregs

    # ---------------- decoder recurrence: only (h, c) recurs -----------------
    dec_hs = []
    for t in range(T_DEC):
        h, c = lstm_step(dec_gin[t], h, c, dec_whh)
        dec_hs.append(h)
    hq = jnp.stack(dec_hs, axis=1)             # (B, T, H)

    # ---------------- hoisted, batched Luong dot attention -------------------
    enc_bf = enc.astype(bf16)
    scores = jnp.einsum('bth,bsh->bts', hq.astype(bf16), enc_bf,
                        preferred_element_type=f32)        # (B, T, S)
    attn = jax.nn.softmax(scores, axis=-1)                  # (B, T, S)
    ctx = jnp.einsum('bts,bsh->bth', attn.astype(bf16), enc_bf,
                     preferred_element_type=f32)            # (B, T, H)

    # ---------------- combine + output projection, batched over (b, t) -------
    h_flat = hq.reshape(B * T_DEC, H)
    ctx_flat = ctx.reshape(B * T_DEC, H)
    comb = jnp.tanh(
        jnp.dot(h_flat.astype(bf16), wc_h_ref[...].astype(bf16),
                preferred_element_type=f32)
        + jnp.dot(ctx_flat.astype(bf16), wc_ctx_ref[...].astype(bf16),
                  preferred_element_type=f32))
    logits = (jnp.dot(comb.astype(bf16), wout_ref[...].astype(bf16),
                      preferred_element_type=f32) + bout_ref[...])

    # Single lane/sublane-dense (B*T, 128) store.
    out_ref[...] = logits


def seq2seq_pallas(enc_x, dec_x,
                   enc_wih, enc_whh, enc_b,
                   dec_wih, dec_whh, dec_b,
                   wc_h, wc_ctx, wout_pad, bout_pad):
    # Single invocation, no grid: all operands are whole-array VMEM blocks and
    # the working set is tiny on every generation (incl. v7x's 64 MiB VMEM).
    return pl.pallas_call(
        seq2seq_kernel,
        out_shape=jax.ShapeDtypeStruct((B * T_DEC, V_PAD), jnp.float32),
    )(enc_x, dec_x,
      enc_wih, enc_whh, enc_b,
      dec_wih, dec_whh, dec_b,
      wc_h, wc_ctx, wout_pad, bout_pad)


# ----------------------------------------------------------------------------
# Full Seq2Seq forward (glue in plain JAX: embedding gather + layout reshapes)
# ----------------------------------------------------------------------------
def seq2seq_forward(enc_tokens, dec_tokens, p):
    enc_emb = p["emb_enc"][enc_tokens]                   # (B, S, E)
    dec_emb = p["emb_dec"][dec_tokens]                   # (B, T, E)
    # time-major flatten: row index = t*B + b (matches the in-kernel
    # (T, B, 4H) reshape of the hoisted gate inputs)
    enc_x = jnp.transpose(enc_emb, (1, 0, 2)).reshape(S_ENC * B, E)
    dec_x = jnp.transpose(dec_emb, (1, 0, 2)).reshape(T_DEC * B, E)

    # Lane-pad the output projection so the kernel's final store is unmasked.
    wout_pad = jnp.zeros((H, V_PAD), jnp.float32).at[:, :V_DEC].set(p["wout"])
    bout_pad = jnp.zeros((1, V_PAD), jnp.float32).at[:, :V_DEC].set(p["bout"])

    logits = seq2seq_pallas(
        enc_x, dec_x,
        p["enc_wih"], p["enc_whh"], p["enc_b"],
        p["dec_wih"], p["dec_whh"], p["dec_b"],
        p["wc"][:H, :], p["wc"][H:, :],
        wout_pad, bout_pad)                              # (B*T, V_PAD), rows b*T+t

    return logits.reshape(B, T_DEC, V_PAD)[:, :, :V_DEC]  # (B, T, V)


# ----------------------------------------------------------------------------
# Pure-JAX f32 reference (same math, no Pallas) for numerical verification.
# ----------------------------------------------------------------------------
def _lstm_gates_ref(x, h, wih, whh, b):
    gates = x @ wih + h @ whh + b
    i = jax.nn.sigmoid(gates[:, 0 * H:1 * H])
    f = jax.nn.sigmoid(gates[:, 1 * H:2 * H])
    g = jnp.tanh(gates[:, 2 * H:3 * H])
    o = jax.nn.sigmoid(gates[:, 3 * H:4 * H])
    return i, f, g, o


def seq2seq_ref(enc_tokens, dec_tokens, p):
    enc_emb = p["emb_enc"][enc_tokens]
    dec_emb = p["emb_dec"][dec_tokens]
    h = jnp.zeros((B, H), jnp.float32)
    c = jnp.zeros((B, H), jnp.float32)
    hs = []
    for t in range(S_ENC):
        i, f, g, o = _lstm_gates_ref(enc_emb[:, t], h,
                                     p["enc_wih"], p["enc_whh"], p["enc_b"])
        c = f * c + i * g
        h = o * jnp.tanh(c)
        hs.append(h)
    enc_hs = jnp.stack(hs, axis=1)                       # (B, S, H)
    outs = []
    for t in range(T_DEC):
        i, f, g, o = _lstm_gates_ref(dec_emb[:, t], h,
                                     p["dec_wih"], p["dec_whh"], p["dec_b"])
        c = f * c + i * g
        h = o * jnp.tanh(c)
        scores = jnp.sum(h[:, None, :] * enc_hs, axis=-1)
        attn = jax.nn.softmax(scores, axis=-1)
        ctx = jnp.sum(attn[:, :, None] * enc_hs, axis=1)
        comb = jnp.tanh(jnp.concatenate([h, ctx], axis=-1) @ p["wc"])
        outs.append(comb @ p["wout"] + p["bout"])
    return jnp.stack(outs, axis=1)                       # (B, T, V)


def init_params(key):
    ks = jax.random.split(key, 11)
    n = lambda k, shape: (0.1 * jax.random.normal(k, shape)).astype(jnp.float32)
    return {
        "emb_enc": n(ks[0], (V_ENC, E)),
        "emb_dec": n(ks[1], (V_DEC, E)),
        "enc_wih": n(ks[2], (E, 4 * H)),
        "enc_whh": n(ks[3], (H, 4 * H)),
        "enc_b":   n(ks[4], (1, 4 * H)),
        "dec_wih": n(ks[5], (E, 4 * H)),
        "dec_whh": n(ks[6], (H, 4 * H)),
        "dec_b":   n(ks[7], (1, 4 * H)),
        "wc":      n(ks[8], (2 * H, H)),
        "wout":    n(ks[9], (H, V_DEC)),
        "bout":    n(ks[10], (1, V_DEC)),
    }


if __name__ == "__main__":
    key = jax.random.PRNGKey(0)
    k_params, k_enc, k_dec = jax.random.split(key, 3)
    params = init_params(k_params)

    enc_tokens = jax.random.randint(k_enc, (B, S_ENC), 0, V_ENC)
    dec_tokens = jax.random.randint(k_dec, (B, T_DEC), 0, V_DEC)

    out = seq2seq_forward(enc_tokens, dec_tokens, params)
    out = jax.block_until_ready(out)

    ref = seq2seq_ref(enc_tokens, dec_tokens, params)
    assert out.shape == (B, T_DEC, V_DEC), out.shape
    max_err = float(jnp.max(jnp.abs(out - ref)))
    # Tolerance relaxed vs. the pure-f32 version: MXU operands are bf16
    # (f32 accumulation), as recommended by the performance review.
    assert max_err < 2e-2, f"mismatch vs JAX reference: {max_err}"

    print("KERNEL_OK")
</pallas_src>

<mosaic_0001>
module attributes {stable_mosaic.version = 11 : i64} {
  func.func @seq2seq_kernel(%arg0: memref<64x32xf32, #tpu.memory_space<vmem>>, %arg1: memref<64x32xf32, #tpu.memory_space<vmem>>, %arg2: memref<32x128xf32, #tpu.memory_space<vmem>>, %arg3: memref<32x128xf32, #tpu.memory_space<vmem>>, %arg4: memref<1x128xf32, #tpu.memory_space<vmem>>, %arg5: memref<32x128xf32, #tpu.memory_space<vmem>>, %arg6: memref<32x128xf32, #tpu.memory_space<vmem>>, %arg7: memref<1x128xf32, #tpu.memory_space<vmem>>, %arg8: memref<32x32xf32, #tpu.memory_space<vmem>>, %arg9: memref<32x32xf32, #tpu.memory_space<vmem>>, %arg10: memref<32x128xf32, #tpu.memory_space<vmem>>, %arg11: memref<1x128xf32, #tpu.memory_space<vmem>>, %arg12: memref<64x128xf32, #tpu.memory_space<vmem>>) attributes {dimension_semantics = [], scalar_prefetch = 0 : i64, scratch_operands = 0 : i64, tpu.core_type = #tpu.core_type<tc>} {
    %c0 = arith.constant 0 : index
    %c0_0 = arith.constant 0 : index
    %0 = vector.load %arg0[%c0, %c0_0] : memref<64x32xf32, #tpu.memory_space<vmem>>, vector<64x32xf32>
    %1 = arith.truncf %0 : vector<64x32xf32> to vector<64x32xbf16>
    %c0_1 = arith.constant 0 : index
    %c0_2 = arith.constant 0 : index
    %2 = vector.load %arg2[%c0_1, %c0_2] : memref<32x128xf32, #tpu.memory_space<vmem>>, vector<32x128xf32>
    %3 = arith.truncf %2 : vector<32x128xf32> to vector<32x128xbf16>
    %cst = arith.constant dense<0.000000e+00> : vector<64x128xf32>
    %4 = tpu.matmul %1, %3, %cst {dimension_numbers = #tpu.dot_dimension_numbers<[1], [0], [0], [1], [0, 0, 1, 1], [], []>} : vector<64x32xbf16>, vector<32x128xbf16>, vector<64x128xf32> -> vector<64x128xf32>
    %c0_3 = arith.constant 0 : index
    %c0_4 = arith.constant 0 : index
    %5 = vector.load %arg4[%c0_3, %c0_4] : memref<1x128xf32, #tpu.memory_space<vmem>>, vector<1x128xf32>
    %6 = vector.broadcast %5 : vector<1x128xf32> to vector<64x128xf32>
    %7 = arith.addf %4, %6 : vector<64x128xf32>
    %c0_5 = arith.constant 0 : index
    %c0_6 = arith.constant 0 : index
    %8 = vector.load %arg1[%c0_5, %c0_6] : memref<64x32xf32, #tpu.memory_space<vmem>>, vector<64x32xf32>
    %9 = arith.truncf %8 : vector<64x32xf32> to vector<64x32xbf16>
    %c0_7 = arith.constant 0 : index
    %c0_8 = arith.constant 0 : index
    %10 = vector.load %arg5[%c0_7, %c0_8] : memref<32x128xf32, #tpu.memory_space<vmem>>, vector<32x128xf32>
    %11 = arith.truncf %10 : vector<32x128xf32> to vector<32x128xbf16>
    %cst_9 = arith.constant dense<0.000000e+00> : vector<64x128xf32>
    %12 = tpu.matmul %9, %11, %cst_9 {dimension_numbers = #tpu.dot_dimension_numbers<[1], [0], [0], [1], [0, 0, 1, 1], [], []>} : vector<64x32xbf16>, vector<32x128xbf16>, vector<64x128xf32> -> vector<64x128xf32>
    %c0_10 = arith.constant 0 : index
    %c0_11 = arith.constant 0 : index
    %13 = vector.load %arg7[%c0_10, %c0_11] : memref<1x128xf32, #tpu.memory_space<vmem>>, vector<1x128xf32>
    %14 = vector.broadcast %13 : vector<1x128xf32> to vector<64x128xf32>
    %15 = arith.addf %12, %14 : vector<64x128xf32>
    %16 = vector.shape_cast %7 : vector<64x128xf32> to vector<8x8x128xf32>
    %17 = vector.shape_cast %15 : vector<64x128xf32> to vector<8x8x128xf32>
    %c0_12 = arith.constant 0 : index
    %c0_13 = arith.constant 0 : index
    %18 = vector.load %arg3[%c0_12, %c0_13] : memref<32x128xf32, #tpu.memory_space<vmem>>, vector<32x128xf32>
    %19 = arith.truncf %18 : vector<32x128xf32> to vector<32x128xbf16>
    %c0_14 = arith.constant 0 : index
    %c0_15 = arith.constant 0 : index
    %20 = vector.load %arg6[%c0_14, %c0_15] : memref<32x128xf32, #tpu.memory_space<vmem>>, vector<32x128xf32>
    %21 = arith.truncf %20 : vector<32x128xf32> to vector<32x128xbf16>
    %22 = tpu.iota {dimensions = array<i32: 1>} : vector<8x128xi32>
    %c64_i32 = arith.constant 64 : i32
    %23 = vector.broadcast %c64_i32 : i32 to vector<8x128xi32>
    %24 = arith.cmpi sge, %22, %23 : vector<8x128xi32>
    %c96_i32 = arith.constant 96 : i32
    %25 = vector.broadcast %c96_i32 : i32 to vector<8x128xi32>
    %26 = arith.cmpi slt, %22, %25 : vector<8x128xi32>
    %27 = arith.andi %24, %26 : vector<8x128xi1>
    %cst_16 = arith.constant 1.000000e+00 : f32
    %cst_17 = arith.constant 5.000000e-01 : f32
    %28 = vector.broadcast %cst_16 : f32 to vector<8x128xf32>
    %29 = vector.broadcast %cst_17 : f32 to vector<8x128xf32>
    %30 = arith.select %27, %28, %29 : vector<8x128xi1>, vector<8x128xf32>
    %cst_18 = arith.constant 0.000000e+00 : f32
    %31 = vector.broadcast %cst_18 : f32 to vector<8x32xf32>
    %cst_19 = arith.constant 0.000000e+00 : f32
    %32 = vector.broadcast %cst_19 : f32 to vector<8x32xf32>
    %33 = vector.extract_strided_slice %16 {offsets = [0, 0, 0], sizes = [1, 8, 128], strides = [1, 1, 1]} : vector<8x8x128xf32> to vector<1x8x128xf32>
    %34 = vector.shape_cast %33 : vector<1x8x128xf32> to vector<8x128xf32>
    %35 = arith.truncf %31 : vector<8x32xf32> to vector<8x32xbf16>
    %cst_20 = arith.constant dense<0.000000e+00> : vector<8x128xf32>
    %36 = tpu.matmul %35, %19, %cst_20 {dimension_numbers = #tpu.dot_dimension_numbers<[1], [0], [0], [1], [0, 0, 1, 1], [], []>} : vector<8x32xbf16>, vector<32x128xbf16>, vector<8x128xf32> -> vector<8x128xf32>
    %37 = arith.addf %34, %36 : vector<8x128xf32>
    %38 = arith.mulf %37, %30 : vector<8x128xf32>
    %39 = math.tanh %38 : vector<8x128xf32>
    %cst_21 = arith.constant 5.000000e-01 : f32
    %40 = vector.broadcast %cst_21 : f32 to vector<8x128xf32>
    %41 = arith.mulf %40, %39 : vector<8x128xf32>
    %cst_22 = arith.constant 5.000000e-01 : f32
    %42 = vector.broadcast %cst_22 : f32 to vector<8x128xf32>
    %43 = arith.addf %41, %42 : vector<8x128xf32>
    %44 = arith.select %27, %39, %43 : vector<8x128xi1>, vector<8x128xf32>
    %45 = vector.extract_strided_slice %44 {offsets = [0, 0], sizes = [8, 32], strides = [1, 1]} : vector<8x128xf32> to vector<8x32xf32>
    %46 = vector.extract_strided_slice %44 {offsets = [0, 32], sizes = [8, 32], strides = [1, 1]} : vector<8x128xf32> to vector<8x32xf32>
    %47 = vector.extract_strided_slice %44 {offsets = [0, 64], sizes = [8, 32], strides = [1, 1]} : vector<8x128xf32> to vector<8x32xf32>
    %48 = vector.extract_strided_slice %44 {offsets = [0, 96], sizes = [8, 32], strides = [1, 1]} : vector<8x128xf32> to vector<8x32xf32>
    %49 = arith.mulf %46, %32 : vector<8x32xf32>
    %50 = arith.mulf %45, %47 : vector<8x32xf32>
    %51 = arith.addf %49, %50 : vector<8x32xf32>
    %52 = math.tanh %51 : vector<8x32xf32>
    %53 = arith.mulf %48, %52 : vector<8x32xf32>
    %54 = vector.extract_strided_slice %16 {offsets = [1, 0, 0], sizes = [1, 8, 128], strides = [1, 1, 1]} : vector<8x8x128xf32> to vector<1x8x128xf32>
    %55 = vector.shape_cast %54 : vector<1x8x128xf32> to vector<8x128xf32>
    %56 = arith.truncf %53 : vector<8x32xf32> to vector<8x32xbf16>
    %cst_23 = arith.constant dense<0.000000e+00> : vector<8x128xf32>
    %57 = tpu.matmul %56, %19, %cst_23 {dimension_numbers = #tpu.dot_dimension_numbers<[1], [0], [0], [1], [0, 0, 1, 1], [], []>} : vector<8x32xbf16>, vector<32x128xbf16>, vector<8x128xf32> -> vector<8x128xf32>
    %58 = arith.addf %55, %57 : vector<8x128xf32>
    %59 = arith.mulf %58, %30 : vector<8x128xf32>
    %60 = math.tanh %59 : vector<8x128xf32>
    %cst_24 = arith.constant 5.000000e-01 : f32
    %61 = vector.broadcast %cst_24 : f32 to vector<8x128xf32>
    %62 = arith.mulf %61, %60 : vector<8x128xf32>
    %cst_25 = arith.constant 5.000000e-01 : f32
    %63 = vector.broadcast %cst_25 : f32 to vector<8x128xf32>
    %64 = arith.addf %62, %63 : vector<8x128xf32>
    %65 = arith.select %27, %60, %64 : vector<8x128xi1>, vector<8x128xf32>
    %66 = vector.extract_strided_slice %65 {offsets = [0, 0], sizes = [8, 32], strides = [1, 1]} : vector<8x128xf32> to vector<8x32xf32>
    %67 = vector.extract_strided_slice %65 {offsets = [0, 32], sizes = [8, 32], strides = [1, 1]} : vector<8x128xf32> to vector<8x32xf32>
    %68 = vector.extract_strided_slice %65 {offsets = [0, 64], sizes = [8, 32], strides = [1, 1]} : vector<8x128xf32> to vector<8x32xf32>
    %69 = vector.extract_strided_slice %65 {offsets = [0, 96], sizes = [8, 32], strides = [1, 1]} : vector<8x128xf32> to vector<8x32xf32>
    %70 = arith.mulf %67, %51 : vector<8x32xf32>
    %71 = arith.mulf %66, %68 : vector<8x32xf32>
    %72 = arith.addf %70, %71 : vector<8x32xf32>
    %73 = math.tanh %72 : vector<8x32xf32>
    %74 = arith.mulf %69, %73 : vector<8x32xf32>
    %75 = vector.extract_strided_slice %16 {offsets = [2, 0, 0], sizes = [1, 8, 128], strides = [1, 1, 1]} : vector<8x8x128xf32> to vector<1x8x128xf32>
    %76 = vector.shape_cast %75 : vector<1x8x128xf32> to vector<8x128xf32>
    %77 = arith.truncf %74 : vector<8x32xf32> to vector<8x32xbf16>
    %cst_26 = arith.constant dense<0.000000e+00> : vector<8x128xf32>
    %78 = tpu.matmul %77, %19, %cst_26 {dimension_numbers = #tpu.dot_dimension_numbers<[1], [0], [0], [1], [0, 0, 1, 1], [], []>} : vector<8x32xbf16>, vector<32x128xbf16>, vector<8x128xf32> -> vector<8x128xf32>
    %79 = arith.addf %76, %78 : vector<8x128xf32>
    %80 = arith.mulf %79, %30 : vector<8x128xf32>
    %81 = math.tanh %80 : vector<8x128xf32>
    %cst_27 = arith.constant 5.000000e-01 : f32
    %82 = vector.broadcast %cst_27 : f32 to vector<8x128xf32>
    %83 = arith.mulf %82, %81 : vector<8x128xf32>
    %cst_28 = arith.constant 5.000000e-01 : f32
    %84 = vector.broadcast %cst_28 : f32 to vector<8x128xf32>
    %85 = arith.addf %83, %84 : vector<8x128xf32>
    %86 = arith.select %27, %81, %85 : vector<8x128xi1>, vector<8x128xf32>
    %87 = vector.extract_strided_slice %86 {offsets = [0, 0], sizes = [8, 32], strides = [1, 1]} : vector<8x128xf32> to vector<8x32xf32>
    %88 = vector.extract_strided_slice %86 {offsets = [0, 32], sizes = [8, 32], strides = [1, 1]} : vector<8x128xf32> to vector<8x32xf32>
    %89 = vector.extract_strided_slice %86 {offsets = [0, 64], sizes = [8, 32], strides = [1, 1]} : vector<8x128xf32> to vector<8x32xf32>
    %90 = vector.extract_strided_slice %86 {offsets = [0, 96], sizes = [8, 32], strides = [1, 1]} : vector<8x128xf32> to vector<8x32xf32>
    %91 = arith.mulf %88, %72 : vector<8x32xf32>
    %92 = arith.mulf %87, %89 : vector<8x32xf32>
    %93 = arith.addf %91, %92 : vector<8x32xf32>
    %94 = math.tanh %93 : vector<8x32xf32>
    %95 = arith.mulf %90, %94 : vector<8x32xf32>
    %96 = vector.extract_strided_slice %16 {offsets = [3, 0, 0], sizes = [1, 8, 128], strides = [1, 1, 1]} : vector<8x8x128xf32> to vector<1x8x128xf32>
    %97 = vector.shape_cast %96 : vector<1x8x128xf32> to vector<8x128xf32>
    %98 = arith.truncf %95 : vector<8x32xf32> to vector<8x32xbf16>
    %cst_29 = arith.constant dense<0.000000e+00> : vector<8x128xf32>
    %99 = tpu.matmul %98, %19, %cst_29 {dimension_numbers = #tpu.dot_dimension_numbers<[1], [0], [0], [1], [0, 0, 1, 1], [], []>} : vector<8x32xbf16>, vector<32x128xbf16>, vector<8x128xf32> -> vector<8x128xf32>
    %100 = arith.addf %97, %99 : vector<8x128xf32>
    %101 = arith.mulf %100, %30 : vector<8x128xf32>
    %102 = math.tanh %101 : vector<8x128xf32>
    %cst_30 = arith.constant 5.000000e-01 : f32
    %103 = vector.broadcast %cst_30 : f32 to vector<8x128xf32>
    %104 = arith.mulf %103, %102 : vector<8x128xf32>
    %cst_31 = arith.constant 5.000000e-01 : f32
    %105 = vector.broadcast %cst_31 : f32 to vector<8x128xf32>
    %106 = arith.addf %104, %105 : vector<8x128xf32>
    %107 = arith.select %27, %102, %106 : vector<8x128xi1>, vector<8x128xf32>
    %108 = vector.extract_strided_slice %107 {offsets = [0, 0], sizes = [8, 32], strides = [1, 1]} : vector<8x128xf32> to vector<8x32xf32>
    %109 = vector.extract_strided_slice %107 {offsets = [0, 32], sizes = [8, 32], strides = [1, 1]} : vector<8x128xf32> to vector<8x32xf32>
    %110 = vector.extract_strided_slice %107 {offsets = [0, 64], sizes = [8, 32], strides = [1, 1]} : vector<8x128xf32> to vector<8x32xf32>
    %111 = vector.extract_strided_slice %107 {offsets = [0, 96], sizes = [8, 32], strides = [1, 1]} : vector<8x128xf32> to vector<8x32xf32>
    %112 = arith.mulf %109, %93 : vector<8x32xf32>
    %113 = arith.mulf %108, %110 : vector<8x32xf32>
    %114 = arith.addf %112, %113 : vector<8x32xf32>
    %115 = math.tanh %114 : vector<8x32xf32>
    %116 = arith.mulf %111, %115 : vector<8x32xf32>
    %117 = vector.extract_strided_slice %16 {offsets = [4, 0, 0], sizes = [1, 8, 128], strides = [1, 1, 1]} : vector<8x8x128xf32> to vector<1x8x128xf32>
    %118 = vector.shape_cast %117 : vector<1x8x128xf32> to vector<8x128xf32>
    %119 = arith.truncf %116 : vector<8x32xf32> to vector<8x32xbf16>
    %cst_32 = arith.constant dense<0.000000e+00> : vector<8x128xf32>
    %120 = tpu.matmul %119, %19, %cst_32 {dimension_numbers = #tpu.dot_dimension_numbers<[1], [0], [0], [1], [0, 0, 1, 1], [], []>} : vector<8x32xbf16>, vector<32x128xbf16>, vector<8x128xf32> -> vector<8x128xf32>
    %121 = arith.addf %118, %120 : vector<8x128xf32>
    %122 = arith.mulf %121, %30 : vector<8x128xf32>
    %123 = math.tanh %122 : vector<8x128xf32>
    %cst_33 = arith.constant 5.000000e-01 : f32
    %124 = vector.broadcast %cst_33 : f32 to vector<8x128xf32>
    %125 = arith.mulf %124, %123 : vector<8x128xf32>
    %cst_34 = arith.constant 5.000000e-01 : f32
    %126 = vector.broadcast %cst_34 : f32 to vector<8x128xf32>
    %127 = arith.addf %125, %126 : vector<8x128xf32>
    %128 = arith.select %27, %123, %127 : vector<8x128xi1>, vector<8x128xf32>
    %129 = vector.extract_strided_slice %128 {offsets = [0, 0], sizes = [8, 32], strides = [1, 1]} : vector<8x128xf32> to vector<8x32xf32>
    %130 = vector.extract_strided_slice %128 {offsets = [0, 32], sizes = [8, 32], strides = [1, 1]} : vector<8x128xf32> to vector<8x32xf32>
    %131 = vector.extract_strided_slice %128 {offsets = [0, 64], sizes = [8, 32], strides = [1, 1]} : vector<8x128xf32> to vector<8x32xf32>
    %132 = vector.extract_strided_slice %128 {offsets = [0, 96], sizes = [8, 32], strides = [1, 1]} : vector<8x128xf32> to vector<8x32xf32>
    %133 = arith.mulf %130, %114 : vector<8x32xf32>
    %134 = arith.mulf %129, %131 : vector<8x32xf32>
    %135 = arith.addf %133, %134 : vector<8x32xf32>
    %136 = math.tanh %135 : vector<8x32xf32>
    %137 = arith.mulf %132, %136 : vector<8x32xf32>
    %138 = vector.extract_strided_slice %16 {offsets = [5, 0, 0], sizes = [1, 8, 128], strides = [1, 1, 1]} : vector<8x8x128xf32> to vector<1x8x128xf32>
    %139 = vector.shape_cast %138 : vector<1x8x128xf32> to vector<8x128xf32>
    %140 = arith.truncf %137 : vector<8x32xf32> to vector<8x32xbf16>
    %cst_35 = arith.constant dense<0.000000e+00> : vector<8x128xf32>
    %141 = tpu.matmul %140, %19, %cst_35 {dimension_numbers = #tpu.dot_dimension_numbers<[1], [0], [0], [1], [0, 0, 1, 1], [], []>} : vector<8x32xbf16>, vector<32x128xbf16>, vector<8x128xf32> -> vector<8x128xf32>
    %142 = arith.addf %139, %141 : vector<8x128xf32>
    %143 = arith.mulf %142, %30 : vector<8x128xf32>
    %144 = math.tanh %143 : vector<8x128xf32>
    %cst_36 = arith.constant 5.000000e-01 : f32
    %145 = vector.broadcast %cst_36 : f32 to vector<8x128xf32>
    %146 = arith.mulf %145, %144 : vector<8x128xf32>
    %cst_37 = arith.constant 5.000000e-01 : f32
    %147 = vector.broadcast %cst_37 : f32 to vector<8x128xf32>
    %148 = arith.addf %146, %147 : vector<8x128xf32>
    %149 = arith.select %27, %144, %148 : vector<8x128xi1>, vector<8x128xf32>
    %150 = vector.extract_strided_slice %149 {offsets = [0, 0], sizes = [8, 32], strides = [1, 1]} : vector<8x128xf32> to vector<8x32xf32>
    %151 = vector.extract_strided_slice %149 {offsets = [0, 32], sizes = [8, 32], strides = [1, 1]} : vector<8x128xf32> to vector<8x32xf32>
    %152 = vector.extract_strided_slice %149 {offsets = [0, 64], sizes = [8, 32], strides = [1, 1]} : vector<8x128xf32> to vector<8x32xf32>
    %153 = vector.extract_strided_slice %149 {offsets = [0, 96], sizes = [8, 32], strides = [1, 1]} : vector<8x128xf32> to vector<8x32xf32>
    %154 = arith.mulf %151, %135 : vector<8x32xf32>
    %155 = arith.mulf %150, %152 : vector<8x32xf32>
    %156 = arith.addf %154, %155 : vector<8x32xf32>
    %157 = math.tanh %156 : vector<8x32xf32>
    %158 = arith.mulf %153, %157 : vector<8x32xf32>
    %159 = vector.extract_strided_slice %16 {offsets = [6, 0, 0], sizes = [1, 8, 128], strides = [1, 1, 1]} : vector<8x8x128xf32> to vector<1x8x128xf32>
    %160 = vector.shape_cast %159 : vector<1x8x128xf32> to vector<8x128xf32>
    %161 = arith.truncf %158 : vector<8x32xf32> to vector<8x32xbf16>
    %cst_38 = arith.constant dense<0.000000e+00> : vector<8x128xf32>
    %162 = tpu.matmul %161, %19, %cst_38 {dimension_numbers = #tpu.dot_dimension_numbers<[1], [0], [0], [1], [0, 0, 1, 1], [], []>} : vector<8x32xbf16>, vector<32x128xbf16>, vector<8x128xf32> -> vector<8x128xf32>
    %163 = arith.addf %160, %162 : vector<8x128xf32>
    %164 = arith.mulf %163, %30 : vector<8x128xf32>
    %165 = math.tanh %164 : vector<8x128xf32>
    %cst_39 = arith.constant 5.000000e-01 : f32
    %166 = vector.broadcast %cst_39 : f32 to vector<8x128xf32>
    %167 = arith.mulf %166, %165 : vector<8x128xf32>
    %cst_40 = arith.constant 5.000000e-01 : f32
    %168 = vector.broadcast %cst_40 : f32 to vector<8x128xf32>
    %169 = arith.addf %167, %168 : vector<8x128xf32>
    %170 = arith.select %27, %165, %169 : vector<8x128xi1>, vector<8x128xf32>
    %171 = vector.extract_strided_slice %170 {offsets = [0, 0], sizes = [8, 32], strides = [1, 1]} : vector<8x128xf32> to vector<8x32xf32>
    %172 = vector.extract_strided_slice %170 {offsets = [0, 32], sizes = [8, 32], strides = [1, 1]} : vector<8x128xf32> to vector<8x32xf32>
    %173 = vector.extract_strided_slice %170 {offsets = [0, 64], sizes = [8, 32], strides = [1, 1]} : vector<8x128xf32> to vector<8x32xf32>
    %174 = vector.extract_strided_slice %170 {offsets = [0, 96], sizes = [8, 32], strides = [1, 1]} : vector<8x128xf32> to vector<8x32xf32>
    %175 = arith.mulf %172, %156 : vector<8x32xf32>
    %176 = arith.mulf %171, %173 : vector<8x32xf32>
    %177 = arith.addf %175, %176 : vector<8x32xf32>
    %178 = math.tanh %177 : vector<8x32xf32>
    %179 = arith.mulf %174, %178 : vector<8x32xf32>
    %180 = vector.extract_strided_slice %16 {offsets = [7, 0, 0], sizes = [1, 8, 128], strides = [1, 1, 1]} : vector<8x8x128xf32> to vector<1x8x128xf32>
    %181 = vector.shape_cast %180 : vector<1x8x128xf32> to vector<8x128xf32>
    %182 = arith.truncf %179 : vector<8x32xf32> to vector<8x32xbf16>
    %cst_41 = arith.constant dense<0.000000e+00> : vector<8x128xf32>
    %183 = tpu.matmul %182, %19, %cst_41 {dimension_numbers = #tpu.dot_dimension_numbers<[1], [0], [0], [1], [0, 0, 1, 1], [], []>} : vector<8x32xbf16>, vector<32x128xbf16>, vector<8x128xf32> -> vector<8x128xf32>
    %184 = arith.addf %181, %183 : vector<8x128xf32>
    %185 = arith.mulf %184, %30 : vector<8x128xf32>
    %186 = math.tanh %185 : vector<8x128xf32>
    %cst_42 = arith.constant 5.000000e-01 : f32
    %187 = vector.broadcast %cst_42 : f32 to vector<8x128xf32>
    %188 = arith.mulf %187, %186 : vector<8x128xf32>
    %cst_43 = arith.constant 5.000000e-01 : f32
    %189 = vector.broadcast %cst_43 : f32 to vector<8x128xf32>
    %190 = arith.addf %188, %189 : vector<8x128xf32>
    %191 = arith.select %27, %186, %190 : vector<8x128xi1>, vector<8x128xf32>
    %192 = vector.extract_strided_slice %191 {offsets = [0, 0], sizes = [8, 32], strides = [1, 1]} : vector<8x128xf32> to vector<8x32xf32>
    %193 = vector.extract_strided_slice %191 {offsets = [0, 32], sizes = [8, 32], strides = [1, 1]} : vector<8x128xf32> to vector<8x32xf32>
    %194 = vector.extract_strided_slice %191 {offsets = [0, 64], sizes = [8, 32], strides = [1, 1]} : vector<8x128xf32> to vector<8x32xf32>
    %195 = vector.extract_strided_slice %191 {offsets = [0, 96], sizes = [8, 32], strides = [1, 1]} : vector<8x128xf32> to vector<8x32xf32>
    %196 = arith.mulf %193, %177 : vector<8x32xf32>
    %197 = arith.mulf %192, %194 : vector<8x32xf32>
    %198 = arith.addf %196, %197 : vector<8x32xf32>
    %199 = math.tanh %198 : vector<8x32xf32>
    %200 = arith.mulf %195, %199 : vector<8x32xf32>
    %201 = vector.shape_cast %53 : vector<8x32xf32> to vector<8x1x32xf32>
    %202 = vector.shape_cast %74 : vector<8x32xf32> to vector<8x1x32xf32>
    %203 = vector.shape_cast %95 : vector<8x32xf32> to vector<8x1x32xf32>
    %204 = vector.shape_cast %116 : vector<8x32xf32> to vector<8x1x32xf32>
    %205 = vector.shape_cast %137 : vector<8x32xf32> to vector<8x1x32xf32>
    %206 = vector.shape_cast %158 : vector<8x32xf32> to vector<8x1x32xf32>
    %207 = vector.shape_cast %179 : vector<8x32xf32> to vector<8x1x32xf32>
    %208 = vector.shape_cast %200 : vector<8x32xf32> to vector<8x1x32xf32>
    %209 = tpu.concatenate %201, %202, %203, %204, %205, %206, %207, %208 in 1 : vector<8x1x32xf32>, vector<8x1x32xf32>, vector<8x1x32xf32>, vector<8x1x32xf32>, vector<8x1x32xf32>, vector<8x1x32xf32>, vector<8x1x32xf32>, vector<8x1x32xf32> -> vector<8x8x32xf32>
    %210 = vector.extract_strided_slice %17 {offsets = [0, 0, 0], sizes = [1, 8, 128], strides = [1, 1, 1]} : vector<8x8x128xf32> to vector<1x8x128xf32>
    %211 = vector.shape_cast %210 : vector<1x8x128xf32> to vector<8x128xf32>
    %212 = arith.truncf %200 : vector<8x32xf32> to vector<8x32xbf16>
    %cst_44 = arith.constant dense<0.000000e+00> : vector<8x128xf32>
    %213 = tpu.matmul %212, %21, %cst_44 {dimension_numbers = #tpu.dot_dimension_numbers<[1], [0], [0], [1], [0, 0, 1, 1], [], []>} : vector<8x32xbf16>, vector<32x128xbf16>, vector<8x128xf32> -> vector<8x128xf32>
    %214 = arith.addf %211, %213 : vector<8x128xf32>
    %215 = arith.mulf %214, %30 : vector<8x128xf32>
    %216 = math.tanh %215 : vector<8x128xf32>
    %cst_45 = arith.constant 5.000000e-01 : f32
    %217 = vector.broadcast %cst_45 : f32 to vector<8x128xf32>
    %218 = arith.mulf %217, %216 : vector<8x128xf32>
    %cst_46 = arith.constant 5.000000e-01 : f32
    %219 = vector.broadcast %cst_46 : f32 to vector<8x128xf32>
    %220 = arith.addf %218, %219 : vector<8x128xf32>
    %221 = arith.select %27, %216, %220 : vector<8x128xi1>, vector<8x128xf32>
    %222 = vector.extract_strided_slice %221 {offsets = [0, 0], sizes = [8, 32], strides = [1, 1]} : vector<8x128xf32> to vector<8x32xf32>
    %223 = vector.extract_strided_slice %221 {offsets = [0, 32], sizes = [8, 32], strides = [1, 1]} : vector<8x128xf32> to vector<8x32xf32>
    %224 = vector.extract_strided_slice %221 {offsets = [0, 64], sizes = [8, 32], strides = [1, 1]} : vector<8x128xf32> to vector<8x32xf32>
    %225 = vector.extract_strided_slice %221 {offsets = [0, 96], sizes = [8, 32], strides = [1, 1]} : vector<8x128xf32> to vector<8x32xf32>
    %226 = arith.mulf %223, %198 : vector<8x32xf32>
    %227 = arith.mulf %222, %224 : vector<8x32xf32>
    %228 = arith.addf %226, %227 : vector<8x32xf32>
    %229 = math.tanh %228 : vector<8x32xf32>
    %230 = arith.mulf %225, %229 : vector<8x32xf32>
    %231 = vector.extract_strided_slice %17 {offsets = [1, 0, 0], sizes = [1, 8, 128], strides = [1, 1, 1]} : vector<8x8x128xf32> to vector<1x8x128xf32>
    %232 = vector.shape_cast %231 : vector<1x8x128xf32> to vector<8x128xf32>
    %233 = arith.truncf %230 : vector<8x32xf32> to vector<8x32xbf16>
    %cst_47 = arith.constant dense<0.000000e+00> : vector<8x128xf32>
    %234 = tpu.matmul %233, %21, %cst_47 {dimension_numbers = #tpu.dot_dimension_numbers<[1], [0], [0], [1], [0, 0, 1, 1], [], []>} : vector<8x32xbf16>, vector<32x128xbf16>, vector<8x128xf32> -> vector<8x128xf32>
    %235 = arith.addf %232, %234 : vector<8x128xf32>
    %236 = arith.mulf %235, %30 : vector<8x128xf32>
    %237 = math.tanh %236 : vector<8x128xf32>
    %cst_48 = arith.constant 5.000000e-01 : f32
    %238 = vector.broadcast %cst_48 : f32 to vector<8x128xf32>
    %239 = arith.mulf %238, %237 : vector<8x128xf32>
    %cst_49 = arith.constant 5.000000e-01 : f32
    %240 = vector.broadcast %cst_49 : f32 to vector<8x128xf32>
    %241 = arith.addf %239, %240 : vector<8x128xf32>
    %242 = arith.select %27, %237, %241 : vector<8x128xi1>, vector<8x128xf32>
    %243 = vector.extract_strided_slice %242 {offsets = [0, 0], sizes = [8, 32], strides = [1, 1]} : vector<8x128xf32> to vector<8x32xf32>
    %244 = vector.extract_strided_slice %242 {offsets = [0, 32], sizes = [8, 32], strides = [1, 1]} : vector<8x128xf32> to vector<8x32xf32>
    %245 = vector.extract_strided_slice %242 {offsets = [0, 64], sizes = [8, 32], strides = [1, 1]} : vector<8x128xf32> to vector<8x32xf32>
    %246 = vector.extract_strided_slice %242 {offsets = [0, 96], sizes = [8, 32], strides = [1, 1]} : vector<8x128xf32> to vector<8x32xf32>
    %247 = arith.mulf %244, %228 : vector<8x32xf32>
    %248 = arith.mulf %243, %245 : vector<8x32xf32>
    %249 = arith.addf %247, %248 : vector<8x32xf32>
    %250 = math.tanh %249 : vector<8x32xf32>
    %251 = arith.mulf %246, %250 : vector<8x32xf32>
    %252 = vector.extract_strided_slice %17 {offsets = [2, 0, 0], sizes = [1, 8, 128], strides = [1, 1, 1]} : vector<8x8x128xf32> to vector<1x8x128xf32>
    %253 = vector.shape_cast %252 : vector<1x8x128xf32> to vector<8x128xf32>
    %254 = arith.truncf %251 : vector<8x32xf32> to vector<8x32xbf16>
    %cst_50 = arith.constant dense<0.000000e+00> : vector<8x128xf32>
    %255 = tpu.matmul %254, %21, %cst_50 {dimension_numbers = #tpu.dot_dimension_numbers<[1], [0], [0], [1], [0, 0, 1, 1], [], []>} : vector<8x32xbf16>, vector<32x128xbf16>, vector<8x128xf32> -> vector<8x128xf32>
    %256 = arith.addf %253, %255 : vector<8x128xf32>
    %257 = arith.mulf %256, %30 : vector<8x128xf32>
    %258 = math.tanh %257 : vector<8x128xf32>
    %cst_51 = arith.constant 5.000000e-01 : f32
    %259 = vector.broadcast %cst_51 : f32 to vector<8x128xf32>
    %260 = arith.mulf %259, %258 : vector<8x128xf32>
    %cst_52 = arith.constant 5.000000e-01 : f32
    %261 = vector.broadcast %cst_52 : f32 to vector<8x128xf32>
    %262 = arith.addf %260, %261 : vector<8x128xf32>
    %263 = arith.select %27, %258, %262 : vector<8x128xi1>, vector<8x128xf32>
    %264 = vector.extract_strided_slice %263 {offsets = [0, 0], sizes = [8, 32], strides = [1, 1]} : vector<8x128xf32> to vector<8x32xf32>
    %265 = vector.extract_strided_slice %263 {offsets = [0, 32], sizes = [8, 32], strides = [1, 1]} : vector<8x128xf32> to vector<8x32xf32>
    %266 = vector.extract_strided_slice %263 {offsets = [0, 64], sizes = [8, 32], strides = [1, 1]} : vector<8x128xf32> to vector<8x32xf32>
    %267 = vector.extract_strided_slice %263 {offsets = [0, 96], sizes = [8, 32], strides = [1, 1]} : vector<8x128xf32> to vector<8x32xf32>
    %268 = arith.mulf %265, %249 : vector<8x32xf32>
    %269 = arith.mulf %264, %266 : vector<8x32xf32>
    %270 = arith.addf %268, %269 : vector<8x32xf32>
    %271 = math.tanh %270 : vector<8x32xf32>
    %272 = arith.mulf %267, %271 : vector<8x32xf32>
    %273 = vector.extract_strided_slice %17 {offsets = [3, 0, 0], sizes = [1, 8, 128], strides = [1, 1, 1]} : vector<8x8x128xf32> to vector<1x8x128xf32>
    %274 = vector.shape_cast %273 : vector<1x8x128xf32> to vector<8x128xf32>
    %275 = arith.truncf %272 : vector<8x32xf32> to vector<8x32xbf16>
    %cst_53 = arith.constant dense<0.000000e+00> : vector<8x128xf32>
    %276 = tpu.matmul %275, %21, %cst_53 {dimension_numbers = #tpu.dot_dimension_numbers<[1], [0], [0], [1], [0, 0, 1, 1], [], []>} : vector<8x32xbf16>, vector<32x128xbf16>, vector<8x128xf32> -> vector<8x128xf32>
    %277 = arith.addf %274, %276 : vector<8x128xf32>
    %278 = arith.mulf %277, %30 : vector<8x128xf32>
    %279 = math.tanh %278 : vector<8x128xf32>
    %cst_54 = arith.constant 5.000000e-01 : f32
    %280 = vector.broadcast %cst_54 : f32 to vector<8x128xf32>
    %281 = arith.mulf %280, %279 : vector<8x128xf32>
    %cst_55 = arith.constant 5.000000e-01 : f32
    %282 = vector.broadcast %cst_55 : f32 to vector<8x128xf32>
    %283 = arith.addf %281, %282 : vector<8x128xf32>
    %284 = arith.select %27, %279, %283 : vector<8x128xi1>, vector<8x128xf32>
    %285 = vector.extract_strided_slice %284 {offsets = [0, 0], sizes = [8, 32], strides = [1, 1]} : vector<8x128xf32> to vector<8x32xf32>
    %286 = vector.extract_strided_slice %284 {offsets = [0, 32], sizes = [8, 32], strides = [1, 1]} : vector<8x128xf32> to vector<8x32xf32>
    %287 = vector.extract_strided_slice %284 {offsets = [0, 64], sizes = [8, 32], strides = [1, 1]} : vector<8x128xf32> to vector<8x32xf32>
    %288 = vector.extract_strided_slice %284 {offsets = [0, 96], sizes = [8, 32], strides = [1, 1]} : vector<8x128xf32> to vector<8x32xf32>
    %289 = arith.mulf %286, %270 : vector<8x32xf32>
    %290 = arith.mulf %285, %287 : vector<8x32xf32>
    %291 = arith.addf %289, %290 : vector<8x32xf32>
    %292 = math.tanh %291 : vector<8x32xf32>
    %293 = arith.mulf %288, %292 : vector<8x32xf32>
    %294 = vector.extract_strided_slice %17 {offsets = [4, 0, 0], sizes = [1, 8, 128], strides = [1, 1, 1]} : vector<8x8x128xf32> to vector<1x8x128xf32>
    %295 = vector.shape_cast %294 : vector<1x8x128xf32> to vector<8x128xf32>
    %296 = arith.truncf %293 : vector<8x32xf32> to vector<8x32xbf16>
    %cst_56 = arith.constant dense<0.000000e+00> : vector<8x128xf32>
    %297 = tpu.matmul %296, %21, %cst_56 {dimension_numbers = #tpu.dot_dimension_numbers<[1], [0], [0], [1], [0, 0, 1, 1], [], []>} : vector<8x32xbf16>, vector<32x128xbf16>, vector<8x128xf32> -> vector<8x128xf32>
    %298 = arith.addf %295, %297 : vector<8x128xf32>
    %299 = arith.mulf %298, %30 : vector<8x128xf32>
    %300 = math.tanh %299 : vector<8x128xf32>
    %cst_57 = arith.constant 5.000000e-01 : f32
    %301 = vector.broadcast %cst_57 : f32 to vector<8x128xf32>
    %302 = arith.mulf %301, %300 : vector<8x128xf32>
    %cst_58 = arith.constant 5.000000e-01 : f32
    %303 = vector.broadcast %cst_58 : f32 to vector<8x128xf32>
    %304 = arith.addf %302, %303 : vector<8x128xf32>
    %305 = arith.select %27, %300, %304 : vector<8x128xi1>, vector<8x128xf32>
    %306 = vector.extract_strided_slice %305 {offsets = [0, 0], sizes = [8, 32], strides = [1, 1]} : vector<8x128xf32> to vector<8x32xf32>
    %307 = vector.extract_strided_slice %305 {offsets = [0, 32], sizes = [8, 32], strides = [1, 1]} : vector<8x128xf32> to vector<8x32xf32>
    %308 = vector.extract_strided_slice %305 {offsets = [0, 64], sizes = [8, 32], strides = [1, 1]} : vector<8x128xf32> to vector<8x32xf32>
    %309 = vector.extract_strided_slice %305 {offsets = [0, 96], sizes = [8, 32], strides = [1, 1]} : vector<8x128xf32> to vector<8x32xf32>
    %310 = arith.mulf %307, %291 : vector<8x32xf32>
    %311 = arith.mulf %306, %308 : vector<8x32xf32>
    %312 = arith.addf %310, %311 : vector<8x32xf32>
    %313 = math.tanh %312 : vector<8x32xf32>
    %314 = arith.mulf %309, %313 : vector<8x32xf32>
    %315 = vector.extract_strided_slice %17 {offsets = [5, 0, 0], sizes = [1, 8, 128], strides = [1, 1, 1]} : vector<8x8x128xf32> to vector<1x8x128xf32>
    %316 = vector.shape_cast %315 : vector<1x8x128xf32> to vector<8x128xf32>
    %317 = arith.truncf %314 : vector<8x32xf32> to vector<8x32xbf16>
    %cst_59 = arith.constant dense<0.000000e+00> : vector<8x128xf32>
    %318 = tpu.matmul %317, %21, %cst_59 {dimension_numbers = #tpu.dot_dimension_numbers<[1], [0], [0], [1], [0, 0, 1, 1], [], []>} : vector<8x32xbf16>, vector<32x128xbf16>, vector<8x128xf32> -> vector<8x128xf32>
    %319 = arith.addf %316, %318 : vector<8x128xf32>
    %320 = arith.mulf %319, %30 : vector<8x128xf32>
    %321 = math.tanh %320 : vector<8x128xf32>
    %cst_60 = arith.constant 5.000000e-01 : f32
    %322 = vector.broadcast %cst_60 : f32 to vector<8x128xf32>
    %323 = arith.mulf %322, %321 : vector<8x128xf32>
    %cst_61 = arith.constant 5.000000e-01 : f32
    %324 = vector.broadcast %cst_61 : f32 to vector<8x128xf32>
    %325 = arith.addf %323, %324 : vector<8x128xf32>
    %326 = arith.select %27, %321, %325 : vector<8x128xi1>, vector<8x128xf32>
    %327 = vector.extract_strided_slice %326 {offsets = [0, 0], sizes = [8, 32], strides = [1, 1]} : vector<8x128xf32> to vector<8x32xf32>
    %328 = vector.extract_strided_slice %326 {offsets = [0, 32], sizes = [8, 32], strides = [1, 1]} : vector<8x128xf32> to vector<8x32xf32>
    %329 = vector.extract_strided_slice %326 {offsets = [0, 64], sizes = [8, 32], strides = [1, 1]} : vector<8x128xf32> to vector<8x32xf32>
    %330 = vector.extract_strided_slice %326 {offsets = [0, 96], sizes = [8, 32], strides = [1, 1]} : vector<8x128xf32> to vector<8x32xf32>
    %331 = arith.mulf %328, %312 : vector<8x32xf32>
    %332 = arith.mulf %327, %329 : vector<8x32xf32>
    %333 = arith.addf %331, %332 : vector<8x32xf32>
    %334 = math.tanh %333 : vector<8x32xf32>
    %335 = arith.mulf %330, %334 : vector<8x32xf32>
    %336 = vector.extract_strided_slice %17 {offsets = [6, 0, 0], sizes = [1, 8, 128], strides = [1, 1, 1]} : vector<8x8x128xf32> to vector<1x8x128xf32>
    %337 = vector.shape_cast %336 : vector<1x8x128xf32> to vector<8x128xf32>
    %338 = arith.truncf %335 : vector<8x32xf32> to vector<8x32xbf16>
    %cst_62 = arith.constant dense<0.000000e+00> : vector<8x128xf32>
    %339 = tpu.matmul %338, %21, %cst_62 {dimension_numbers = #tpu.dot_dimension_numbers<[1], [0], [0], [1], [0, 0, 1, 1], [], []>} : vector<8x32xbf16>, vector<32x128xbf16>, vector<8x128xf32> -> vector<8x128xf32>
    %340 = arith.addf %337, %339 : vector<8x128xf32>
    %341 = arith.mulf %340, %30 : vector<8x128xf32>
    %342 = math.tanh %341 : vector<8x128xf32>
    %cst_63 = arith.constant 5.000000e-01 : f32
    %343 = vector.broadcast %cst_63 : f32 to vector<8x128xf32>
    %344 = arith.mulf %343, %342 : vector<8x128xf32>
    %cst_64 = arith.constant 5.000000e-01 : f32
    %345 = vector.broadcast %cst_64 : f32 to vector<8x128xf32>
    %346 = arith.addf %344, %345 : vector<8x128xf32>
    %347 = arith.select %27, %342, %346 : vector<8x128xi1>, vector<8x128xf32>
    %348 = vector.extract_strided_slice %347 {offsets = [0, 0], sizes = [8, 32], strides = [1, 1]} : vector<8x128xf32> to vector<8x32xf32>
    %349 = vector.extract_strided_slice %347 {offsets = [0, 32], sizes = [8, 32], strides = [1, 1]} : vector<8x128xf32> to vector<8x32xf32>
    %350 = vector.extract_strided_slice %347 {offsets = [0, 64], sizes = [8, 32], strides = [1, 1]} : vector<8x128xf32> to vector<8x32xf32>
    %351 = vector.extract_strided_slice %347 {offsets = [0, 96], sizes = [8, 32], strides = [1, 1]} : vector<8x128xf32> to vector<8x32xf32>
    %352 = arith.mulf %349, %333 : vector<8x32xf32>
    %353 = arith.mulf %348, %350 : vector<8x32xf32>
    %354 = arith.addf %352, %353 : vector<8x32xf32>
    %355 = math.tanh %354 : vector<8x32xf32>
    %356 = arith.mulf %351, %355 : vector<8x32xf32>
    %357 = vector.extract_strided_slice %17 {offsets = [7, 0, 0], sizes = [1, 8, 128], strides = [1, 1, 1]} : vector<8x8x128xf32> to vector<1x8x128xf32>
    %358 = vector.shape_cast %357 : vector<1x8x128xf32> to vector<8x128xf32>
    %359 = arith.truncf %356 : vector<8x32xf32> to vector<8x32xbf16>
    %cst_65 = arith.constant dense<0.000000e+00> : vector<8x128xf32>
    %360 = tpu.matmul %359, %21, %cst_65 {dimension_numbers = #tpu.dot_dimension_numbers<[1], [0], [0], [1], [0, 0, 1, 1], [], []>} : vector<8x32xbf16>, vector<32x128xbf16>, vector<8x128xf32> -> vector<8x128xf32>
    %361 = arith.addf %358, %360 : vector<8x128xf32>
    %362 = arith.mulf %361, %30 : vector<8x128xf32>
    %363 = math.tanh %362 : vector<8x128xf32>
    %cst_66 = arith.constant 5.000000e-01 : f32
    %364 = vector.broadcast %cst_66 : f32 to vector<8x128xf32>
    %365 = arith.mulf %364, %363 : vector<8x128xf32>
    %cst_67 = arith.constant 5.000000e-01 : f32
    %366 = vector.broadcast %cst_67 : f32 to vector<8x128xf32>
    %367 = arith.addf %365, %366 : vector<8x128xf32>
    %368 = arith.select %27, %363, %367 : vector<8x128xi1>, vector<8x128xf32>
    %369 = vector.extract_strided_slice %368 {offsets = [0, 0], sizes = [8, 32], strides = [1, 1]} : vector<8x128xf32> to vector<8x32xf32>
    %370 = vector.extract_strided_slice %368 {offsets = [0, 32], sizes = [8, 32], strides = [1, 1]} : vector<8x128xf32> to vector<8x32xf32>
    %371 = vector.extract_strided_slice %368 {offsets = [0, 64], sizes = [8, 32], strides = [1, 1]} : vector<8x128xf32> to vector<8x32xf32>
    %372 = vector.extract_strided_slice %368 {offsets = [0, 96], sizes = [8, 32], strides = [1, 1]} : vector<8x128xf32> to vector<8x32xf32>
    %373 = arith.mulf %370, %354 : vector<8x32xf32>
    %374 = arith.mulf %369, %371 : vector<8x32xf32>
    %375 = arith.addf %373, %374 : vector<8x32xf32>
    %376 = math.tanh %375 : vector<8x32xf32>
    %377 = arith.mulf %372, %376 : vector<8x32xf32>
    %378 = vector.shape_cast %230 : vector<8x32xf32> to vector<8x1x32xf32>
    %379 = vector.shape_cast %251 : vector<8x32xf32> to vector<8x1x32xf32>
    %380 = vector.shape_cast %272 : vector<8x32xf32> to vector<8x1x32xf32>
    %381 = vector.shape_cast %293 : vector<8x32xf32> to vector<8x1x32xf32>
    %382 = vector.shape_cast %314 : vector<8x32xf32> to vector<8x1x32xf32>
    %383 = vector.shape_cast %335 : vector<8x32xf32> to vector<8x1x32xf32>
    %384 = vector.shape_cast %356 : vector<8x32xf32> to vector<8x1x32xf32>
    %385 = vector.shape_cast %377 : vector<8x32xf32> to vector<8x1x32xf32>
    %386 = tpu.concatenate %378, %379, %380, %381, %382, %383, %384, %385 in 1 : vector<8x1x32xf32>, vector<8x1x32xf32>, vector<8x1x32xf32>, vector<8x1x32xf32>, vector<8x1x32xf32>, vector<8x1x32xf32>, vector<8x1x32xf32>, vector<8x1x32xf32> -> vector<8x8x32xf32>
    %387 = arith.truncf %209 : vector<8x8x32xf32> to vector<8x8x32xbf16>
    %388 = arith.truncf %386 : vector<8x8x32xf32> to vector<8x8x32xbf16>
    "tpu.trace_start"() <{level = 10 : i32, message = "bth,bsh->bts"}> : () -> ()
    %cst_68 = arith.constant dense<0.000000e+00> : vector<8x8x8xf32>
    %389 = tpu.matmul %388, %387, %cst_68 {dimension_numbers = #tpu.dot_dimension_numbers<[2], [2], [1], [1], [0, 0, 0, 1, 1, 1], [0], [0]>} : vector<8x8x32xbf16>, vector<8x8x32xbf16>, vector<8x8x8xf32> -> vector<8x8x8xf32>
    "tpu.trace_stop"() : () -> ()
    %cst_69 = arith.constant dense<0xFF800000> : vector<8x8xf32>
    %390 = vector.multi_reduction <maximumf>, %389, %cst_69 [2] : vector<8x8x8xf32> to vector<8x8xf32>
    %cst_70 = arith.constant 0xFF800000 : f32
    %391 = vector.broadcast %cst_70 : f32 to vector<8x8xf32>
    %392 = arith.maximumf %391, %390 : vector<8x8xf32>
    %393 = vector.shape_cast %392 : vector<8x8xf32> to vector<8x8x1xf32>
    %394 = vector.broadcast %393 : vector<8x8x1xf32> to vector<8x8x8xf32>
    %395 = arith.subf %389, %394 : vector<8x8x8xf32>
    %396 = math.exp %395 : vector<8x8x8xf32>
    %cst_71 = arith.constant dense<0.000000e+00> : vector<8x8xf32>
    %397 = vector.multi_reduction <add>, %396, %cst_71 [2] : vector<8x8x8xf32> to vector<8x8xf32>
    %398 = vector.shape_cast %397 : vector<8x8xf32> to vector<8x8x1xf32>
    %399 = vector.broadcast %398 : vector<8x8x1xf32> to vector<8x8x8xf32>
    %400 = arith.divf %396, %399 : vector<8x8x8xf32>
    %401 = arith.truncf %400 : vector<8x8x8xf32> to vector<8x8x8xbf16>
    "tpu.trace_start"() <{level = 10 : i32, message = "bts,bsh->bth"}> : () -> ()
    %cst_72 = arith.constant dense<0.000000e+00> : vector<8x8x32xf32>
    %402 = tpu.matmul %401, %387, %cst_72 {dimension_numbers = #tpu.dot_dimension_numbers<[2], [1], [1], [2], [0, 0, 0, 1, 1, 2], [0], [0]>} : vector<8x8x8xbf16>, vector<8x8x32xbf16>, vector<8x8x32xf32> -> vector<8x8x32xf32>
    "tpu.trace_stop"() : () -> ()
    %403 = vector.shape_cast %386 : vector<8x8x32xf32> to vector<64x32xf32>
    %404 = vector.shape_cast %402 : vector<8x8x32xf32> to vector<64x32xf32>
    %405 = arith.truncf %403 : vector<64x32xf32> to vector<64x32xbf16>
    %c0_73 = arith.constant 0 : index
    %c0_74 = arith.constant 0 : index
    %406 = vector.load %arg8[%c0_73, %c0_74] : memref<32x32xf32, #tpu.memory_space<vmem>>, vector<32x32xf32>
    %407 = arith.truncf %406 : vector<32x32xf32> to vector<32x32xbf16>
    %cst_75 = arith.constant dense<0.000000e+00> : vector<64x32xf32>
    %408 = tpu.matmul %405, %407, %cst_75 {dimension_numbers = #tpu.dot_dimension_numbers<[1], [0], [0], [1], [0, 0, 1, 1], [], []>} : vector<64x32xbf16>, vector<32x32xbf16>, vector<64x32xf32> -> vector<64x32xf32>
    %409 = arith.truncf %404 : vector<64x32xf32> to vector<64x32xbf16>
    %c0_76 = arith.constant 0 : index
    %c0_77 = arith.constant 0 : index
    %410 = vector.load %arg9[%c0_76, %c0_77] : memref<32x32xf32, #tpu.memory_space<vmem>>, vector<32x32xf32>
    %411 = arith.truncf %410 : vector<32x32xf32> to vector<32x32xbf16>
    %cst_78 = arith.constant dense<0.000000e+00> : vector<64x32xf32>
    %412 = tpu.matmul %409, %411, %cst_78 {dimension_numbers = #tpu.dot_dimension_numbers<[1], [0], [0], [1], [0, 0, 1, 1], [], []>} : vector<64x32xbf16>, vector<32x32xbf16>, vector<64x32xf32> -> vector<64x32xf32>
    %413 = arith.addf %408, %412 : vector<64x32xf32>
    %414 = math.tanh %413 : vector<64x32xf32>
    %415 = arith.truncf %414 : vector<64x32xf32> to vector<64x32xbf16>
    %c0_79 = arith.constant 0 : index
    %c0_80 = arith.constant 0 : index
    %416 = vector.load %arg10[%c0_79, %c0_80] : memref<32x128xf32, #tpu.memory_space<vmem>>, vector<32x128xf32>
    %417 = arith.truncf %416 : vector<32x128xf32> to vector<32x128xbf16>
    %cst_81 = arith.constant dense<0.000000e+00> : vector<64x128xf32>
    %418 = tpu.matmul %415, %417, %cst_81 {dimension_numbers = #tpu.dot_dimension_numbers<[1], [0], [0], [1], [0, 0, 1, 1], [], []>} : vector<64x32xbf16>, vector<32x128xbf16>, vector<64x128xf32> -> vector<64x128xf32>
    %c0_82 = arith.constant 0 : index
    %c0_83 = arith.constant 0 : index
    %419 = vector.load %arg11[%c0_82, %c0_83] : memref<1x128xf32, #tpu.memory_space<vmem>>, vector<1x128xf32>
    %420 = vector.broadcast %419 : vector<1x128xf32> to vector<64x128xf32>
    %421 = arith.addf %418, %420 : vector<64x128xf32>
    %c0_84 = arith.constant 0 : index
    %c0_85 = arith.constant 0 : index
    %422 = vector.load %arg12[%c0_84, %c0_85] : memref<64x128xf32, #tpu.memory_space<vmem>>, vector<64x128xf32>
    tpu.vector_store %arg12[%c0_84, %c0_85], %421 {strides = array<i32>} : memref<64x128xf32, #tpu.memory_space<vmem>>, vector<64x128xf32>,
    return
  }
}

</mosaic_0001>

<bundles_post_ra>
// kernel: tpu_custom_call.1
= control target key start
LH: loop header
LB: loop body
LE: loop exit
PB: predicated region body
PF: predicated region fallthrough
CT: control target
= control target key end

     0   :  { %17 = vsyncpa [#allocation3], 0  ;;  %s6019_s0 = inlined_call_operand.vmem [shape: f32[64,32], index: 0, kind: input, shape index: {}]   ;;  %s6020_s1 = inlined_call_operand.vmem [shape: f32[64,32], index: 1, kind: input, shape index: {}]   ;;  %s6021_s2 = inlined_call_operand.vmem [shape: f32[32,128], index: 2, kind: input, shape index: {}]   ;;  %s6022_s3 = inlined_call_operand.vmem [shape: f32[32,128], index: 3, kind: input, shape index: {}]   ;;  %s6023_s4 = inlined_call_operand.vmem [shape: f32[1,128], index: 4, kind: input, shape index: {}]   ;;  %s6024_s5 = inlined_call_operand.vmem [shape: f32[32,128], index: 5, kind: input, shape index: {}]   ;;  %s6025_s6 = inlined_call_operand.vmem [shape: f32[32,128], index: 6, kind: input, shape index: {}]   ;;  %s6026_s7 = inlined_call_operand.vmem [shape: f32[1,128], index: 7, kind: input, shape index: {}]   ;;  %s6027_s8 = inlined_call_operand.vmem [shape: f32[32,32], index: 8, kind: input, shape index: {}]   ;;  %s6028_s9 = inlined_call_operand.vmem [shape: f32[32,32], index: 9, kind: input, shape index: {}]   ;;  %s6029_s10 = inlined_call_operand.hbm [shape: f32[32,128], index: 10, kind: input, shape index: {}]   ;;  %s6030_s11 = inlined_call_operand.vmem [shape: f32[1,128], index: 11, kind: input, shape index: {}]   ;;  %s6031_s12 = inlined_call_operand.hbm [shape: f32[64,128], index: 12, kind: output, shape index: {}]  }
   0x1   :  { %18 = vsyncpa [#allocation4], 0  ;;  %s4724_s21 = smov [#allocation2]   ;;  %s4676_s25 = scalar_lea.hbm %s6029_s10, 512 }
   0x2   :  { %s44_s22 = sshll.u32 %s4724_s21, 4  ;;  %p4677_p0 = scmp.ne.s32.totalorder %s6029_s10, %s4676_s25  ;;  %s45_s22 = int_to_ptr.vmem [resolvable:$true] %s44_s22 }
   0x3   :  { %p4680_p1 = scmp.lt.u32.totalorder %s4676_s25, %s6029_s10 }
   0x5   :  { %p4682_p2 = pnand %p4680_p1, %p4677_p0 }
   0x7   :  { %4685 = shalt.err (!%p4682_p2)
}
   0x8   :  { %s4686_s30 = scalar_lea.vmem %s45_s22, 512  ;;  %p4691_p4 = scmp.lt.s32.totalorder %s45_s22, %s45_s22 }
   0x9   :  { %p4687_p3 = scmp.ne.s32.totalorder %s45_s22, %s4686_s30  ;;  %p4692_p5 = scmp.lt.s32.totalorder %s4686_s30, %s4686_s30 }
   0xb   :  { %p4693_p6 = por %p4692_p5, %p4691_p4 }
   0xd   :  { %p4694_p7 = pnand %p4693_p6, %p4687_p3 }
   0xf   :  { %4697 = shalt.err (!%p4694_p7)
}
  0x10   :  { %s4725_s13 = smov 128   ;;  %s4726_s14 = smov 8  }
  0x11   :  { %50 = dma.hbm_to_vmem [thread:$0]  %s6029_s10, 512, %s45_s22, [#allocation3], %s4725_s13, %s4725_s13, %s4726_s14  }
  0x12   :  { %4720 = dma.done.wait [#allocation3], 512  }
  0x13   :  { %4721 = vsyncadd [#allocation3], 4294966784  ;;  %v69_v0 = vld [vmem:[%s6021_s2] sm:$0xff]  ;;  %v70_v1 = vld [vmem:[%s6021_s2 + $0x8] sm:$0xff]  ;;  %vm82_vm0 = vcmask 261120   ;;  %v4727_v15 = vmov 0.0   ;;  %v274_v20 = vlaneseq }
  0x14   :  { %v71_v2 = vld [vmem:[%s6021_s2 + $0x10] sm:$0xff]  ;;  %v73_v3 = vpack.c.bf16 %v70_v1, %v69_v0  ;;  %v72_v4 = vld [vmem:[%s6021_s2 + $0x18] sm:$0xff]  ;;  %v57_v5 = vld [vmem:[%s6019_s0] sm:$0xff]  ;;  %vm4728_vm1 = vmmov 0   ;;  %v4729_v19 = vmov 0   ;;  %v4730_v29 = vmov 0.5  }
  0x15   :  { %v58_v6 = vld [vmem:[%s6019_s0 + $0x8] sm:$0xff]  ;;  %v74_v7 = vpack.c.bf16 %v72_v4, %v71_v2  ;;  %v59_v9 = vld [vmem:[%s6019_s0 + $0x10] sm:$0xff]  ;;  %v60_v10 = vld [vmem:[%s6019_s0 + $0x18] sm:$0xff]  ;;  %v275_v21 = vand.u32 127, %v274_v20  ;;  %s4732_s25 = smov 32   ;;  %vm1524_vm5 = vcmask 1040384  }
  0x16   :  { %v65_v8 = vpack.c.bf16 %v58_v6, %v57_v5  ;;  %4257 = vmatprep.subr.bf16.mxu0 %v73_v3  ;;  %4541 = vmatprep.subr.bf16.mxu1 %v73_v3  ;;  %v262_v11 = vld [vmem:[%s6022_s3] sm:$0xff]  ;;  %v263_v12 = vld [vmem:[%s6022_s3 + $0x8] sm:$0xff]  ;;  %v66_v13 = vpack.c.bf16 %v60_v10, %v59_v9  ;;  %v264_v16 = vld [vmem:[%s6022_s3 + $0x10] sm:$0xff]  ;;  %vm1533_vm6 = vcmask 1041408   ;;  %vm1542_vm7 = vcmask 1042432   ;;  %s4734_s19 = smov [#allocation5]  }
  0x17   :  { %4258 = vmatpush3.bf16.msra.mxu0 %v73_v3  ;;  %4543 = vmatpush3.bf16.msra.mxu1 %v73_v3  ;;  %v4846_v14 = vpack.c.bf16 %v263_v12, %v262_v11  ;;  %v265_v17 = vld [vmem:[%s6022_s3 + $0x18] sm:$0xff]  ;;  %vm276_vm2 = vcmp.ge.s32.totalorder %v275_v21, 64  ;;  %vm277_vm3 = vcmp.lt.s32.totalorder %v275_v21, 96  ;;  %v4880_v26 = vld [vmem:[%s6023_s4] ss:$0 sm:$0xff]  ;;  %s4731_s4 = smov 64  }
  0x18   :  { %4261 = vmatprep.mubr.msk.bf16.mxu0 %vm82_vm0, %v65_v8  ;;  %4259 = vmatprep.subr.bf16.mxu0 %v74_v7  ;;  %v4857_v18 = vpack.c.bf16 %v265_v17, %v264_v16  ;;  %vm4882_vm4 = vmand %vm276_vm2, %vm277_vm3  ;;  %v61_v46 = vld [vmem:[%s6019_s0 + $0x20] sm:$0xff]  ;;  %v62_v47 = vld [vmem:[%s6019_s0 + $0x28] sm:$0xff]  ;;  %vm1551_vm8 = vcmask 1043456   ;;  %vm1560_vm9 = vcmask 1044480   ;;  %vm1569_vm10 = vcmask 1045504  }
  0x19   :  { %4542 = vmatprep.subr.bf16.mxu1 %v74_v7  ;;  %v4889_v30 = vsel %vm4882_vm4, 1.0, %v4730_v29  ;;  %v63_v48 = vld [vmem:[%s6019_s0 + $0x30] sm:$0xff]  ;;  %v67_v49 = vpack.c.bf16 %v62_v47, %v61_v46  ;;  %v64_v50 = vld [vmem:[%s6019_s0 + $0x38] sm:$0xff]  ;;  %v172_v51 = vld [vmem:[%s6024_s5] sm:$0xff]  ;;  %vm1578_vm11 = vcmask 1046528   ;;  %vm3323_vm12 = vcmask 64512  }
  0x1a   :  { %v173_v52 = vld [vmem:[%s6024_s5 + $0x8] sm:$0xff]  ;;  %v68_v54 = vpack.c.bf16 %v64_v50, %v63_v48  ;;  %v174_v56 = vld [vmem:[%s6024_s5 + $0x10] sm:$0xff]  ;;  %v175_v57 = vld [vmem:[%s6024_s5 + $0x18] sm:$0xff] }
  0x1b   :  { %4260 = vmatpush3.bf16.msra.mxu0 %v74_v7  ;;  %4544 = vmatpush3.bf16.msra.mxu1 %v74_v7  ;;  %v176_v55 = vpack.c.bf16 %v173_v52, %v172_v51  ;;  %v160_v58 = vld [vmem:[%s6020_s1] sm:$0xff]  ;;  %v177_v59 = vpack.c.bf16 %v175_v57, %v174_v56  ;;  %v161_v60 = vld [vmem:[%s6020_s1 + $0x8] sm:$0xff]  ;;  %v162_v62 = vld [vmem:[%s6020_s1 + $0x10] sm:$0xff] }
  0x1c   :  { %4281 = vmatprep.subr.bf16.mxu0 %v4727_v15  ;;  %4265 = vmatprep.mubr.msk.bf16.mxu1 %vm82_vm0, %v67_v49  ;;  %v168_v61 = vpack.c.bf16 %v161_v60, %v160_v58  ;;  %v163_v63 = vld [vmem:[%s6020_s1 + $0x18] sm:$0xff]  ;;  %v164_v0 = vld [vmem:[%s6020_s1 + $0x20] sm:$0xff]  ;;  %v165_v1 = vld [vmem:[%s6020_s1 + $0x28] sm:$0xff]  ;;  %v4733_v58 = vmov 1966171168  }
  0x1d   :  { %4269 = vmatprep.subr.bf16.mxu1 %v176_v55  ;;  %v169_v2 = vpack.c.bf16 %v163_v63, %v162_v62  ;;  %v170_v3 = vpack.c.bf16 %v165_v1, %v164_v0  ;;  %v166_v4 = vld [vmem:[%s6020_s1 + $0x30] sm:$0xff]  ;;  %v167_v5 = vld [vmem:[%s6020_s1 + $0x38] sm:$0xff]  ;;  %v4973_v16 = vld [vmem:[%s6026_s7] ss:$0 sm:$0xff]  ;;  %s4081_s7 = sshll.u32 %s4734_s19, 4  ;;  %s4082_s7 = int_to_ptr.vmem [resolvable:$true] %s4081_s7 }
  0x1e   :  { %4262 = vmatmul.mubr.msk.bf16.vlgmr.msra.gmra.mrb[0].mxu0 %vm82_vm0, %v66_v13  ;;  %4266 = vmatmul.mubr.msk.bf16.vlgmr.msra.gmra.mrb[0].mxu1 %vm82_vm0, %v68_v54  ;;  %v171_v6 = vpack.c.bf16 %v167_v5, %v166_v4  ;;  %p4703_p9 = scmp.lt.s32.totalorder %s4082_s7, %s4082_s7 }
  0x1f   :  { %4282 = vmatpush3.bf16.msra.mxu0 %v4846_v14  ;;  %4285 = vmatprep.mubr.msk.bf16.mxu0 %vm4728_vm1, %v4727_v15 }
  0x20   :  { %4283 = vmatprep.subr.bf16.mxu0 %v4727_v15  ;;  %4270 = vmatpush3.bf16.msra.mxu1 %v176_v55 }
  0x21   :  { %4271 = vmatprep.subr.bf16.mxu1 %v177_v59  ;;  %4273 = vmatprep.mubr.msk.bf16.mxu1 %vm82_vm0, %v168_v61  ;;  %v842_v61 = vshrl.u32 %v274_v20, 7 }
  0x23   :  { %4284 = vmatpush3.bf16.msra.mxu0 %v4857_v18 }
  0x24   :  { %4297 = vmatprep.subr.bf16.mxu0 %v4727_v15  ;;  %4272 = vmatpush3.bf16.msra.mxu1 %v177_v59  ;;  %v839_v59 = vunpack.c.l.s4 %v4733_v58 }
  0x25   :  { %4289 = vmatprep.subr.bf16.mxu1 %v4727_v15 }
  0x26   :  { %4286 = vmatmul.mubr.bf16.vlgmr.msra.gmra.mrb[4].mxu0 %v4729_v19  ;;  %v840_v60 = vunpack.c.0.s8 %v839_v59 }
  0x27   :  { %4298 = vmatpush3.bf16.msra.mxu0 %v4846_v14  ;;  %4301 = vmatprep.mubr.msk.bf16.mxu0 %vm4728_vm1, %v4727_v15 }
  0x28   :  { %4299 = vmatprep.subr.bf16.mxu0 %v4727_v15  ;;  %4274 = vmatmul.mubr.msk.bf16.vlgmr.msra.gmra.mrb[4].mxu1 %vm82_vm0, %v169_v2  ;;  %v5018_v62 = vsub.s32 %v840_v60, %v842_v61 }
  0x29   :  { %4290 = vmatpush3.bf16.msra.mxu1 %v4846_v14  ;;  %4277 = vmatprep.mubr.msk.bf16.mxu1 %vm82_vm0, %v170_v3 }
  0x2a   :  { %4291 = vmatprep.subr.bf16.mxu1 %v4727_v15 }
  0x2b   :  { %4300 = vmatpush3.bf16.msra.mxu0 %v4857_v18 }
  0x2c   :  { %4313 = vmatprep.subr.bf16.mxu0 %v4727_v15 }
  0x2d   :  { %4292 = vmatpush3.bf16.msra.mxu1 %v4857_v18 }
  0x2e   :  { %4305 = vmatprep.subr.bf16.mxu1 %v4727_v15 }
  0x30   :  { %4278 = vmatmul.mubr.msk.bf16.gmra.mrb[8].mxu1 %vm82_vm0, %v171_v6 }
  0x31   :  { %4293 = vmatprep.mubr.msk.bf16.mxu1 %vm4728_vm1, %v4727_v15 }
  0xf1   :  { %v4871_v22 = vpop.f32.mrb[0].mxu0  ;;  %v4962_v10 = vpop.f32.mrb[0].mxu1 }
  0xf2   :  { %v129_v23 = vpop.f32.mrb[1].mxu0  ;;  %v4964_v11 = vpop.f32.mrb[1].mxu1 }
  0xf3   :  { %v4873_v24 = vpop.f32.mrb[2].mxu0  ;;  %v130_v28 = vadd.f32 %v4880_v26, %v129_v23  ;;  %v4966_v12 = vpop.f32.mrb[2].mxu1 }
  0xf4   :  { %v4875_v25 = vpop.f32.mrb[3].mxu0  ;;  %v4968_v13 = vpop.f32.mrb[3].mxu1 }
  0xf9   :  { %v317_v31 = vpop.f32.mrb[4].mxu0 }
  0xfa   :  { %v323_v32 = vadd.f32 %v317_v31, %v130_v28  ;;  %v4287_v33 = vpop.f32.mrb[5].mxu0 }
  0xfb   :  { %v320_v34 = vpop.f32.mrb[6].mxu0  ;;  %v4275_v17 = vpop.f32.mrb[4].mxu1 }
  0xfc   :  { %v324_v35 = vmul.f32 %v323_v32, %v4889_v30  ;;  %v4288_v36 = vpop.f32.mrb[7].mxu0  ;;  %v4976_v19 = vadd.f32 %v4275_v17, %v4973_v16  ;;  %v4978_v21 = vpop.f32.mrb[5].mxu1 }
  0xfd   :  { %v4276_v23 = vpop.f32.mrb[6].mxu1 }
  0xfe   :  { %4564 = vtanh.f32 %v324_v35  ;;  %v4981_v28 = vadd.f32 %v4276_v23, %v4973_v16  ;;  %v234_v29 = vpop.f32.mrb[7].mxu1 }
  0xff   :  { %v4984_v31 = vadd.f32 %v4973_v16, %v234_v29 }
 0x103   :  { %v4279_v32 = vpop.f32.mrb[8].mxu1 }
 0x104   :  { %v4987_v33 = vadd.f32 %v4279_v32, %v4973_v16  ;;  %v247_v34 = vpop.f32.mrb[9].mxu1 }
 0x105   :  { %v4990_v35 = vadd.f32 %v4973_v16, %v247_v34  ;;  %v4280_v36 = vpop.f32.mrb[10].mxu1 }
 0x108   :  { %v4565_v37 = vpop.eup %4564 }
 0x109   :  { %v326_v38 = vmul.f32 0.5, %v4565_v37 }
 0x10b   :  { %v327_v39 = vadd.f32 0.5, %v326_v38  ;;  %v250_v38 = vpop.f32.mrb[11].mxu1 }
 0x10d   :  { %v328_v40 = vsel %vm4882_vm4, %v4565_v37, %v327_v39  ;;  %v4993_v37 = vadd.f32 %v4280_v36, %v4973_v16  ;;  %v4996_v39 = vadd.f32 %v4973_v16, %v250_v38 }
 0x10e   :  { %331 = vrot.lane.b32.xlu0 %v328_v40, %s4731_s4  ;;  %v329_v43 = vmul.f32 0.0, %v328_v40 }
 0x180   :  { %v332_v41 = vpop.permute.xlu0 %331 }
 0x181   :  { %v334_v42 = vmul.f32 %v332_v41, %v328_v40  ;;  %v133_v41 = vadd.f32 %v4880_v26, %v4875_v25 }
 0x183   :  { %336 = vrot.lane.b32.xlu0 %v334_v42, %s4732_s25 }
 0x1f5   :  { %v337_v44 = vpop.permute.xlu0 %336 }
 0x1f6   :  { %v4896_v45 = vadd.f32 %v337_v44, %v329_v43 }
 0x1f8   :  { %4566 = vtanh.f32 %v4896_v45 }
 0x202   :  { %v4567_v53 = vpop.eup %4566 }
 0x203   :  { %342 = vrot.lane.b32.xlu1 %v4567_v53, %s4731_s4 }
 0x275   :  { %v343_v7 = vpop.permute.xlu1 %342 }
 0x276   :  { %v345_v8 = vmul.f32 %v343_v7, %v328_v40  ;;  %v5023_v7 = vsub.s32 0, %v842_v61 }
 0x278   :  { %v346_v9 = vpack.c.bf16 %v345_v8, %v345_v8  ;;  %v837_v63 = vcombine.high %v345_v8, %v345_v8  ;;  %v844_v0 = vrot.slane %v345_v8, %v5018_v62 }
 0x27a   :  { %348 = vrot.lane.b32.xlu1 %v346_v9, %s4732_s25  ;;  %v852_v3 = vcombine.high %v844_v0, %v844_v0  ;;  %v860_v17 = vrot.slane %v844_v0, %v5018_v62 }
 0x27c   :  { %v874_v32 = vrot.slane %v852_v3, %v5018_v62 }
 0x2ec   :  { %v349_v40 = vpop.permute.xlu1 %348 }
 0x2ed   :  { %4294 = vmatmul.mubr.msk.bf16.vlgmr.msra.gmra.mrb[12].mxu1 %vm82_vm0, %v349_v40 }
 0x2ee   :  { %4306 = vmatpush3.bf16.msra.mxu1 %v4846_v14  ;;  %4309 = vmatprep.mubr.msk.bf16.mxu1 %vm4728_vm1, %v4727_v15 }
 0x2ef   :  { %4307 = vmatprep.subr.bf16.mxu1 %v4727_v15 }
 0x2f2   :  { %4308 = vmatpush3.bf16.msra.mxu1 %v4857_v18 }
 0x2f3   :  { %4321 = vmatprep.subr.bf16.mxu1 %v4727_v15 }
 0x3c0   :  { %v387_v42 = vpop.f32.mrb[12].mxu1 }
 0x3c1   :  { %v393_v43 = vadd.f32 %v387_v42, %v133_v41  ;;  %v4295_v44 = vpop.f32.mrb[13].mxu1  ;;  %v882_v42 = vcombine.high %v860_v17, %v860_v17 }
 0x3c2   :  { %v390_v46 = vpop.f32.mrb[14].mxu1 }
 0x3c3   :  { %v394_v47 = vmul.f32 %v393_v43, %v4889_v30  ;;  %v4296_v48 = vpop.f32.mrb[15].mxu1 }
 0x3c5   :  { %4568 = vtanh.f32 %v394_v47 }
 0x3cf   :  { %v4569_v49 = vpop.eup %4568 }
 0x3d0   :  { %v396_v50 = vmul.f32 0.5, %v4569_v49 }
 0x3d2   :  { %v397_v51 = vadd.f32 0.5, %v396_v50  ;;  %v884_v50 = vcombine.high %v874_v32, %v874_v32 }
 0x3d4   :  { %v398_v52 = vsel %vm4882_vm4, %v4569_v49, %v397_v51 }
 0x3d5   :  { %401 = vrot.lane.b32.xlu0 %v398_v52, %s4731_s4  ;;  %v399_v25 = vmul.f32 %v398_v52, %v4896_v45  ;;  %v851_v45 = vrot.slane %v837_v63, %v5018_v62 }
 0x3d7   :  { %v853_v9 = vcombine.high %v851_v45, %v851_v45  ;;  %v867_v20 = vrot.slane %v851_v45, %v5018_v62 }
 0x3d9   :  { %v881_v41 = vrot.slane %v853_v9, %v5018_v62  ;;  %v883_v43 = vcombine.high %v867_v20, %v867_v20 }
 0x3db   :  { %v885_v58 = vcombine.high %v881_v41, %v881_v41 }
 0x447   :  { %v402_v53 = vpop.permute.xlu0 %401 }
 0x448   :  { %v404_v54 = vmul.f32 %v402_v53, %v398_v52 }
 0x44a   :  { %406 = vrot.lane.b32.xlu1 %v404_v54, %s4732_s25 }
 0x4bc   :  { %v407_v55 = vpop.permute.xlu1 %406 }
 0x4bd   :  { %v5013_v56 = vadd.f32 %v407_v55, %v399_v25 }
 0x4bf   :  { %4570 = vtanh.f32 %v5013_v56 }
 0x4c9   :  { %v4571_v57 = vpop.eup %4570 }
 0x4ca   :  { %412 = vrot.lane.b32.xlu0 %v4571_v57, %s4731_s4 }
 0x53c   :  { %v413_v1 = vpop.permute.xlu0 %412 }
 0x53d   :  { %v415_v2 = vmul.f32 %v413_v1, %v398_v52 }
 0x53f   :  { %v895_v4 = vcombine.high %v415_v2, %v415_v2  ;;  %v902_v5 = vrot.slane %v415_v2, %v5018_v62  ;;  %v416_v6 = vpack.c.bf16 %v415_v2, %v415_v2 }
 0x541   :  { %v909_v23 = vrot.slane %v895_v4, %v5018_v62  ;;  %v910_v29 = vcombine.high %v902_v5, %v902_v5  ;;  %v918_v8 = vrot.slane %v902_v5, %v5018_v62  ;;  %418 = vrot.lane.b32.xlu1 %v416_v6, %s4732_s25  ;;  %v138_v4 = vadd.f32 %v4871_v22, %v4880_v26 }
 0x543   :  { %v911_v34 = vcombine.high %v909_v23, %v909_v23  ;;  %v925_v36 = vrot.slane %v909_v23, %v5018_v62  ;;  %v932_v38 = vrot.slane %v910_v29, %v5018_v62  ;;  %v940_v40 = vcombine.high %v918_v8, %v918_v8 }
 0x544   :  { %v1247_v44 = vrot.slane %v918_v8, %v5023_v7 }
 0x545   :  { %v939_v46 = vrot.slane %v911_v34, %v5018_v62  ;;  %v941_v47 = vcombine.high %v925_v36, %v925_v36  ;;  %v942_v48 = vcombine.high %v932_v38, %v932_v38  ;;  %v1251_v49 = vrot.slane %v932_v38, %v5023_v7 }
 0x546   :  { %v1255_v51 = vrot.slane %v940_v40, %v5023_v7  ;;  %v1263_v52 = vrot.slane %v925_v36, %v5023_v7  ;;  %v5040_v53 = vsel %vm1524_vm5, %v860_v17, %v1247_v44 }
 0x547   :  { %v943_v54 = vcombine.high %v939_v46, %v939_v46  ;;  %v1259_v25 = vrot.slane %v942_v48, %v5023_v7  ;;  %v1267_v55 = vrot.slane %v939_v46, %v5023_v7  ;;  %v1271_v57 = vrot.slane %v941_v47, %v5023_v7 }
 0x548   :  { %v5046_v59 = vsel %vm1524_vm5, %v874_v32, %v1251_v49  ;;  %v5049_v60 = vsel %vm1524_vm5, %v882_v42, %v1255_v51  ;;  %v5052_v61 = vsel %vm1524_vm5, %v867_v20, %v1263_v52 }
 0x549   :  { %v1275_v63 = vrot.slane %v943_v54, %v5023_v7  ;;  %v5056_v0 = vsel %vm1524_vm5, %v884_v50, %v1259_v25  ;;  %v5059_v45 = vsel %vm1524_vm5, %v881_v41, %v1267_v55  ;;  %v5062_v1 = vsel %vm1524_vm5, %v883_v43, %v1271_v57 }
 0x54b   :  { %v5065_v2 = vsel %vm1524_vm5, %v885_v58, %v1275_v63 }
 0x5b3   :  { %v419_v3 = vpop.permute.xlu1 %418 }
 0x5b4   :  { %4302 = vmatmul.mubr.msk.bf16.vlgmr.msra.gmra.mrb[8].mxu0 %vm82_vm0, %v419_v3 }
 0x5b5   :  { %4314 = vmatpush3.bf16.msra.mxu0 %v4846_v14  ;;  %4317 = vmatprep.mubr.msk.bf16.mxu0 %vm4728_vm1, %v4727_v15 }
 0x5b6   :  { %4315 = vmatprep.subr.bf16.mxu0 %v4727_v15 }
 0x5b9   :  { %4316 = vmatpush3.bf16.msra.mxu0 %v4857_v18 }
 0x5ba   :  { %4329 = vmatprep.subr.bf16.mxu0 %v4727_v15 }
 0x687   :  { %v457_v5 = vpop.f32.mrb[8].mxu0 }
 0x688   :  { %v463_v6 = vadd.f32 %v457_v5, %v138_v4  ;;  %v4303_v9 = vpop.f32.mrb[9].mxu0 }
 0x689   :  { %v460_v17 = vpop.f32.mrb[10].mxu0 }
 0x68a   :  { %v464_v20 = vmul.f32 %v463_v6, %v4889_v30  ;;  %v4304_v23 = vpop.f32.mrb[11].mxu0 }
 0x68c   :  { %4572 = vtanh.f32 %v464_v20 }
 0x696   :  { %v4573_v29 = vpop.eup %4572 }
 0x697   :  { %v466_v8 = vmul.f32 0.5, %v4573_v29 }
 0x699   :  { %v467_v32 = vadd.f32 0.5, %v466_v8 }
 0x69b   :  { %v468_v34 = vsel %vm4882_vm4, %v4573_v29, %v467_v32 }
 0x69c   :  { %471 = vrot.lane.b32.xlu0 %v468_v34, %s4731_s4  ;;  %v469_v22 = vmul.f32 %v468_v34, %v5013_v56 }
 0x70e   :  { %v472_v36 = vpop.permute.xlu0 %471 }
 0x70f   :  { %v474_v38 = vmul.f32 %v472_v36, %v468_v34 }
 0x711   :  { %476 = vrot.lane.b32.xlu1 %v474_v38, %s4732_s25 }
 0x783   :  { %v477_v40 = vpop.permute.xlu1 %476 }
 0x784   :  { %v479_v41 = vadd.f32 %v477_v40, %v469_v22 }
 0x786   :  { %4574 = vtanh.f32 %v479_v41 }
 0x790   :  { %v4575_v42 = vpop.eup %4574 }
 0x791   :  { %482 = vrot.lane.b32.xlu0 %v4575_v42, %s4731_s4 }
 0x803   :  { %v483_v43 = vpop.permute.xlu0 %482 }
 0x804   :  { %v485_v44 = vmul.f32 %v483_v43, %v468_v34 }
 0x806   :  { %v945_v46 = vcombine.high %v485_v44, %v485_v44  ;;  %v952_v47 = vrot.slane %v485_v44, %v5018_v62  ;;  %v486_v48 = vpack.c.bf16 %v485_v44, %v485_v44 }
 0x808   :  { %v959_v49 = vrot.slane %v945_v46, %v5018_v62  ;;  %v960_v50 = vcombine.high %v952_v47, %v952_v47  ;;  %v968_v51 = vrot.slane %v952_v47, %v5018_v62  ;;  %488 = vrot.lane.b32.xlu1 %v486_v48, %s4732_s25 }
 0x80a   :  { %v961_v56 = vcombine.high %v959_v49, %v959_v49  ;;  %v975_v52 = vrot.slane %v959_v49, %v5018_v62  ;;  %v982_v54 = vrot.slane %v960_v50, %v5018_v62  ;;  %v990_v25 = vcombine.high %v968_v51, %v968_v51 }
 0x80b   :  { %v1287_v55 = vrot.slane %v968_v51, %v5023_v7 }
 0x80c   :  { %v989_v57 = vrot.slane %v961_v56, %v5018_v62  ;;  %v991_v58 = vcombine.high %v975_v52, %v975_v52  ;;  %v992_v63 = vcombine.high %v982_v54, %v982_v54  ;;  %v1291_v3 = vrot.slane %v982_v54, %v5023_v7 }
 0x80d   :  { %v1295_v4 = vrot.slane %v990_v25, %v5023_v7  ;;  %v1303_v5 = vrot.slane %v975_v52, %v5023_v7  ;;  %v5096_v6 = vsel %vm1533_vm6, %v5040_v53, %v1287_v55 }
 0x80e   :  { %v993_v9 = vcombine.high %v989_v57, %v989_v57  ;;  %v1299_v17 = vrot.slane %v992_v63, %v5023_v7  ;;  %v1307_v20 = vrot.slane %v989_v57, %v5023_v7  ;;  %v1311_v23 = vrot.slane %v991_v58, %v5023_v7 }
 0x80f   :  { %v5103_v29 = vsel %vm1533_vm6, %v5049_v60, %v1295_v4  ;;  %v5107_v8 = vsel %vm1533_vm6, %v5046_v59, %v1291_v3  ;;  %v5111_v32 = vsel %vm1533_vm6, %v5052_v61, %v1303_v5 }
 0x810   :  { %v1315_v53 = vrot.slane %v993_v9, %v5023_v7  ;;  %v5116_v34 = vsel %vm1533_vm6, %v5056_v0, %v1299_v17  ;;  %v5120_v36 = vsel %vm1533_vm6, %v5059_v45, %v1307_v20  ;;  %v5124_v60 = vsel %vm1533_vm6, %v5062_v1, %v1311_v23 }
 0x811   :  { %v141_v0 = vadd.f32 %v4873_v24, %v4880_v26 }
 0x812   :  { %v5128_v59 = vsel %vm1533_vm6, %v5065_v2, %v1315_v53 }
 0x87a   :  { %v489_v61 = vpop.permute.xlu1 %488 }
 0x87b   :  { %4310 = vmatmul.mubr.msk.bf16.vlgmr.msra.gmra.mrb[16].mxu1 %vm82_vm0, %v489_v61 }
 0x87c   :  { %4322 = vmatpush3.bf16.msra.mxu1 %v4846_v14  ;;  %4325 = vmatprep.mubr.msk.bf16.mxu1 %vm4728_vm1, %v4727_v15 }
 0x87d   :  { %4323 = vmatprep.subr.bf16.mxu1 %v4727_v15 }
 0x880   :  { %4324 = vmatpush3.bf16.msra.mxu1 %v4857_v18 }
 0x881   :  { %4337 = vmatprep.subr.bf16.mxu1 %v4727_v15 }
 0x94e   :  { %v527_v45 = vpop.f32.mrb[16].mxu1 }
 0x94f   :  { %v533_v1 = vadd.f32 %v527_v45, %v141_v0  ;;  %v4311_v2 = vpop.f32.mrb[17].mxu1 }
 0x950   :  { %v530_v38 = vpop.f32.mrb[18].mxu1 }
 0x951   :  { %v534_v22 = vmul.f32 %v533_v1, %v4889_v30  ;;  %v4312_v40 = vpop.f32.mrb[19].mxu1 }
 0x953   :  { %4576 = vtanh.f32 %v534_v22 }
 0x95d   :  { %v4577_v42 = vpop.eup %4576 }
 0x95e   :  { %v536_v43 = vmul.f32 0.5, %v4577_v42 }
 0x960   :  { %v537_v44 = vadd.f32 0.5, %v536_v43 }
 0x962   :  { %v538_v46 = vsel %vm4882_vm4, %v4577_v42, %v537_v44 }
 0x963   :  { %541 = vrot.lane.b32.xlu0 %v538_v46, %s4731_s4  ;;  %v539_v24 = vmul.f32 %v538_v46, %v479_v41 }
 0x9d5   :  { %v542_v47 = vpop.permute.xlu0 %541 }
 0x9d6   :  { %v544_v48 = vmul.f32 %v542_v47, %v538_v46 }
 0x9d8   :  { %546 = vrot.lane.b32.xlu1 %v544_v48, %s4732_s25 }
 0xa4a   :  { %v547_v49 = vpop.permute.xlu1 %546 }
 0xa4b   :  { %v549_v50 = vadd.f32 %v547_v49, %v539_v24 }
 0xa4d   :  { %4578 = vtanh.f32 %v549_v50 }
 0xa57   :  { %v4579_v51 = vpop.eup %4578 }
 0xa58   :  { %552 = vrot.lane.b32.xlu0 %v4579_v51, %s4731_s4 }
 0xaca   :  { %v553_v56 = vpop.permute.xlu0 %552 }
 0xacb   :  { %v555_v52 = vmul.f32 %v553_v56, %v538_v46 }
 0xacd   :  { %v995_v54 = vcombine.high %v555_v52, %v555_v52  ;;  %v1002_v25 = vrot.slane %v555_v52, %v5018_v62  ;;  %v556_v55 = vpack.c.bf16 %v555_v52, %v555_v52 }
 0xacf   :  { %v1009_v57 = vrot.slane %v995_v54, %v5018_v62  ;;  %v1010_v58 = vcombine.high %v1002_v25, %v1002_v25  ;;  %v1018_v63 = vrot.slane %v1002_v25, %v5018_v62  ;;  %558 = vrot.lane.b32.xlu1 %v556_v55, %s4732_s25 }
 0xad1   :  { %v1011_v41 = vcombine.high %v1009_v57, %v1009_v57  ;;  %v1025_v3 = vrot.slane %v1009_v57, %v5018_v62  ;;  %v1032_v4 = vrot.slane %v1010_v58, %v5018_v62  ;;  %v1040_v5 = vcombine.high %v1018_v63, %v1018_v63 }
 0xad2   :  { %v1327_v9 = vrot.slane %v1018_v63, %v5023_v7 }
 0xad3   :  { %v1039_v17 = vrot.slane %v1011_v41, %v5018_v62  ;;  %v1041_v20 = vcombine.high %v1025_v3, %v1025_v3  ;;  %v1042_v23 = vcombine.high %v1032_v4, %v1032_v4  ;;  %v1331_v53 = vrot.slane %v1032_v4, %v5023_v7 }
 0xad4   :  { %v1335_v61 = vrot.slane %v1040_v5, %v5023_v7  ;;  %v1343_v0 = vrot.slane %v1025_v3, %v5023_v7  ;;  %v5158_v45 = vsel %vm1542_vm7, %v5096_v6, %v1327_v9 }
 0xad5   :  { %v1043_v1 = vcombine.high %v1039_v17, %v1039_v17  ;;  %v1339_v2 = vrot.slane %v1042_v23, %v5023_v7  ;;  %v1347_v38 = vrot.slane %v1039_v17, %v5023_v7  ;;  %v1351_v22 = vrot.slane %v1041_v20, %v5023_v7 }
 0xad6   :  { %v5165_v40 = vsel %vm1542_vm7, %v5103_v29, %v1335_v61  ;;  %v5169_v42 = vsel %vm1542_vm7, %v5107_v8, %v1331_v53  ;;  %v5173_v43 = vsel %vm1542_vm7, %v5111_v32, %v1343_v0 }
 0xad7   :  { %v1355_v6 = vrot.slane %v1043_v1, %v5023_v7  ;;  %v5178_v44 = vsel %vm1542_vm7, %v5116_v34, %v1339_v2  ;;  %v5182_v46 = vsel %vm1542_vm7, %v5120_v36, %v1347_v38  ;;  %v5186_v29 = vsel %vm1542_vm7, %v5124_v60, %v1351_v22 }
 0xad8   :  { %v146_v34 = vadd.f32 %v4880_v26, %v4964_v11 }
 0xad9   :  { %v5190_v8 = vsel %vm1542_vm7, %v5128_v59, %v1355_v6 }
 0xb41   :  { %v559_v32 = vpop.permute.xlu1 %558 }
 0xb42   :  { %4318 = vmatmul.mubr.msk.bf16.vlgmr.msra.gmra.mrb[12].mxu0 %vm82_vm0, %v559_v32 }
 0xb43   :  { %4330 = vmatpush3.bf16.msra.mxu0 %v4846_v14  ;;  %4333 = vmatprep.mubr.msk.bf16.mxu0 %vm4728_vm1, %v4727_v15 }
 0xb44   :  { %4331 = vmatprep.subr.bf16.mxu0 %v4727_v15 }
 0xb47   :  { %4332 = vmatpush3.bf16.msra.mxu0 %v4857_v18 }
 0xb48   :  { %4345 = vmatprep.subr.bf16.mxu0 %v4727_v15 }
 0xc15   :  { %v597_v36 = vpop.f32.mrb[12].mxu0 }
 0xc16   :  { %v603_v60 = vadd.f32 %v597_v36, %v146_v34  ;;  %v4319_v59 = vpop.f32.mrb[13].mxu0 }
 0xc17   :  { %v600_v47 = vpop.f32.mrb[14].mxu0 }
 0xc18   :  { %v604_v48 = vmul.f32 %v603_v60, %v4889_v30  ;;  %v4320_v24 = vpop.f32.mrb[15].mxu0 }
 0xc1a   :  { %4580 = vtanh.f32 %v604_v48 }
 0xc24   :  { %v4581_v49 = vpop.eup %4580 }
 0xc25   :  { %v606_v51 = vmul.f32 0.5, %v4581_v49 }
 0xc27   :  { %v607_v56 = vadd.f32 0.5, %v606_v51 }
 0xc29   :  { %v608_v52 = vsel %vm4882_vm4, %v4581_v49, %v607_v56 }
 0xc2a   :  { %611 = vrot.lane.b32.xlu0 %v608_v52, %s4731_s4  ;;  %v609_v11 = vmul.f32 %v608_v52, %v549_v50 }
 0xc9c   :  { %v612_v54 = vpop.permute.xlu0 %611 }
 0xc9d   :  { %v614_v25 = vmul.f32 %v612_v54, %v608_v52 }
 0xc9f   :  { %616 = vrot.lane.b32.xlu1 %v614_v25, %s4732_s25 }
 0xd11   :  { %v617_v55 = vpop.permute.xlu1 %616 }
 0xd12   :  { %v619_v57 = vadd.f32 %v617_v55, %v609_v11 }
 0xd14   :  { %4582 = vtanh.f32 %v619_v57 }
 0xd1e   :  { %v4583_v58 = vpop.eup %4582 }
 0xd1f   :  { %622 = vrot.lane.b32.xlu0 %v4583_v58, %s4731_s4 }
 0xd91   :  { %v623_v63 = vpop.permute.xlu0 %622 }
 0xd92   :  { %v625_v41 = vmul.f32 %v623_v63, %v608_v52 }
 0xd94   :  { %v1045_v3 = vcombine.high %v625_v41, %v625_v41  ;;  %v1052_v4 = vrot.slane %v625_v41, %v5018_v62  ;;  %v626_v5 = vpack.c.bf16 %v625_v41, %v625_v41 }
 0xd96   :  { %v1059_v9 = vrot.slane %v1045_v3, %v5018_v62  ;;  %v1060_v17 = vcombine.high %v1052_v4, %v1052_v4  ;;  %v1068_v20 = vrot.slane %v1052_v4, %v5018_v62  ;;  %628 = vrot.lane.b32.xlu1 %v626_v5, %s4732_s25 }
 0xd98   :  { %v1061_v50 = vcombine.high %v1059_v9, %v1059_v9  ;;  %v1075_v23 = vrot.slane %v1059_v9, %v5018_v62  ;;  %v1082_v53 = vrot.slane %v1060_v17, %v5018_v62  ;;  %v1090_v61 = vcombine.high %v1068_v20, %v1068_v20 }
 0xd99   :  { %v1367_v0 = vrot.slane %v1068_v20, %v5023_v7 }
 0xd9a   :  { %v1089_v1 = vrot.slane %v1061_v50, %v5018_v62  ;;  %v1091_v2 = vcombine.high %v1075_v23, %v1075_v23  ;;  %v1092_v38 = vcombine.high %v1082_v53, %v1082_v53  ;;  %v1371_v22 = vrot.slane %v1082_v53, %v5023_v7 }
 0xd9b   :  { %v1375_v6 = vrot.slane %v1090_v61, %v5023_v7  ;;  %v1383_v32 = vrot.slane %v1075_v23, %v5023_v7  ;;  %v5220_v34 = vsel %vm1551_vm8, %v5158_v45, %v1367_v0 }
 0xd9c   :  { %v1093_v36 = vcombine.high %v1089_v1, %v1089_v1  ;;  %v1379_v60 = vrot.slane %v1092_v38, %v5023_v7  ;;  %v1387_v59 = vrot.slane %v1089_v1, %v5023_v7  ;;  %v1391_v47 = vrot.slane %v1091_v2, %v5023_v7 }
 0xd9d   :  { %v5227_v48 = vsel %vm1551_vm8, %v5165_v40, %v1375_v6  ;;  %v5231_v24 = vsel %vm1551_vm8, %v5169_v42, %v1371_v22  ;;  %v5235_v49 = vsel %vm1551_vm8, %v5173_v43, %v1383_v32 }
 0xd9e   :  { %v1395_v45 = vrot.slane %v1093_v36, %v5023_v7  ;;  %v5240_v51 = vsel %vm1551_vm8, %v5178_v44, %v1379_v60  ;;  %v5244_v56 = vsel %vm1551_vm8, %v5182_v46, %v1387_v59  ;;  %v5248_v40 = vsel %vm1551_vm8, %v5186_v29, %v1391_v47 }
 0xd9f   :  { %v149_v44 = vadd.f32 %v4880_v26, %v4968_v13 }
 0xda0   :  { %v5252_v42 = vsel %vm1551_vm8, %v5190_v8, %v1395_v45 }
 0xe08   :  { %v629_v43 = vpop.permute.xlu1 %628 }
 0xe09   :  { %4326 = vmatmul.mubr.msk.bf16.vlgmr.msra.gmra.mrb[20].mxu1 %vm82_vm0, %v629_v43 }
 0xe0a   :  { %4338 = vmatpush3.bf16.msra.mxu1 %v4846_v14  ;;  %4341 = vmatprep.mubr.msk.bf16.mxu1 %vm4728_vm1, %v4727_v15 }
 0xe0b   :  { %4339 = vmatprep.subr.bf16.mxu1 %v4727_v15 }
 0xe0e   :  { %4340 = vmatpush3.bf16.msra.mxu1 %v4857_v18 }
 0xe0f   :  { %4353 = vmatprep.subr.bf16.mxu1 %v4727_v15 }
 0xedc   :  { %v667_v46 = vpop.f32.mrb[20].mxu1 }
 0xedd   :  { %v673_v29 = vadd.f32 %v667_v46, %v149_v44  ;;  %v4327_v8 = vpop.f32.mrb[21].mxu1 }
 0xede   :  { %v670_v52 = vpop.f32.mrb[22].mxu1 }
 0xedf   :  { %v674_v54 = vmul.f32 %v673_v29, %v4889_v30  ;;  %v4328_v25 = vpop.f32.mrb[23].mxu1 }
 0xee1   :  { %4584 = vtanh.f32 %v674_v54 }
 0xeeb   :  { %v4585_v14 = vpop.eup %4584 }
 0xeec   :  { %v676_v11 = vmul.f32 0.5, %v4585_v14 }
 0xeee   :  { %v677_v55 = vadd.f32 0.5, %v676_v11 }
 0xef0   :  { %v678_v58 = vsel %vm4882_vm4, %v4585_v14, %v677_v55 }
 0xef1   :  { %681 = vrot.lane.b32.xlu0 %v678_v58, %s4731_s4  ;;  %v679_v13 = vmul.f32 %v678_v58, %v619_v57 }
 0xf63   :  { %v682_v18 = vpop.permute.xlu0 %681 }
 0xf64   :  { %v684_v63 = vmul.f32 %v682_v18, %v678_v58 }
 0xf66   :  { %686 = vrot.lane.b32.xlu1 %v684_v63, %s4732_s25 }
 0xfd8   :  { %v687_v41 = vpop.permute.xlu1 %686 }
 0xfd9   :  { %v689_v3 = vadd.f32 %v687_v41, %v679_v13 }
 0xfdb   :  { %4586 = vtanh.f32 %v689_v3 }
 0xfe5   :  { %v4587_v4 = vpop.eup %4586 }
 0xfe6   :  { %692 = vrot.lane.b32.xlu0 %v4587_v4, %s4731_s4 }
0x1058   :  { %v693_v5 = vpop.permute.xlu0 %692 }
0x1059   :  { %v695_v9 = vmul.f32 %v693_v5, %v678_v58 }
0x105b   :  { %v1095_v17 = vcombine.high %v695_v9, %v695_v9  ;;  %v1102_v20 = vrot.slane %v695_v9, %v5018_v62  ;;  %v696_v50 = vpack.c.bf16 %v695_v9, %v695_v9 }
0x105d   :  { %v1109_v23 = vrot.slane %v1095_v17, %v5018_v62  ;;  %v1110_v53 = vcombine.high %v1102_v20, %v1102_v20  ;;  %v1118_v61 = vrot.slane %v1102_v20, %v5018_v62  ;;  %698 = vrot.lane.b32.xlu1 %v696_v50, %s4732_s25 }
0x105f   :  { %v1111_v57 = vcombine.high %v1109_v23, %v1109_v23  ;;  %v1125_v0 = vrot.slane %v1109_v23, %v5018_v62  ;;  %v1132_v1 = vrot.slane %v1110_v53, %v5018_v62  ;;  %v1140_v2 = vcombine.high %v1118_v61, %v1118_v61 }
0x1060   :  { %v1407_v38 = vrot.slane %v1118_v61, %v5023_v7 }
0x1061   :  { %v1139_v22 = vrot.slane %v1111_v57, %v5018_v62  ;;  %v1141_v6 = vcombine.high %v1125_v0, %v1125_v0  ;;  %v1142_v32 = vcombine.high %v1132_v1, %v1132_v1  ;;  %v1411_v36 = vrot.slane %v1132_v1, %v5023_v7 }
0x1062   :  { %v1415_v60 = vrot.slane %v1140_v2, %v5023_v7  ;;  %v1423_v59 = vrot.slane %v1125_v0, %v5023_v7  ;;  %v1561_v47 = vsel %vm1560_vm9, %v5220_v34, %v1407_v38 }
0x1063   :  { %v1143_v45 = vcombine.high %v1139_v22, %v1139_v22  ;;  %v1419_v43 = vrot.slane %v1142_v32, %v5023_v7  ;;  %v1427_v44 = vrot.slane %v1139_v22, %v5023_v7  ;;  %v1431_v46 = vrot.slane %v1141_v6, %v5023_v7 }
0x1064   :  { %v1563_v29 = vsel %vm1560_vm9, %v5227_v48, %v1415_v60  ;;  %v1562_v8 = vsel %vm1560_vm9, %v5231_v24, %v1411_v36  ;;  %v1565_v52 = vsel %vm1560_vm9, %v5235_v49, %v1423_v59  ;;  %v154_v24 = vadd.f32 %v4962_v10, %v4880_v26 }
0x1065   :  { %v1564_v54 = vsel %vm1560_vm9, %v5240_v51, %v1419_v43  ;;  %v1566_v34 = vsel %vm1560_vm9, %v5244_v56, %v1427_v44  ;;  %v1567_v25 = vsel %vm1560_vm9, %v5248_v40, %v1431_v46  ;;  %v1435_v14 = vrot.slane %v1143_v45, %v5023_v7 }
0x1067   :  { %v1568_v48 = vsel %vm1560_vm9, %v5252_v42, %v1435_v14 }
0x10cf   :  { %v699_v11 = vpop.permute.xlu1 %698 }
0x10d0   :  { %4334 = vmatmul.mubr.msk.bf16.vlgmr.msra.gmra.mrb[16].mxu0 %vm82_vm0, %v699_v11 }
0x10d1   :  { %4349 = vmatprep.mubr.msk.bf16.mxu0 %vm4728_vm1, %v4727_v15 }
0x11a3   :  { %v737_v49 = vpop.f32.mrb[16].mxu0 }
0x11a4   :  { %v743_v51 = vadd.f32 %v737_v49, %v154_v24  ;;  %v4335_v56 = vpop.f32.mrb[17].mxu0 }
0x11a5   :  { %v740_v55 = vpop.f32.mrb[18].mxu0 }
0x11a6   :  { %v744_v40 = vmul.f32 %v743_v51, %v4889_v30  ;;  %v4336_v58 = vpop.f32.mrb[19].mxu0 }
0x11a8   :  { %4588 = vtanh.f32 %v744_v40 }
0x11b2   :  { %v4589_v18 = vpop.eup %4588 }
0x11b3   :  { %v746_v63 = vmul.f32 0.5, %v4589_v18 }
0x11b5   :  { %v747_v42 = vadd.f32 0.5, %v746_v63 }
0x11b7   :  { %v748_v13 = vsel %vm4882_vm4, %v4589_v18, %v747_v42 }
0x11b8   :  { %751 = vrot.lane.b32.xlu0 %v748_v13, %s4731_s4  ;;  %v749_v10 = vmul.f32 %v748_v13, %v689_v3 }
0x122a   :  { %v752_v41 = vpop.permute.xlu0 %751 }
0x122b   :  { %v754_v4 = vmul.f32 %v752_v41, %v748_v13 }
0x122d   :  { %756 = vrot.lane.b32.xlu1 %v754_v4, %s4732_s25 }
0x129f   :  { %v757_v5 = vpop.permute.xlu1 %756 }
0x12a0   :  { %v759_v9 = vadd.f32 %v757_v5, %v749_v10 }
0x12a2   :  { %4590 = vtanh.f32 %v759_v9 }
0x12ac   :  { %v4591_v17 = vpop.eup %4590 }
0x12ad   :  { %762 = vrot.lane.b32.xlu0 %v4591_v17, %s4731_s4 }
0x131f   :  { %v763_v20 = vpop.permute.xlu0 %762 }
0x1320   :  { %v765_v50 = vmul.f32 %v763_v20, %v748_v13  ;;  %v268_v20 = vld [vmem:[%s6025_s6] sm:$0xff] }
0x1322   :  { %v1145_v23 = vcombine.high %v765_v50, %v765_v50  ;;  %v1152_v53 = vrot.slane %v765_v50, %v5018_v62  ;;  %v766_v61 = vpack.c.bf16 %v765_v50, %v765_v50  ;;  %v269_v50 = vld [vmem:[%s6025_s6 + $0x8] sm:$0xff] }
0x1324   :  { %v1159_v57 = vrot.slane %v1145_v23, %v5018_v62  ;;  %v1160_v0 = vcombine.high %v1152_v53, %v1152_v53  ;;  %v1168_v1 = vrot.slane %v1152_v53, %v5018_v62  ;;  %768 = vrot.lane.b32.xlu1 %v766_v61, %s4732_s25  ;;  %v270_v23 = vld [vmem:[%s6025_s6 + $0x10] sm:$0xff]  ;;  %v5372_v53 = vpack.c.bf16 %v269_v50, %v268_v20 }
0x1326   :  { %v1161_v3 = vcombine.high %v1159_v57, %v1159_v57  ;;  %v1175_v2 = vrot.slane %v1159_v57, %v5018_v62  ;;  %v1182_v38 = vrot.slane %v1160_v0, %v5018_v62  ;;  %v1190_v22 = vcombine.high %v1168_v1, %v1168_v1  ;;  %4346 = vmatpush3.bf16.msra.mxu0 %v5372_v53 }
0x1327   :  { %v1447_v6 = vrot.slane %v1168_v1, %v5023_v7  ;;  %4347 = vmatprep.subr.bf16.mxu0 %v4727_v15 }
0x1328   :  { %v1189_v32 = vrot.slane %v1161_v3, %v5018_v62  ;;  %v1191_v36 = vcombine.high %v1175_v2, %v1175_v2  ;;  %v1192_v60 = vcombine.high %v1182_v38, %v1182_v38  ;;  %v1455_v59 = vrot.slane %v1190_v22, %v5023_v7 }
0x1329   :  { %v5321_v45 = vsel %vm1569_vm10, %v1561_v47, %v1447_v6  ;;  %v1451_v43 = vrot.slane %v1182_v38, %v5023_v7  ;;  %v1463_v44 = vrot.slane %v1175_v2, %v5023_v7 }
0x132a   :  { %v5326_v46 = vsel %vm1569_vm10, %v1563_v29, %v1455_v59  ;;  %v1459_v14 = vrot.slane %v1192_v60, %v5023_v7  ;;  %v1467_v11 = vrot.slane %v1189_v32, %v5023_v7  ;;  %v1471_v24 = vrot.slane %v1191_v36, %v5023_v7 }
0x132b   :  { %v5332_v49 = vsel %vm1569_vm10, %v1562_v8, %v1451_v43  ;;  %v5335_v51 = vsel %vm1569_vm10, %v1565_v52, %v1463_v44  ;;  %v1193_v47 = vcombine.high %v1189_v32, %v1189_v32  ;;  %v157_v52 = vadd.f32 %v4966_v12, %v4880_v26 }
0x132c   :  { %v5338_v56 = vsel %vm1569_vm10, %v1564_v54, %v1459_v14  ;;  %v5341_v55 = vsel %vm1569_vm10, %v1566_v34, %v1467_v11  ;;  %v5344_v29 = vsel %vm1569_vm10, %v1567_v25, %v1471_v24 }
0x132d   :  { %v1475_v40 = vrot.slane %v1193_v47, %v5023_v7 }
0x132f   :  { %v5348_v58 = vsel %vm1569_vm10, %v1568_v48, %v1475_v40 }
0x1396   :  { %v769_v8 = vpop.permute.xlu1 %768 }
0x1397   :  { %4342 = vmatmul.mubr.msk.bf16.vlgmr.msra.gmra.mrb[24].mxu1 %vm82_vm0, %v769_v8 }
0x1398   :  { %4357 = vmatprep.mubr.msk.bf16.mxu1 %vm4728_vm1, %v4727_v15  ;;  %4354 = vmatpush3.bf16.msra.mxu1 %v5372_v53 }
0x1399   :  { %4355 = vmatprep.subr.bf16.mxu1 %v4727_v15 }
0x146a   :  { %v807_v54 = vpop.f32.mrb[24].mxu1 }
0x146b   :  { %v813_v34 = vadd.f32 %v807_v54, %v157_v52  ;;  %v4343_v18 = vpop.f32.mrb[25].mxu1 }
0x146c   :  { %v810_v63 = vpop.f32.mrb[26].mxu1 }
0x146d   :  { %v814_v25 = vmul.f32 %v813_v34, %v4889_v30  ;;  %v4344_v42 = vpop.f32.mrb[27].mxu1 }
0x146f   :  { %4592 = vtanh.f32 %v814_v25 }
0x1479   :  { %v4593_v13 = vpop.eup %4592 }
0x147a   :  { %v816_v48 = vmul.f32 0.5, %v4593_v13 }
0x147c   :  { %v817_v41 = vadd.f32 0.5, %v816_v48 }
0x147e   :  { %v818_v4 = vsel %vm4882_vm4, %v4593_v13, %v817_v41 }
0x147f   :  { %821 = vrot.lane.b32.xlu0 %v818_v4, %s4731_s4  ;;  %v819_v26 = vmul.f32 %v818_v4, %v759_v9  ;;  %v271_v9 = vld [vmem:[%s6025_s6 + $0x18] sm:$0xff] }
0x1480   :  { %v5378_v61 = vpack.c.bf16 %v271_v9, %v270_v23 }
0x1482   :  { %4348 = vmatpush3.bf16.msra.mxu0 %v5378_v61  ;;  %4356 = vmatpush3.bf16.msra.mxu1 %v5378_v61 }
0x1483   :  { %4361 = vmatprep.subr.bf16.mxu0 %v4727_v15  ;;  %4369 = vmatprep.subr.bf16.mxu1 %v4727_v15 }
0x14f1   :  { %v822_v10 = vpop.permute.xlu0 %821 }
0x14f2   :  { %v824_v5 = vmul.f32 %v822_v10, %v818_v4 }
0x14f4   :  { %826 = vrot.lane.b32.xlu1 %v824_v5, %s4732_s25 }
0x1566   :  { %v827_v12 = vpop.permute.xlu1 %826 }
0x1567   :  { %v5360_v17 = vadd.f32 %v827_v12, %v819_v26 }
0x1569   :  { %4594 = vtanh.f32 %v5360_v17 }
0x1573   :  { %v4595_v57 = vpop.eup %4594 }
0x1574   :  { %832 = vrot.lane.b32.xlu0 %v4595_v57, %s4731_s4 }
0x15e6   :  { %v833_v0 = vpop.permute.xlu0 %832 }
0x15e7   :  { %v835_v1 = vmul.f32 %v833_v0, %v818_v4 }
0x15e9   :  { %v1195_v3 = vcombine.high %v835_v1, %v835_v1  ;;  %v1202_v2 = vrot.slane %v835_v1, %v5018_v62  ;;  %v1587_v38 = vpack.c.bf16 %v835_v1, %v835_v1 }
0x15eb   :  { %v1209_v22 = vrot.slane %v1195_v3, %v5018_v62  ;;  %v1210_v6 = vcombine.high %v1202_v2, %v1202_v2  ;;  %v1218_v32 = vrot.slane %v1202_v2, %v5018_v62  ;;  %1589 = vrot.lane.b32.xlu1 %v1587_v38, %s4732_s25 }
0x15ed   :  { %v1211_v36 = vcombine.high %v1209_v22, %v1209_v22  ;;  %v1225_v60 = vrot.slane %v1209_v22, %v5018_v62  ;;  %v1232_v59 = vrot.slane %v1210_v6, %v5018_v62  ;;  %v1240_v43 = vcombine.high %v1218_v32, %v1218_v32 }
0x15ee   :  { %v1487_v44 = vrot.slane %v1218_v32, %v5023_v7 }
0x15ef   :  { %v1495_v14 = vrot.slane %v1240_v43, %v5023_v7  ;;  %v1491_v11 = vrot.slane %v1232_v59, %v5023_v7  ;;  %v1242_v24 = vcombine.high %v1232_v59, %v1232_v59  ;;  %v1503_v47 = vrot.slane %v1225_v60, %v5023_v7 }
0x15f0   :  { %v5400_v40 = vsel %vm1578_vm11, %v5321_v45, %v1487_v44  ;;  %v1239_v8 = vrot.slane %v1211_v36, %v5018_v62  ;;  %v1241_v52 = vcombine.high %v1225_v60, %v1225_v60 }
0x15f1   :  { %v5405_v54 = vsel %vm1578_vm11, %v5326_v46, %v1495_v14  ;;  %v5409_v34 = vsel %vm1578_vm11, %v5332_v49, %v1491_v11  ;;  %v1499_v18 = vrot.slane %v1242_v24, %v5023_v7  ;;  %v5414_v63 = vsel %vm1578_vm11, %v5335_v51, %v1503_v47 }
0x15f2   :  { %v1507_v45 = vrot.slane %v1239_v8, %v5023_v7  ;;  %v1511_v42 = vrot.slane %v1241_v52, %v5023_v7  ;;  %v1243_v46 = vcombine.high %v1239_v8, %v1239_v8 }
0x15f3   :  { %v5419_v25 = vsel %vm1578_vm11, %v5338_v56, %v1499_v18  ;;  %v232_v56 = vadd.f32 %v4973_v16, %v4978_v21 }
0x15f4   :  { %v5424_v13 = vsel %vm1578_vm11, %v5341_v55, %v1507_v45  ;;  %v5428_v49 = vsel %vm1578_vm11, %v5344_v29, %v1511_v42  ;;  %v1515_v51 = vrot.slane %v1243_v46, %v5023_v7 }
0x15f6   :  { %v5433_v48 = vsel %vm1578_vm11, %v5348_v58, %v1515_v51 }
0x165d   :  { %v1590_v41 = vpop.permute.xlu1 %1589 }
0x165e   :  { %4350 = vmatmul.mubr.msk.bf16.vlgmr.msra.gmra.mrb[20].mxu0 %vm82_vm0, %v1590_v41 }
0x165f   :  { %4362 = vmatpush3.bf16.msra.mxu0 %v5372_v53  ;;  %4365 = vmatprep.mubr.msk.bf16.mxu0 %vm4728_vm1, %v4727_v15 }
0x1660   :  { %4363 = vmatprep.subr.bf16.mxu0 %v4727_v15 }
0x1663   :  { %4364 = vmatpush3.bf16.msra.mxu0 %v5378_v61 }
0x1664   :  { %4377 = vmatprep.subr.bf16.mxu0 %v4727_v15 }
0x1731   :  { %v1628_v55 = vpop.f32.mrb[20].mxu0 }
0x1732   :  { %v1634_v29 = vadd.f32 %v1628_v55, %v232_v56  ;;  %v4351_v58 = vpop.f32.mrb[21].mxu0 }
0x1733   :  { %v1631_v4 = vpop.f32.mrb[22].mxu0 }
0x1734   :  { %v1635_v10 = vmul.f32 %v1634_v29, %v4889_v30  ;;  %v4352_v5 = vpop.f32.mrb[23].mxu0 }
0x1736   :  { %4596 = vtanh.f32 %v1635_v10 }
0x1740   :  { %v4597_v26 = vpop.eup %4596 }
0x1741   :  { %v1637_v12 = vmul.f32 0.5, %v4597_v26 }
0x1743   :  { %v1638_v20 = vadd.f32 0.5, %v1637_v12 }
0x1745   :  { %v1639_v50 = vsel %vm4882_vm4, %v4597_v26, %v1638_v20 }
0x1746   :  { %1642 = vrot.lane.b32.xlu0 %v1639_v50, %s4731_s4  ;;  %v1640_v16 = vmul.f32 %v1639_v50, %v5360_v17 }
0x17b8   :  { %v1643_v23 = vpop.permute.xlu0 %1642 }
0x17b9   :  { %v1645_v9 = vmul.f32 %v1643_v23, %v1639_v50 }
0x17bb   :  { %1647 = vrot.lane.b32.xlu1 %v1645_v9, %s4732_s25 }
0x182d   :  { %v1648_v21 = vpop.permute.xlu1 %1647 }
0x182e   :  { %v1650_v57 = vadd.f32 %v1648_v21, %v1640_v16 }
0x1830   :  { %4598 = vtanh.f32 %v1650_v57 }
0x183a   :  { %v4599_v0 = vpop.eup %4598 }
0x183b   :  { %1653 = vrot.lane.b32.xlu0 %v4599_v0, %s4731_s4 }
0x18ad   :  { %v1654_v1 = vpop.permute.xlu0 %1653 }
0x18ae   :  { %v1656_v3 = vmul.f32 %v1654_v1, %v1639_v50 }
0x18b0   :  { %v1657_v2 = vpack.c.bf16 %v1656_v3, %v1656_v3  ;;  %v2148_v18 = vcombine.high %v1656_v3, %v1656_v3  ;;  %v2155_v45 = vrot.slane %v1656_v3, %v5018_v62 }
0x18b2   :  { %1659 = vrot.lane.b32.xlu1 %v1657_v2, %s4732_s25  ;;  %v2162_v42 = vrot.slane %v2148_v18, %v5018_v62  ;;  %v2163_v41 = vcombine.high %v2155_v45, %v2155_v45  ;;  %v2171_v4 = vrot.slane %v2155_v45, %v5018_v62 }
0x18b4   :  { %v2164_v58 = vcombine.high %v2162_v42, %v2162_v42  ;;  %v2178_v10 = vrot.slane %v2162_v42, %v5018_v62  ;;  %v2185_v20 = vrot.slane %v2163_v41, %v5018_v62 }
0x18b6   :  { %v2192_v21 = vrot.slane %v2164_v58, %v5018_v62  ;;  %v2194_v0 = vcombine.high %v2178_v10, %v2178_v10 }
0x1924   :  { %v1660_v38 = vpop.permute.xlu1 %1659 }
0x1925   :  { %4358 = vmatmul.mubr.msk.bf16.vlgmr.msra.gmra.mrb[28].mxu1 %vm82_vm0, %v1660_v38 }
0x1926   :  { %4370 = vmatpush3.bf16.msra.mxu1 %v5372_v53  ;;  %4373 = vmatprep.mubr.msk.bf16.mxu1 %vm4728_vm1, %v4727_v15 }
0x1927   :  { %4371 = vmatprep.subr.bf16.mxu1 %v4727_v15 }
0x192a   :  { %4372 = vmatpush3.bf16.msra.mxu1 %v5378_v61 }
0x192b   :  { %4385 = vmatprep.subr.bf16.mxu1 %v4727_v15 }
0x19f8   :  { %v1698_v17 = vpop.f32.mrb[28].mxu1 }
0x19f9   :  { %v1704_v22 = vadd.f32 %v1698_v17, %v4984_v31  ;;  %v4359_v6 = vpop.f32.mrb[29].mxu1 }
0x19fa   :  { %v1701_v32 = vpop.f32.mrb[30].mxu1 }
0x19fb   :  { %v1705_v36 = vmul.f32 %v1704_v22, %v4889_v30  ;;  %v4360_v60 = vpop.f32.mrb[31].mxu1  ;;  %v2195_v22 = vcombine.high %v2185_v20, %v2185_v20 }
0x19fd   :  { %4600 = vtanh.f32 %v1705_v36 }
0x1a07   :  { %v4601_v59 = vpop.eup %4600 }
0x1a08   :  { %v1707_v43 = vmul.f32 0.5, %v4601_v59 }
0x1a0a   :  { %v1708_v44 = vadd.f32 0.5, %v1707_v43 }
0x1a0c   :  { %v1709_v14 = vsel %vm4882_vm4, %v4601_v59, %v1708_v44 }
0x1a0d   :  { %1712 = vrot.lane.b32.xlu0 %v1709_v14, %s4731_s4  ;;  %v1710_v47 = vmul.f32 %v1709_v14, %v1650_v57  ;;  %v2193_v57 = vcombine.high %v2171_v4, %v2171_v4 }
0x1a7f   :  { %v1713_v11 = vpop.permute.xlu0 %1712 }
0x1a80   :  { %v1715_v24 = vmul.f32 %v1713_v11, %v1709_v14 }
0x1a82   :  { %1717 = vrot.lane.b32.xlu1 %v1715_v24, %s4732_s25 }
0x1af4   :  { %v1718_v31 = vpop.permute.xlu1 %1717 }
0x1af5   :  { %v5465_v8 = vadd.f32 %v1718_v31, %v1710_v47 }
0x1af7   :  { %4602 = vtanh.f32 %v5465_v8 }
0x1b01   :  { %v4603_v52 = vpop.eup %4602 }
0x1b02   :  { %1723 = vrot.lane.b32.xlu0 %v4603_v52, %s4731_s4 }
0x1b74   :  { %v1724_v46 = vpop.permute.xlu0 %1723 }
0x1b75   :  { %v1726_v51 = vmul.f32 %v1724_v46, %v1709_v14  ;;  %v2196_v14 = vcombine.high %v2192_v21, %v2192_v21 }
0x1b77   :  { %v2206_v56 = vcombine.high %v1726_v51, %v1726_v51  ;;  %v2213_v55 = vrot.slane %v1726_v51, %v5018_v62  ;;  %v1727_v29 = vpack.c.bf16 %v1726_v51, %v1726_v51 }
0x1b79   :  { %v2220_v5 = vrot.slane %v2206_v56, %v5018_v62  ;;  %v2221_v26 = vcombine.high %v2213_v55, %v2213_v55  ;;  %v2229_v12 = vrot.slane %v2213_v55, %v5018_v62  ;;  %1729 = vrot.lane.b32.xlu1 %v1727_v29, %s4732_s25 }
0x1b7b   :  { %v2222_v50 = vcombine.high %v2220_v5, %v2220_v5  ;;  %v2236_v23 = vrot.slane %v2220_v5, %v5018_v62  ;;  %v2243_v9 = vrot.slane %v2221_v26, %v5018_v62  ;;  %v2251_v16 = vcombine.high %v2229_v12, %v2229_v12 }
0x1b7c   :  { %v2558_v1 = vrot.slane %v2229_v12, %v5023_v7 }
0x1b7d   :  { %v2250_v3 = vrot.slane %v2222_v50, %v5018_v62  ;;  %v2252_v2 = vcombine.high %v2236_v23, %v2236_v23  ;;  %v2253_v38 = vcombine.high %v2243_v9, %v2243_v9  ;;  %v2562_v17 = vrot.slane %v2243_v9, %v5023_v7 }
0x1b7e   :  { %v2566_v6 = vrot.slane %v2251_v16, %v5023_v7  ;;  %v2574_v32 = vrot.slane %v2236_v23, %v5023_v7  ;;  %v5487_v36 = vsel %vm1524_vm5, %v2171_v4, %v2558_v1 }
0x1b7f   :  { %v2254_v60 = vcombine.high %v2250_v3, %v2250_v3  ;;  %v2570_v59 = vrot.slane %v2253_v38, %v5023_v7  ;;  %v2578_v43 = vrot.slane %v2250_v3, %v5023_v7  ;;  %v2582_v44 = vrot.slane %v2252_v2, %v5023_v7 }
0x1b80   :  { %v2836_v11 = vsel %vm1524_vm5, %v2185_v20, %v2562_v17  ;;  %v2837_v24 = vsel %vm1524_vm5, %v2193_v57, %v2566_v6  ;;  %v2839_v47 = vsel %vm1524_vm5, %v2178_v10, %v2574_v32 }
0x1b81   :  { %v2586_v31 = vrot.slane %v2254_v60, %v5023_v7  ;;  %v2838_v52 = vsel %vm1524_vm5, %v2195_v22, %v2570_v59  ;;  %v2840_v18 = vsel %vm1524_vm5, %v2192_v21, %v2578_v43  ;;  %v2841_v45 = vsel %vm1524_vm5, %v2194_v0, %v2582_v44 }
0x1b83   :  { %v2842_v42 = vsel %vm1524_vm5, %v2196_v14, %v2586_v31 }
0x1beb   :  { %v1730_v46 = vpop.permute.xlu1 %1729 }
0x1bec   :  { %4366 = vmatmul.mubr.msk.bf16.vlgmr.msra.gmra.mrb[24].mxu0 %vm82_vm0, %v1730_v46 }
0x1bed   :  { %4378 = vmatpush3.bf16.msra.mxu0 %v5372_v53  ;;  %4381 = vmatprep.mubr.msk.bf16.mxu0 %vm4728_vm1, %v4727_v15 }
0x1bee   :  { %4379 = vmatprep.subr.bf16.mxu0 %v4727_v15 }
0x1bf1   :  { %4380 = vmatpush3.bf16.msra.mxu0 %v5378_v61 }
0x1bf2   :  { %4393 = vmatprep.subr.bf16.mxu0 %v4727_v15 }
0x1cbf   :  { %v1768_v51 = vpop.f32.mrb[24].mxu0 }
0x1cc0   :  { %v1774_v41 = vadd.f32 %v1768_v51, %v4976_v19  ;;  %v4367_v56 = vpop.f32.mrb[25].mxu0 }
0x1cc1   :  { %v1771_v55 = vpop.f32.mrb[26].mxu0 }
0x1cc2   :  { %v1775_v29 = vmul.f32 %v1774_v41, %v4889_v30  ;;  %v4368_v58 = vpop.f32.mrb[27].mxu0 }
0x1cc4   :  { %4604 = vtanh.f32 %v1775_v29 }
0x1cce   :  { %v4605_v4 = vpop.eup %4604 }
0x1ccf   :  { %v1777_v10 = vmul.f32 0.5, %v4605_v4 }
0x1cd1   :  { %v1778_v5 = vadd.f32 0.5, %v1777_v10 }
0x1cd3   :  { %v1779_v26 = vsel %vm4882_vm4, %v4605_v4, %v1778_v5 }
0x1cd4   :  { %1782 = vrot.lane.b32.xlu0 %v1779_v26, %s4731_s4  ;;  %v1780_v19 = vmul.f32 %v1779_v26, %v5465_v8 }
0x1d46   :  { %v1783_v12 = vpop.permute.xlu0 %1782 }
0x1d47   :  { %v1785_v20 = vmul.f32 %v1783_v12, %v1779_v26 }
0x1d49   :  { %1787 = vrot.lane.b32.xlu1 %v1785_v20, %s4732_s25 }
0x1dbb   :  { %v1788_v50 = vpop.permute.xlu1 %1787 }
0x1dbc   :  { %v1790_v23 = vadd.f32 %v1788_v50, %v1780_v19 }
0x1dbe   :  { %4606 = vtanh.f32 %v1790_v23 }
0x1dc8   :  { %v4607_v9 = vpop.eup %4606 }
0x1dc9   :  { %1793 = vrot.lane.b32.xlu0 %v4607_v9, %s4731_s4 }
0x1e3b   :  { %v1794_v16 = vpop.permute.xlu0 %1793 }
0x1e3c   :  { %v1796_v21 = vmul.f32 %v1794_v16, %v1779_v26 }
0x1e3e   :  { %v2256_v57 = vcombine.high %v1796_v21, %v1796_v21  ;;  %v2263_v0 = vrot.slane %v1796_v21, %v5018_v62  ;;  %v1797_v1 = vpack.c.bf16 %v1796_v21, %v1796_v21 }
0x1e40   :  { %v2270_v3 = vrot.slane %v2256_v57, %v5018_v62  ;;  %v2271_v2 = vcombine.high %v2263_v0, %v2263_v0  ;;  %v2279_v38 = vrot.slane %v2263_v0, %v5018_v62  ;;  %1799 = vrot.lane.b32.xlu1 %v1797_v1, %s4732_s25 }
0x1e42   :  { %v2272_v8 = vcombine.high %v2270_v3, %v2270_v3  ;;  %v2286_v17 = vrot.slane %v2270_v3, %v5018_v62  ;;  %v2293_v22 = vrot.slane %v2271_v2, %v5018_v62  ;;  %v2301_v6 = vcombine.high %v2279_v38, %v2279_v38 }
0x1e43   :  { %v2598_v32 = vrot.slane %v2279_v38, %v5023_v7 }
0x1e44   :  { %v2300_v60 = vrot.slane %v2272_v8, %v5018_v62  ;;  %v2302_v59 = vcombine.high %v2286_v17, %v2286_v17  ;;  %v2303_v43 = vcombine.high %v2293_v22, %v2293_v22  ;;  %v2602_v44 = vrot.slane %v2293_v22, %v5023_v7 }
0x1e45   :  { %v2606_v14 = vrot.slane %v2301_v6, %v5023_v7  ;;  %v2614_v31 = vrot.slane %v2286_v17, %v5023_v7  ;;  %v2843_v46 = vsel %vm1533_vm6, %v5487_v36, %v2598_v32 }
0x1e46   :  { %v2304_v51 = vcombine.high %v2300_v60, %v2300_v60  ;;  %v2610_v41 = vrot.slane %v2303_v43, %v5023_v7  ;;  %v2618_v56 = vrot.slane %v2300_v60, %v5023_v7  ;;  %v2622_v55 = vrot.slane %v2302_v59, %v5023_v7 }
0x1e47   :  { %v2844_v29 = vsel %vm1533_vm6, %v2836_v11, %v2602_v44  ;;  %v2845_v58 = vsel %vm1533_vm6, %v2837_v24, %v2606_v14  ;;  %v2847_v4 = vsel %vm1533_vm6, %v2839_v47, %v2614_v31 }
0x1e48   :  { %v2626_v10 = vrot.slane %v2304_v51, %v5023_v7  ;;  %v2846_v5 = vsel %vm1533_vm6, %v2838_v52, %v2610_v41  ;;  %v2848_v26 = vsel %vm1533_vm6, %v2840_v18, %v2618_v56  ;;  %v2849_v36 = vsel %vm1533_vm6, %v2841_v45, %v2622_v55 }
0x1e4a   :  { %v2850_v12 = vsel %vm1533_vm6, %v2842_v42, %v2626_v10 }
0x1eb2   :  { %v1800_v20 = vpop.permute.xlu1 %1799 }
0x1eb3   :  { %4374 = vmatmul.mubr.msk.bf16.vlgmr.msra.gmra.mrb[32].mxu1 %vm82_vm0, %v1800_v20 }
0x1eb4   :  { %4386 = vmatpush3.bf16.msra.mxu1 %v5372_v53  ;;  %4389 = vmatprep.mubr.msk.bf16.mxu1 %vm4728_vm1, %v4727_v15 }
0x1eb5   :  { %4387 = vmatprep.subr.bf16.mxu1 %v4727_v15 }
0x1eb8   :  { %4388 = vmatpush3.bf16.msra.mxu1 %v5378_v61 }
0x1eb9   :  { %4401 = vmatprep.subr.bf16.mxu1 %v4727_v15 }
0x1f86   :  { %v1838_v11 = vpop.f32.mrb[32].mxu1 }
0x1f87   :  { %v1844_v24 = vadd.f32 %v1838_v11, %v4981_v28  ;;  %v4375_v47 = vpop.f32.mrb[33].mxu1 }
0x1f88   :  { %v1841_v52 = vpop.f32.mrb[34].mxu1 }
0x1f89   :  { %v1845_v18 = vmul.f32 %v1844_v24, %v4889_v30  ;;  %v4376_v45 = vpop.f32.mrb[35].mxu1 }
0x1f8b   :  { %4608 = vtanh.f32 %v1845_v18 }
0x1f95   :  { %v4609_v42 = vpop.eup %4608 }
0x1f96   :  { %v1847_v19 = vmul.f32 0.5, %v4609_v42 }
0x1f98   :  { %v1848_v50 = vadd.f32 0.5, %v1847_v19 }
0x1f9a   :  { %v1849_v9 = vsel %vm4882_vm4, %v4609_v42, %v1848_v50 }
0x1f9b   :  { %1852 = vrot.lane.b32.xlu0 %v1849_v9, %s4731_s4  ;;  %v1850_v57 = vmul.f32 %v1849_v9, %v1790_v23 }
0x200d   :  { %v1853_v16 = vpop.permute.xlu0 %1852 }
0x200e   :  { %v1855_v21 = vmul.f32 %v1853_v16, %v1849_v9 }
0x2010   :  { %1857 = vrot.lane.b32.xlu1 %v1855_v21, %s4732_s25 }
0x2082   :  { %v1858_v28 = vpop.permute.xlu1 %1857 }
0x2083   :  { %v1860_v0 = vadd.f32 %v1858_v28, %v1850_v57 }
0x2085   :  { %4610 = vtanh.f32 %v1860_v0 }
0x208f   :  { %v4611_v1 = vpop.eup %4610 }
0x2090   :  { %1863 = vrot.lane.b32.xlu0 %v4611_v1, %s4731_s4 }
0x2102   :  { %v1864_v3 = vpop.permute.xlu0 %1863 }
0x2103   :  { %v1866_v2 = vmul.f32 %v1864_v3, %v1849_v9 }
0x2105   :  { %v2306_v38 = vcombine.high %v1866_v2, %v1866_v2  ;;  %v2313_v8 = vrot.slane %v1866_v2, %v5018_v62  ;;  %v1867_v17 = vpack.c.bf16 %v1866_v2, %v1866_v2 }
0x2107   :  { %v2320_v22 = vrot.slane %v2306_v38, %v5018_v62  ;;  %v2321_v6 = vcombine.high %v2313_v8, %v2313_v8  ;;  %v2329_v32 = vrot.slane %v2313_v8, %v5018_v62  ;;  %1869 = vrot.lane.b32.xlu1 %v1867_v17, %s4732_s25 }
0x2109   :  { %v2322_v23 = vcombine.high %v2320_v22, %v2320_v22  ;;  %v2336_v60 = vrot.slane %v2320_v22, %v5018_v62  ;;  %v2343_v59 = vrot.slane %v2321_v6, %v5018_v62  ;;  %v2351_v43 = vcombine.high %v2329_v32, %v2329_v32 }
0x210a   :  { %v2638_v44 = vrot.slane %v2329_v32, %v5023_v7 }
0x210b   :  { %v2350_v14 = vrot.slane %v2322_v23, %v5018_v62  ;;  %v2352_v31 = vcombine.high %v2336_v60, %v2336_v60  ;;  %v2353_v51 = vcombine.high %v2343_v59, %v2343_v59  ;;  %v2642_v41 = vrot.slane %v2343_v59, %v5023_v7 }
0x210c   :  { %v2646_v56 = vrot.slane %v2351_v43, %v5023_v7  ;;  %v2654_v55 = vrot.slane %v2336_v60, %v5023_v7  ;;  %v2851_v10 = vsel %vm1542_vm7, %v2843_v46, %v2638_v44 }
0x210d   :  { %v2354_v20 = vcombine.high %v2350_v14, %v2350_v14  ;;  %v2650_v11 = vrot.slane %v2353_v51, %v5023_v7  ;;  %v2658_v24 = vrot.slane %v2350_v14, %v5023_v7  ;;  %v2662_v47 = vrot.slane %v2352_v31, %v5023_v7 }
0x210e   :  { %v2852_v52 = vsel %vm1542_vm7, %v2844_v29, %v2642_v41  ;;  %v2853_v18 = vsel %vm1542_vm7, %v2845_v58, %v2646_v56  ;;  %v2855_v45 = vsel %vm1542_vm7, %v2847_v4, %v2654_v55 }
0x210f   :  { %v2666_v42 = vrot.slane %v2354_v20, %v5023_v7  ;;  %v2854_v19 = vsel %vm1542_vm7, %v2846_v5, %v2650_v11  ;;  %v2856_v50 = vsel %vm1542_vm7, %v2848_v26, %v2658_v24  ;;  %v2857_v46 = vsel %vm1542_vm7, %v2849_v36, %v2662_v47 }
0x2111   :  { %v2858_v9 = vsel %vm1542_vm7, %v2850_v12, %v2666_v42 }
0x2179   :  { %v1870_v16 = vpop.permute.xlu1 %1869 }
0x217a   :  { %4382 = vmatmul.mubr.msk.bf16.vlgmr.msra.gmra.mrb[28].mxu0 %vm82_vm0, %v1870_v16 }
0x217b   :  { %4394 = vmatpush3.bf16.msra.mxu0 %v5372_v53  ;;  %4397 = vmatprep.mubr.msk.bf16.mxu0 %vm4728_vm1, %v4727_v15 }
0x217c   :  { %4395 = vmatprep.subr.bf16.mxu0 %v4727_v15 }
0x217f   :  { %4396 = vmatpush3.bf16.msra.mxu0 %v5378_v61 }
0x2180   :  { %4409 = vmatprep.subr.bf16.mxu0 %v4727_v15 }
0x224d   :  { %v1908_v29 = vpop.f32.mrb[28].mxu0 }
0x224e   :  { %v1914_v58 = vadd.f32 %v1908_v29, %v4990_v35  ;;  %v4383_v4 = vpop.f32.mrb[29].mxu0 }
0x224f   :  { %v1911_v5 = vpop.f32.mrb[30].mxu0 }
0x2250   :  { %v1915_v26 = vmul.f32 %v1914_v58, %v4889_v30  ;;  %v4384_v36 = vpop.f32.mrb[31].mxu0 }
0x2252   :  { %4612 = vtanh.f32 %v1915_v26 }
0x225c   :  { %v4613_v12 = vpop.eup %4612 }
0x225d   :  { %v1917_v21 = vmul.f32 0.5, %v4613_v12 }
0x225f   :  { %v1918_v57 = vadd.f32 0.5, %v1917_v21 }
0x2261   :  { %v1919_v28 = vsel %vm4882_vm4, %v4613_v12, %v1918_v57 }
0x2262   :  { %1922 = vrot.lane.b32.xlu0 %v1919_v28, %s4731_s4  ;;  %v1920_v2 = vmul.f32 %v1919_v28, %v1860_v0 }
0x22d4   :  { %v1923_v1 = vpop.permute.xlu0 %1922 }
0x22d5   :  { %v1925_v3 = vmul.f32 %v1923_v1, %v1919_v28 }
0x22d7   :  { %1927 = vrot.lane.b32.xlu1 %v1925_v3, %s4732_s25 }
0x2349   :  { %v1928_v35 = vpop.permute.xlu1 %1927 }
0x234a   :  { %v1930_v38 = vadd.f32 %v1928_v35, %v1920_v2 }
0x234c   :  { %4614 = vtanh.f32 %v1930_v38 }
0x2356   :  { %v4615_v8 = vpop.eup %4614 }
0x2357   :  { %1933 = vrot.lane.b32.xlu0 %v4615_v8, %s4731_s4 }
0x23c9   :  { %v1934_v17 = vpop.permute.xlu0 %1933 }
0x23ca   :  { %v1936_v22 = vmul.f32 %v1934_v17, %v1919_v28 }
0x23cc   :  { %v2356_v6 = vcombine.high %v1936_v22, %v1936_v22  ;;  %v2363_v32 = vrot.slane %v1936_v22, %v5018_v62  ;;  %v1937_v23 = vpack.c.bf16 %v1936_v22, %v1936_v22 }
0x23ce   :  { %v2370_v60 = vrot.slane %v2356_v6, %v5018_v62  ;;  %v2371_v59 = vcombine.high %v2363_v32, %v2363_v32  ;;  %v2379_v43 = vrot.slane %v2363_v32, %v5018_v62  ;;  %1939 = vrot.lane.b32.xlu1 %v1937_v23, %s4732_s25 }
0x23d0   :  { %v2372_v0 = vcombine.high %v2370_v60, %v2370_v60  ;;  %v2386_v44 = vrot.slane %v2370_v60, %v5018_v62  ;;  %v2393_v14 = vrot.slane %v2371_v59, %v5018_v62  ;;  %v2401_v31 = vcombine.high %v2379_v43, %v2379_v43 }
0x23d1   :  { %v2678_v51 = vrot.slane %v2379_v43, %v5023_v7 }
0x23d2   :  { %v2400_v41 = vrot.slane %v2372_v0, %v5018_v62  ;;  %v2402_v56 = vcombine.high %v2386_v44, %v2386_v44  ;;  %v2403_v55 = vcombine.high %v2393_v14, %v2393_v14  ;;  %v2682_v20 = vrot.slane %v2393_v14, %v5023_v7 }
0x23d3   :  { %v2686_v11 = vrot.slane %v2401_v31, %v5023_v7  ;;  %v2694_v24 = vrot.slane %v2386_v44, %v5023_v7  ;;  %v2859_v47 = vsel %vm1551_vm8, %v2851_v10, %v2678_v51 }
0x23d4   :  { %v2404_v42 = vcombine.high %v2400_v41, %v2400_v41  ;;  %v2690_v16 = vrot.slane %v2403_v55, %v5023_v7  ;;  %v2698_v29 = vrot.slane %v2400_v41, %v5023_v7  ;;  %v2702_v58 = vrot.slane %v2402_v56, %v5023_v7 }
0x23d5   :  { %v2860_v4 = vsel %vm1551_vm8, %v2852_v52, %v2682_v20  ;;  %v2861_v5 = vsel %vm1551_vm8, %v2853_v18, %v2686_v11  ;;  %v2863_v26 = vsel %vm1551_vm8, %v2855_v45, %v2694_v24 }
0x23d6   :  { %v2706_v36 = vrot.slane %v2404_v42, %v5023_v7  ;;  %v2862_v12 = vsel %vm1551_vm8, %v2854_v19, %v2690_v16  ;;  %v2864_v21 = vsel %vm1551_vm8, %v2856_v50, %v2698_v29  ;;  %v2865_v10 = vsel %vm1551_vm8, %v2857_v46, %v2702_v58 }
0x23d8   :  { %v2866_v57 = vsel %vm1551_vm8, %v2858_v9, %v2706_v36 }
0x2440   :  { %v1940_v28 = vpop.permute.xlu1 %1939 }
0x2441   :  { %4390 = vmatmul.mubr.msk.bf16.vlgmr.msra.gmra.mrb[36].mxu1 %vm82_vm0, %v1940_v28 }
0x2442   :  { %4402 = vmatpush3.bf16.msra.mxu1 %v5372_v53  ;;  %4405 = vmatprep.mubr.msk.bf16.mxu1 %vm4728_vm1, %v4727_v15 }
0x2443   :  { %4403 = vmatprep.subr.bf16.mxu1 %v4727_v15 }
0x2446   :  { %4404 = vmatpush3.bf16.msra.mxu1 %v5378_v61 }
0x2447   :  { %4415 = vmatprep.subr.bf16.mxu1 %v4727_v15 }
0x2514   :  { %v1978_v52 = vpop.f32.mrb[36].mxu1 }
0x2515   :  { %v1984_v18 = vadd.f32 %v1978_v52, %v4996_v39  ;;  %v4391_v45 = vpop.f32.mrb[37].mxu1 }
0x2516   :  { %v1981_v19 = vpop.f32.mrb[38].mxu1 }
0x2517   :  { %v1985_v50 = vmul.f32 %v1984_v18, %v4889_v30  ;;  %v4392_v46 = vpop.f32.mrb[39].mxu1 }
0x2519   :  { %4616 = vtanh.f32 %v1985_v50 }
0x2523   :  { %v4617_v9 = vpop.eup %4616 }
0x2524   :  { %v1987_v53 = vmul.f32 0.5, %v4617_v9 }
0x2526   :  { %v1988_v1 = vadd.f32 0.5, %v1987_v53 }
0x2528   :  { %v1989_v3 = vsel %vm4882_vm4, %v4617_v9, %v1988_v1 }
0x2529   :  { %1992 = vrot.lane.b32.xlu0 %v1989_v3, %s4731_s4  ;;  %v1990_v35 = vmul.f32 %v1989_v3, %v1930_v38 }
0x259b   :  { %v1993_v61 = vpop.permute.xlu0 %1992 }
0x259c   :  { %v1995_v2 = vmul.f32 %v1993_v61, %v1989_v3 }
0x259e   :  { %1997 = vrot.lane.b32.xlu1 %v1995_v2, %s4732_s25 }
0x2610   :  { %v1998_v39 = vpop.permute.xlu1 %1997 }
0x2611   :  { %v2000_v8 = vadd.f32 %v1998_v39, %v1990_v35 }
0x2613   :  { %4618 = vtanh.f32 %v2000_v8 }
0x261d   :  { %v4619_v17 = vpop.eup %4618 }
0x261e   :  { %2003 = vrot.lane.b32.xlu0 %v4619_v17, %s4731_s4 }
0x2690   :  { %v2004_v22 = vpop.permute.xlu0 %2003 }
0x2691   :  { %v2006_v6 = vmul.f32 %v2004_v22, %v1989_v3 }
0x2693   :  { %v2406_v32 = vcombine.high %v2006_v6, %v2006_v6  ;;  %v2413_v23 = vrot.slane %v2006_v6, %v5018_v62  ;;  %v2007_v60 = vpack.c.bf16 %v2006_v6, %v2006_v6 }
0x2695   :  { %v2420_v59 = vrot.slane %v2406_v32, %v5018_v62  ;;  %v2421_v43 = vcombine.high %v2413_v23, %v2413_v23  ;;  %v2429_v0 = vrot.slane %v2413_v23, %v5018_v62  ;;  %2009 = vrot.lane.b32.xlu1 %v2007_v60, %s4732_s25 }
0x2697   :  { %v2422_v38 = vcombine.high %v2420_v59, %v2420_v59  ;;  %v2436_v44 = vrot.slane %v2420_v59, %v5018_v62  ;;  %v2443_v14 = vrot.slane %v2421_v43, %v5018_v62  ;;  %v2451_v31 = vcombine.high %v2429_v0, %v2429_v0 }
0x2698   :  { %v2718_v51 = vrot.slane %v2429_v0, %v5023_v7 }
0x2699   :  { %v2450_v41 = vrot.slane %v2422_v38, %v5018_v62  ;;  %v2452_v56 = vcombine.high %v2436_v44, %v2436_v44  ;;  %v2453_v55 = vcombine.high %v2443_v14, %v2443_v14  ;;  %v2722_v20 = vrot.slane %v2443_v14, %v5023_v7 }
0x269a   :  { %v2726_v11 = vrot.slane %v2451_v31, %v5023_v7  ;;  %v2734_v24 = vrot.slane %v2436_v44, %v5023_v7  ;;  %v2867_v42 = vsel %vm1560_vm9, %v2859_v47, %v2718_v51 }
0x269b   :  { %v2454_v16 = vcombine.high %v2450_v41, %v2450_v41  ;;  %v2730_v29 = vrot.slane %v2453_v55, %v5023_v7  ;;  %v2738_v58 = vrot.slane %v2450_v41, %v5023_v7  ;;  %v2742_v36 = vrot.slane %v2452_v56, %v5023_v7 }
0x269c   :  { %v2868_v28 = vsel %vm1560_vm9, %v2860_v4, %v2722_v20  ;;  %v2869_v52 = vsel %vm1560_vm9, %v2861_v5, %v2726_v11  ;;  %v2871_v18 = vsel %vm1560_vm9, %v2863_v26, %v2734_v24 }
0x269d   :  { %v2870_v45 = vsel %vm1560_vm9, %v2862_v12, %v2730_v29  ;;  %v2872_v19 = vsel %vm1560_vm9, %v2864_v21, %v2738_v58  ;;  %v2873_v50 = vsel %vm1560_vm9, %v2865_v10, %v2742_v36  ;;  %v2746_v47 = vrot.slane %v2454_v16, %v5023_v7 }
0x269f   :  { %v2874_v46 = vsel %vm1560_vm9, %v2866_v57, %v2746_v47 }
0x2707   :  { %v2010_v9 = vpop.permute.xlu1 %2009 }
0x2708   :  { %4398 = vmatmul.mubr.msk.bf16.vlgmr.msra.gmra.mrb[32].mxu0 %vm82_vm0, %v2010_v9 }
0x2709   :  { %4411 = vmatprep.mubr.msk.bf16.mxu0 %vm4728_vm1, %v4727_v15 }
0x27db   :  { %v2048_v4 = vpop.f32.mrb[32].mxu0 }
0x27dc   :  { %v2054_v5 = vadd.f32 %v2048_v4, %v4987_v33  ;;  %v4399_v26 = vpop.f32.mrb[33].mxu0 }
0x27dd   :  { %v2051_v53 = vpop.f32.mrb[34].mxu0 }
0x27de   :  { %v2055_v12 = vmul.f32 %v2054_v5, %v4889_v30  ;;  %v4400_v21 = vpop.f32.mrb[35].mxu0 }
0x27e0   :  { %4620 = vtanh.f32 %v2055_v12 }
0x27ea   :  { %v4621_v10 = vpop.eup %4620 }
0x27eb   :  { %v2057_v1 = vmul.f32 0.5, %v4621_v10 }
0x27ed   :  { %v2058_v3 = vadd.f32 0.5, %v2057_v1 }
0x27ef   :  { %v2059_v57 = vsel %vm4882_vm4, %v4621_v10, %v2058_v3 }
0x27f0   :  { %2062 = vrot.lane.b32.xlu0 %v2059_v57, %s4731_s4  ;;  %v2060_v35 = vmul.f32 %v2059_v57, %v2000_v8 }
0x2862   :  { %v2063_v61 = vpop.permute.xlu0 %2062 }
0x2863   :  { %v2065_v2 = vmul.f32 %v2063_v61, %v2059_v57 }
0x2865   :  { %2067 = vrot.lane.b32.xlu1 %v2065_v2, %s4732_s25 }
0x28d7   :  { %v2068_v33 = vpop.permute.xlu1 %2067 }
0x28d8   :  { %v2070_v39 = vadd.f32 %v2068_v33, %v2060_v35 }
0x28da   :  { %4622 = vtanh.f32 %v2070_v39 }
0x28e4   :  { %v4623_v17 = vpop.eup %4622 }
0x28e5   :  { %2073 = vrot.lane.b32.xlu0 %v4623_v17, %s4731_s4 }
0x2957   :  { %v2074_v22 = vpop.permute.xlu0 %2073 }
0x2958   :  { %v2076_v6 = vmul.f32 %v2074_v22, %v2059_v57 }
0x295a   :  { %v2456_v32 = vcombine.high %v2076_v6, %v2076_v6  ;;  %v2463_v23 = vrot.slane %v2076_v6, %v5018_v62  ;;  %v2077_v60 = vpack.c.bf16 %v2076_v6, %v2076_v6 }
0x295c   :  { %v2470_v59 = vrot.slane %v2456_v32, %v5018_v62  ;;  %v2471_v43 = vcombine.high %v2463_v23, %v2463_v23  ;;  %v2479_v0 = vrot.slane %v2463_v23, %v5018_v62  ;;  %2079 = vrot.lane.b32.xlu1 %v2077_v60, %s4732_s25 }
0x295e   :  { %v2472_v8 = vcombine.high %v2470_v59, %v2470_v59  ;;  %v2486_v38 = vrot.slane %v2470_v59, %v5018_v62  ;;  %v2493_v44 = vrot.slane %v2471_v43, %v5018_v62  ;;  %v2501_v14 = vcombine.high %v2479_v0, %v2479_v0 }
0x295f   :  { %v2758_v31 = vrot.slane %v2479_v0, %v5023_v7 }
0x2960   :  { %v2500_v51 = vrot.slane %v2472_v8, %v5018_v62  ;;  %v2502_v41 = vcombine.high %v2486_v38, %v2486_v38  ;;  %v2503_v56 = vcombine.high %v2493_v44, %v2493_v44  ;;  %v2762_v55 = vrot.slane %v2493_v44, %v5023_v7 }
0x2961   :  { %v2766_v20 = vrot.slane %v2501_v14, %v5023_v7  ;;  %v2774_v11 = vrot.slane %v2486_v38, %v5023_v7  ;;  %v5672_v24 = vsel %vm1569_vm10, %v2867_v42, %v2758_v31 }
0x2962   :  { %v2504_v16 = vcombine.high %v2500_v51, %v2500_v51  ;;  %v5675_v29 = vsel %vm1569_vm10, %v2868_v28, %v2762_v55  ;;  %v2770_v58 = vrot.slane %v2503_v56, %v5023_v7  ;;  %v2778_v36 = vrot.slane %v2500_v51, %v5023_v7 }
0x2963   :  { %v5680_v47 = vsel %vm1569_vm10, %v2869_v52, %v2766_v20  ;;  %v5683_v9 = vsel %vm1569_vm10, %v2871_v18, %v2774_v11  ;;  %v2782_v4 = vrot.slane %v2502_v41, %v5023_v7 }
0x2964   :  { %v5687_v5 = vsel %vm1569_vm10, %v2870_v45, %v2770_v58  ;;  %v5690_v42 = vsel %vm1569_vm10, %v2872_v19, %v2778_v36  ;;  %v2786_v28 = vrot.slane %v2504_v16, %v5023_v7 }
0x2965   :  { %v5694_v26 = vsel %vm1569_vm10, %v2873_v50, %v2782_v4 }
0x2966   :  { %v5697_v53 = vsel %vm1569_vm10, %v2874_v46, %v2786_v28  ;;  %v2895_v28 = vpack.c.bf16 %v5414_v63, %v5414_v63 }
0x29ce   :  { %v2080_v52 = vpop.permute.xlu1 %2079 }
0x29cf   :  { %4406 = vmatmul.mubr.msk.bf16.vlgmr.msra.gmra.mrb[40].mxu1 %vm82_vm0, %v2080_v52 }
0x29d0   :  { %4417 = vmatprep.mubr.msk.bf16.mxu1 %vm4728_vm1, %v4727_v15 }
0x2aa2   :  { %v2118_v18 = vpop.f32.mrb[40].mxu1 }
0x2aa3   :  { %v2124_v45 = vadd.f32 %v2118_v18, %v4993_v37  ;;  %v4407_v12 = vpop.f32.mrb[41].mxu1  ;;  %v2891_v37 = vpack.c.bf16 %v5400_v40, %v5400_v40 }
0x2aa4   :  { %v2121_v19 = vpop.f32.mrb[42].mxu1 }
0x2aa5   :  { %v2125_v21 = vmul.f32 %v2124_v45, %v4889_v30  ;;  %v4408_v10 = vpop.f32.mrb[43].mxu1  ;;  %v2893_v30 = vpack.c.bf16 %v5405_v54, %v5405_v54  ;;  %v2892_v54 = vpack.c.bf16 %v5409_v34, %v5409_v34 }
0x2aa7   :  { %4624 = vtanh.f32 %v2125_v21 }
0x2ab1   :  { %v4625_v50 = vpop.eup %4624 }
0x2ab2   :  { %v2127_v1 = vmul.f32 0.5, %v4625_v50 }
0x2ab4   :  { %v2128_v3 = vadd.f32 0.5, %v2127_v1  ;;  %v2898_v1 = vpack.c.bf16 %v5433_v48, %v5433_v48 }
0x2ab6   :  { %v2129_v46 = vsel %vm4882_vm4, %v4625_v50, %v2128_v3  ;;  %v2897_v50 = vpack.c.bf16 %v5428_v49, %v5428_v49 }
0x2ab7   :  { %2132 = vrot.lane.b32.xlu0 %v2129_v46, %s4731_s4  ;;  %v2130_v2 = vmul.f32 %v2129_v46, %v2070_v39  ;;  %v2894_v39 = vpack.c.bf16 %v5419_v25, %v5419_v25 }
0x2b29   :  { %v2133_v57 = vpop.permute.xlu0 %2132 }
0x2b2a   :  { %v2135_v61 = vmul.f32 %v2133_v57, %v2129_v46 }
0x2b2c   :  { %2137 = vrot.lane.b32.xlu1 %v2135_v61, %s4732_s25 }
0x2b30   :  { %2911 = vrot.lane.b32.xlu1 %v2891_v37, %s4732_s25 }
0x2b34   :  { %3015 = vrot.lane.b32.xlu1 %v2893_v30, %s4732_s25 }
0x2b9e   :  { %v2138_v35 = vpop.permute.xlu1 %2137 }
0x2b9f   :  { %v2140_v27 = vadd.f32 %v2138_v35, %v2130_v2 }
0x2ba1   :  { %4626 = vtanh.f32 %v2140_v27 }
0x2ba2   :  { %v5714_v33 = vpop.permute.xlu1 %2911 }
0x2ba3   :  { %v2917_v17 = vsel %vm82_vm0, %v5714_v33, 0 }
0x2ba4   :  { %4410 = vmatpush3.bf16.xpose.msra.mxu0 %v2917_v17 }
0x2ba5   :  { %4421 = vmatprep.subr.bf16.mxu0 %v4727_v15 }
0x2ba6   :  { %v5821_v57 = vpop.permute.xlu1 %3015 }
0x2ba7   :  { %v3021_v37 = vsel %vm82_vm0, %v5821_v57, 0 }
0x2bab   :  { %v4627_v40 = vpop.eup %4626 }
0x2bac   :  { %2143 = vrot.lane.b32.xlu0 %v4627_v40, %s4731_s4 }
0x2bb0   :  { %2963 = vrot.lane.b32.xlu0 %v2892_v54, %s4732_s25 }
0x2bb4   :  { %3067 = vrot.lane.b32.xlu0 %v2894_v39, %s4732_s25 }
0x2c1e   :  { %v2144_v22 = vpop.permute.xlu0 %2143 }
0x2c1f   :  { %v2146_v6 = vmul.f32 %v2144_v22, %v2129_v46 }
0x2c21   :  { %v2506_v32 = vcombine.high %v2146_v6, %v2146_v6  ;;  %v2513_v23 = vrot.slane %v2146_v6, %v5018_v62 }
0x2c22   :  { %v5727_v60 = vpop.permute.xlu0 %2963 }
0x2c23   :  { %v2520_v59 = vrot.slane %v2506_v32, %v5018_v62  ;;  %v2521_v43 = vcombine.high %v2513_v23, %v2513_v23  ;;  %v2529_v0 = vrot.slane %v2513_v23, %v5018_v62  ;;  %v2969_v34 = vsel %vm82_vm0, %v5727_v60, 0 }
0x2c24   :  { %4416 = vmatpush3.bf16.xpose.msra.mxu1 %v2969_v34  ;;  %v3423_v34 = vsel %vm1551_vm8, %v5714_v33, 0 }
0x2c25   :  { %v2522_v8 = vcombine.high %v2520_v59, %v2520_v59  ;;  %v2536_v25 = vrot.slane %v2520_v59, %v5018_v62  ;;  %v2543_v38 = vrot.slane %v2521_v43, %v5018_v62  ;;  %v2551_v44 = vcombine.high %v2529_v0, %v2529_v0  ;;  %4427 = vmatprep.subr.bf16.mxu1 %v4727_v15 }
0x2c26   :  { %v2798_v14 = vrot.slane %v2529_v0, %v5023_v7  ;;  %v5823_v49 = vpop.permute.xlu0 %3067 }
0x2c27   :  { %v2550_v31 = vrot.slane %v2522_v8, %v5018_v62  ;;  %v2553_v51 = vcombine.high %v2543_v38, %v2543_v38  ;;  %v2802_v41 = vrot.slane %v2543_v38, %v5023_v7  ;;  %v2552_v56 = vcombine.high %v2536_v25, %v2536_v25 }
0x2c28   :  { %v2806_v55 = vrot.slane %v2551_v44, %v5023_v7  ;;  %v2814_v20 = vrot.slane %v2536_v25, %v5023_v7  ;;  %v5743_v16 = vsel %vm1578_vm11, %v5672_v24, %v2798_v14  ;;  %v3073_v30 = vsel %vm82_vm0, %v5823_v49, 0 }
0x2c29   :  { %v2554_v11 = vcombine.high %v2550_v31, %v2550_v31  ;;  %v5747_v58 = vsel %vm1578_vm11, %v5675_v29, %v2802_v41  ;;  %v2810_v36 = vrot.slane %v2553_v51, %v5023_v7  ;;  %v2899_v62 = vpack.c.bf16 %v5743_v16, %v5743_v16 }
0x2c2a   :  { %v2900_v4 = vpack.c.bf16 %v5747_v58, %v5747_v58  ;;  %v2818_v24 = vrot.slane %v2550_v31, %v5023_v7  ;;  %v5765_v29 = vsel %vm1578_vm11, %v5680_v47, %v2806_v55  ;;  %v2822_v18 = vrot.slane %v2552_v56, %v5023_v7 }
0x2c2b   :  { %v5758_v52 = vsel %vm1578_vm11, %v5687_v5, %v2810_v36  ;;  %2908 = vrot.lane.b32.xlu1 %v2899_v62, %s4732_s25  ;;  %v2826_v45 = vrot.slane %v2554_v11, %v5023_v7  ;;  %v5771_v63 = vsel %vm1578_vm11, %v5683_v9, %v2814_v20  ;;  %v3780_v19 = vpack.c.bf16 %v5747_v58, %v5743_v16 }
0x2c2c   :  { %2960 = vrot.lane.b32.xlu0 %v2900_v4, %s4732_s25  ;;  %v5775_v5 = vsel %vm1578_vm11, %v5690_v42, %v2818_v24  ;;  %v3781_v12 = vpack.c.bf16 %v5758_v52, %v5765_v29  ;;  %v2896_v47 = vpack.c.bf16 %v5424_v13, %v5424_v13  ;;  %v5785_v7 = vsel %vm1578_vm11, %v5694_v26, %v2822_v18 }
0x2c2d   :  { %v5789_v9 = vsel %vm1578_vm11, %v5697_v53, %v2826_v45  ;;  %v3782_v42 = vpack.c.bf16 %v5775_v5, %v5771_v63  ;;  %v2901_v13 = vpack.c.bf16 %v5765_v29, %v5765_v29  ;;  %v2902_v26 = vpack.c.bf16 %v5758_v52, %v5758_v52 }
0x2c2e   :  { %v3783_v21 = vpack.c.bf16 %v5789_v9, %v5785_v7  ;;  %v2903_v53 = vpack.c.bf16 %v5771_v63, %v5771_v63  ;;  %v2904_v10 = vpack.c.bf16 %v5775_v5, %v5775_v5  ;;  %v2905_v3 = vpack.c.bf16 %v5785_v7, %v5785_v7 }
0x2c2f   :  { %3119 = vrot.lane.b32.xlu1 %v2895_v28, %s4732_s25  ;;  %v2906_v46 = vpack.c.bf16 %v5789_v9, %v5789_v9  ;;  %v3468_v8 = vsel %vm1551_vm8, %v5727_v60, 0  ;;  %v3513_v5 = vsel %vm1551_vm8, %v5821_v57, 0  ;;  %v3558_v9 = vsel %vm1551_vm8, %v5823_v49, 0 }
0x2c30   :  { %3171 = vrot.lane.b32.xlu0 %v2896_v47, %s4732_s25 }
0x2c33   :  { %3012 = vrot.lane.b32.xlu1 %v2901_v13, %s4732_s25 }
0x2c34   :  { %3064 = vrot.lane.b32.xlu0 %v2902_v26, %s4732_s25 }
0x2c37   :  { %3116 = vrot.lane.b32.xlu1 %v2903_v53, %s4732_s25 }
0x2c38   :  { %3168 = vrot.lane.b32.xlu0 %v2904_v10, %s4732_s25 }
0x2c3b   :  { %3223 = vrot.lane.b32.xlu1 %v2897_v50, %s4732_s25 }
0x2c3c   :  { %3275 = vrot.lane.b32.xlu0 %v2898_v1, %s4732_s25 }
0x2c3f   :  { %3220 = vrot.lane.b32.xlu1 %v2905_v3, %s4732_s25 }
0x2c40   :  { %3272 = vrot.lane.b32.xlu0 %v2906_v46, %s4732_s25 }
0x2c9d   :  { %v2909_v61 = vpop.permute.xlu1 %2908 }
0x2c9e   :  { %v2961_v48 = vpop.permute.xlu0 %2960  ;;  %4412 = vmatmul.mubr.msk.bf16.vlgmr.msra.gmra.mrb[36].mxu0 %vm82_vm0, %v2909_v61 }
0x2c9f   :  { %4418 = vmatmul.mubr.msk.bf16.vlgmr.msra.gmra.mrb[44].mxu1 %vm82_vm0, %v2961_v48  ;;  %4422 = vmatpush3.bf16.xpose.msra.mxu0 %v3021_v37 }
0x2ca0   :  { %4428 = vmatpush3.bf16.xpose.msra.mxu1 %v3073_v30  ;;  %4423 = vmatprep.mubr.msk.bf16.mxu0 %vm4728_vm1, %v4727_v15 }
0x2ca1   :  { %4433 = vmatprep.subr.bf16.mxu0 %v4727_v15  ;;  %v5834_v2 = vpop.permute.xlu1 %3119  ;;  %4429 = vmatprep.mubr.msk.bf16.mxu1 %vm4728_vm1, %v4727_v15 }
0x2ca2   :  { %v5836_v35 = vpop.permute.xlu0 %3171  ;;  %4439 = vmatprep.subr.bf16.mxu1 %v4727_v15  ;;  %v3125_v40 = vsel %vm82_vm0, %v5834_v2, 0 }
0x2ca3   :  { %v3177_v54 = vsel %vm82_vm0, %v5836_v35, 0 }
0x2ca5   :  { %v3013_v27 = vpop.permute.xlu1 %3012 }
0x2ca6   :  { %v3065_v17 = vpop.permute.xlu0 %3064  ;;  %4424 = vmatmul.mubr.msk.bf16.vlgmr.msra.gmra.mrb[40].mxu0 %vm82_vm0, %v3013_v27 }
0x2ca7   :  { %4430 = vmatmul.mubr.msk.bf16.vlgmr.msra.gmra.mrb[48].mxu1 %vm82_vm0, %v3065_v17  ;;  %4434 = vmatpush3.bf16.xpose.msra.mxu0 %v3125_v40 }
0x2ca8   :  { %4440 = vmatpush3.bf16.xpose.msra.mxu1 %v3177_v54  ;;  %4435 = vmatprep.mubr.msk.bf16.mxu0 %vm4728_vm1, %v4727_v15 }
0x2ca9   :  { %4445 = vmatprep.subr.bf16.mxu0 %v4727_v15  ;;  %v3117_v39 = vpop.permute.xlu1 %3116  ;;  %4441 = vmatprep.mubr.msk.bf16.mxu1 %vm4728_vm1, %v4727_v15 }
0x2caa   :  { %v3169_v22 = vpop.permute.xlu0 %3168  ;;  %4451 = vmatprep.subr.bf16.mxu1 %v4727_v15 }
0x2cad   :  { %v5853_v6 = vpop.permute.xlu1 %3223 }
0x2cae   :  { %v5855_v32 = vpop.permute.xlu0 %3275  ;;  %v3229_v23 = vsel %vm82_vm0, %v5853_v6, 0  ;;  %4436 = vmatmul.mubr.msk.bf16.vlgmr.msra.gmra.mrb[44].mxu0 %vm82_vm0, %v3117_v39 }
0x2caf   :  { %v3281_v59 = vsel %vm82_vm0, %v5855_v32, 0  ;;  %4442 = vmatmul.mubr.msk.bf16.vlgmr.msra.gmra.mrb[52].mxu1 %vm82_vm0, %v3169_v22  ;;  %4446 = vmatpush3.bf16.xpose.msra.mxu0 %v3229_v23 }
0x2cb0   :  { %4452 = vmatpush3.bf16.xpose.msra.mxu1 %v3281_v59  ;;  %4447 = vmatprep.mubr.msk.bf16.mxu0 %vm4728_vm1, %v4727_v15 }
0x2cb1   :  { %4457 = vmatprep.subr.bf16.mxu0 %v4727_v15  ;;  %4453 = vmatprep.mubr.msk.bf16.mxu1 %vm4728_vm1, %v4727_v15  ;;  %v3221_v43 = vpop.permute.xlu1 %3220 }
0x2cb2   :  { %4463 = vmatprep.subr.bf16.mxu1 %v4727_v15  ;;  %v3273_v0 = vpop.permute.xlu0 %3272 }
0x2cb6   :  { %4448 = vmatmul.mubr.msk.bf16.vlgmr.msra.gmra.mrb[48].mxu0 %vm82_vm0, %v3221_v43 }
0x2cb7   :  { %4454 = vmatmul.mubr.msk.bf16.vlgmr.msra.gmra.mrb[56].mxu1 %vm82_vm0, %v3273_v0  ;;  %4458 = vmatpush3.bf16.msra.mxu0 %v3423_v34 }
0x2cb8   :  { %4464 = vmatpush3.bf16.msra.mxu1 %v3468_v8  ;;  %4459 = vmatprep.mubr.msk.bf16.mxu0 %vm4728_vm1, %v4727_v15 }
0x2cb9   :  { %4469 = vmatprep.subr.bf16.mxu0 %v4727_v15  ;;  %4465 = vmatprep.mubr.msk.bf16.mxu1 %vm4728_vm1, %v4727_v15 }
0x2cba   :  { %4475 = vmatprep.subr.bf16.mxu1 %v4727_v15 }
0x2d71   :  { %v2953_v33 = vpop.f32.mrb[36].mxu0 }
0x2d72   :  { %v3005_v25 = vpop.f32.mrb[44].mxu1  ;;  %v4413_v60 = vpop.f32.mrb[37].mxu0  ;;  %v3324_v38 = vsel %vm3323_vm12, %v2953_v33, -inf }
0x2d73   :  { %v4419_v44 = vpop.f32.mrb[45].mxu1  ;;  %v3327_v14 = vsel %vm3323_vm12, %v3005_v25, -inf  ;;  %v2956_v31 = vpop.f32.mrb[38].mxu0  ;;  %3325 = vmax.xlane.f32.xlu1 %v3324_v38 }
0x2d74   :  { %3328 = vmax.xlane.f32.xlu0 %v3327_v14  ;;  %v3008_v51 = vpop.f32.mrb[46].mxu1  ;;  %v4414_v41 = vpop.f32.mrb[39].mxu0 }
0x2d75   :  { %v4420_v56 = vpop.f32.mrb[47].mxu1 }
0x2d79   :  { %v3057_v55 = vpop.f32.mrb[40].mxu0 }
0x2d7a   :  { %v3109_v20 = vpop.f32.mrb[48].mxu1  ;;  %v4425_v11 = vpop.f32.mrb[41].mxu0  ;;  %v3330_v36 = vsel %vm3323_vm12, %v3057_v55, -inf }
0x2d7b   :  { %v4431_v62 = vpop.f32.mrb[49].mxu1  ;;  %v3333_v4 = vsel %vm3323_vm12, %v3109_v20, -inf  ;;  %v3060_v28 = vpop.f32.mrb[42].mxu0  ;;  %3331 = vmax.xlane.f32.xlu0 %v3330_v36 }
0x2d7c   :  { %3334 = vmax.xlane.f32.xlu1 %v3333_v4  ;;  %v3112_v24 = vpop.f32.mrb[50].mxu1  ;;  %v4426_v18 = vpop.f32.mrb[43].mxu0 }
0x2d7d   :  { %v4432_v45 = vpop.f32.mrb[51].mxu1 }
0x2d81   :  { %v3161_v47 = vpop.f32.mrb[44].mxu0 }
0x2d82   :  { %v3213_v13 = vpop.f32.mrb[52].mxu1  ;;  %v4437_v26 = vpop.f32.mrb[45].mxu0  ;;  %v3336_v53 = vsel %vm3323_vm12, %v3161_v47, -inf }
0x2d83   :  { %v4443_v10 = vpop.f32.mrb[53].mxu1  ;;  %v3339_v50 = vsel %vm3323_vm12, %v3213_v13, -inf  ;;  %v3164_v1 = vpop.f32.mrb[46].mxu0  ;;  %3337 = vmax.xlane.f32.xlu0 %v3336_v53 }
0x2d84   :  { %3340 = vmax.xlane.f32.xlu1 %v3339_v50  ;;  %v3216_v3 = vpop.f32.mrb[54].mxu1  ;;  %v4438_v46 = vpop.f32.mrb[47].mxu0 }
0x2d85   :  { %v4444_v61 = vpop.f32.mrb[55].mxu1 }
0x2d89   :  { %v3265_v48 = vpop.f32.mrb[48].mxu0 }
0x2d8a   :  { %v3317_v37 = vpop.f32.mrb[56].mxu1  ;;  %v4449_v30 = vpop.f32.mrb[49].mxu0  ;;  %v3342_v27 = vsel %vm3323_vm12, %v3265_v48, -inf }
0x2d8b   :  { %v4455_v17 = vpop.f32.mrb[57].mxu1  ;;  %v3345_v40 = vsel %vm3323_vm12, %v3317_v37, -inf  ;;  %v3268_v54 = vpop.f32.mrb[50].mxu0  ;;  %3343 = vmax.xlane.f32.xlu0 %v3342_v27 }
0x2d8c   :  { %3346 = vmax.xlane.f32.xlu1 %v3345_v40  ;;  %v3320_v39 = vpop.f32.mrb[58].mxu1  ;;  %v4450_v22 = vpop.f32.mrb[51].mxu0 }
0x2d8d   :  { %v4456_v23 = vpop.f32.mrb[59].mxu1 }
0x2e00   :  { %v3326_v59 = vpop.xlane.xlu1 %3325 }
0x2e01   :  { %v3329_v43 = vpop.xlane.xlu0 %3328  ;;  %v3348_v0 = vsub.f32 %v2953_v33, %v3326_v59 }
0x2e02   :  { %v3349_v34 = vsub.f32 %v3005_v25, %v3329_v43  ;;  %v3603_v43 = vsel %vm1551_vm8, %v5834_v2, 0 }
0x2e03   :  { %v3356_v8 = vmul.f32 1.442695, %v3348_v0 }
0x2e04   :  { %v3358_v60 = vmul.f32 1.442695, %v3349_v34  ;;  %v3648_v34 = vsel %vm1551_vm8, %v5836_v35, 0 }
0x2e05   :  { %4628 = vpow2.f32 %v3356_v8 }
0x2e06   :  { %4630 = vpow2.f32 %v3358_v60 }
0x2e08   :  { %v3332_v38 = vpop.xlane.xlu0 %3331 }
0x2e09   :  { %v3335_v44 = vpop.xlane.xlu1 %3334  ;;  %v3350_v14 = vsub.f32 %v3057_v55, %v3332_v38 }
0x2e0a   :  { %v3351_v31 = vsub.f32 %v3109_v20, %v3335_v44 }
0x2e0b   :  { %v3360_v51 = vmul.f32 1.442695, %v3350_v14 }
0x2e0c   :  { %v3362_v41 = vmul.f32 1.442695, %v3351_v31  ;;  %v3693_v31 = vsel %vm1551_vm8, %v5853_v6, 0 }
0x2e0d   :  { %4632 = vpow2.f32 %v3360_v51  ;;  %v3738_v51 = vsel %vm1551_vm8, %v5855_v32, 0  ;;  %v3794_v32 = vld [vmem:[%s6028_s9] sm:$0xff] }
0x2e0e   :  { %4634 = vpow2.f32 %v3362_v41 }
0x2e0f   :  { %v4629_v56 = vpop.eup %4628 }
0x2e10   :  { %v4631_v11 = vpop.eup %4630  ;;  %v3338_v36 = vpop.xlane.xlu0 %3337  ;;  %v3372_v62 = vsel %vm3323_vm12, %v4629_v56, 0.0 }
0x2e11   :  { %v3341_v4 = vpop.xlane.xlu1 %3340  ;;  %v3352_v33 = vsub.f32 %v3161_v47, %v3338_v36  ;;  %3373 = vadd.xlane.f32.xlu0 %v3372_v62  ;;  %v3375_v28 = vsel %vm3323_vm12, %v4631_v11, 0.0 }
0x2e12   :  { %v3353_v25 = vsub.f32 %v3213_v13, %v3341_v4  ;;  %3376 = vadd.xlane.f32.xlu1 %v3375_v28  ;;  %v3795_v4 = vld [vmem:[%s6028_s9 + $0x8] sm:$0xff] }
0x2e13   :  { %v3364_v24 = vmul.f32 1.442695, %v3352_v33  ;;  %v3796_v33 = vld [vmem:[%s6028_s9 + $0x10] sm:$0xff] }
0x2e14   :  { %v3366_v18 = vmul.f32 1.442695, %v3353_v25  ;;  %v3797_v25 = vld [vmem:[%s6028_s9 + $0x18] sm:$0xff] }
0x2e15   :  { %4636 = vpow2.f32 %v3364_v24  ;;  %v3799_v28 = vpack.c.bf16 %v3797_v25, %v3796_v33  ;;  %v3784_v24 = vld [vmem:[%s6027_s8] sm:$0xff] }
0x2e16   :  { %4638 = vpow2.f32 %v3366_v18  ;;  %v3785_v18 = vld [vmem:[%s6027_s8 + $0x8] sm:$0xff] }
0x2e17   :  { %v4633_v55 = vpop.eup %4632 }
0x2e18   :  { %v4635_v20 = vpop.eup %4634  ;;  %v3344_v45 = vpop.xlane.xlu0 %3343  ;;  %v3378_v26 = vsel %vm3323_vm12, %v4633_v55, 0.0 }
0x2e19   :  { %v3347_v53 = vpop.xlane.xlu1 %3346  ;;  %v3354_v10 = vsub.f32 %v3265_v48, %v3344_v45  ;;  %3379 = vadd.xlane.f32.xlu0 %v3378_v26  ;;  %v3381_v47 = vsel %vm3323_vm12, %v4635_v20, 0.0 }
0x2e1a   :  { %v3355_v50 = vsub.f32 %v3317_v37, %v3347_v53  ;;  %3382 = vadd.xlane.f32.xlu1 %v3381_v47 }
0x2e1b   :  { %v3368_v13 = vmul.f32 1.442695, %v3354_v10 }
0x2e1c   :  { %v3370_v1 = vmul.f32 1.442695, %v3355_v50 }
0x2e1d   :  { %4640 = vpow2.f32 %v3368_v13 }
0x2e1e   :  { %4642 = vpow2.f32 %v3370_v1 }
0x2e1f   :  { %v5893_v3 = vpop.eup %4636 }
0x2e20   :  { %v5895_v46 = vpop.eup %4638  ;;  %v3384_v61 = vsel %vm3323_vm12, %v5893_v3, 0.0 }
0x2e21   :  { %3385 = vadd.xlane.f32.xlu0 %v3384_v61  ;;  %v3387_v48 = vsel %vm3323_vm12, %v5895_v46, 0.0 }
0x2e22   :  { %3388 = vadd.xlane.f32.xlu1 %v3387_v48 }
0x2e27   :  { %v5901_v37 = vpop.eup %4640 }
0x2e28   :  { %v5903_v30 = vpop.eup %4642  ;;  %v3390_v27 = vsel %vm3323_vm12, %v5901_v37, 0.0 }
0x2e29   :  { %3391 = vadd.xlane.f32.xlu0 %v3390_v27  ;;  %v3393_v17 = vsel %vm3323_vm12, %v5903_v30, 0.0 }
0x2e2a   :  { %3394 = vadd.xlane.f32.xlu1 %v3393_v17 }
0x2e3b   :  { %3883 = vrot.lane.b32.xlu1 %v3781_v12, %s4732_s25 }
0x2e3f   :  { %3881 = vrot.lane.b32.xlu0 %v3780_v19, %s4732_s25  ;;  %3885 = vrot.lane.b32.xlu1 %v3782_v42, %s4732_s25 }
0x2e43   :  { %3887 = vrot.lane.b32.xlu0 %v3783_v21, %s4732_s25 }
0x2e9e   :  { %v3374_v40 = vpop.xlane.xlu0 %3373 }
0x2e9f   :  { %4644 = vrcp.f32 %v3374_v40  ;;  %v3377_v54 = vpop.xlane.xlu1 %3376 }
0x2ea0   :  { %4646 = vrcp.f32 %v3377_v54 }
0x2ea6   :  { %v3380_v52 = vpop.xlane.xlu0 %3379 }
0x2ea7   :  { %4648 = vrcp.f32 %v3380_v52  ;;  %v3383_v29 = vpop.xlane.xlu1 %3382 }
0x2ea8   :  { %4650 = vrcp.f32 %v3383_v29 }
0x2ea9   :  { %v4645_v16 = vpop.eup %4644 }
0x2eaa   :  { %v4647_v58 = vpop.eup %4646  ;;  %v3397_v12 = vmul.f32 %v4645_v16, %v4629_v56 }
0x2eab   :  { %v3399_v19 = vmul.f32 %v4647_v58, %v4631_v11 }
0x2eac   :  { %v3412_v39 = vpack.c.bf16 %v3397_v12, %v3397_v12 }
0x2ead   :  { %v3413_v63 = vpack.c.bf16 %v3399_v19, %v3399_v19 }
0x2eae   :  { %4460 = vmatmul.mubr.msk.bf16.vlgmr.msra.gmra.mrb[52].mxu0 %vm3323_vm12, %v3412_v39  ;;  %v3386_v7 = vpop.xlane.xlu0 %3385 }
0x2eaf   :  { %4470 = vmatpush3.bf16.msra.mxu0 %v3513_v5  ;;  %4652 = vrcp.f32 %v3386_v7  ;;  %4466 = vmatmul.mubr.msk.bf16.vlgmr.msra.gmra.mrb[60].mxu1 %vm3323_vm12, %v3413_v63  ;;  %v3389_v42 = vpop.xlane.xlu1 %3388 }
0x2eb0   :  { %4476 = vmatpush3.bf16.msra.mxu1 %v3558_v9  ;;  %4654 = vrcp.f32 %v3389_v42  ;;  %4471 = vmatprep.mubr.msk.bf16.mxu0 %vm4728_vm1, %v4727_v15 }
0x2eb1   :  { %v4649_v21 = vpop.eup %4648  ;;  %4481 = vmatprep.subr.bf16.mxu0 %v4727_v15  ;;  %4477 = vmatprep.mubr.msk.bf16.mxu1 %vm4728_vm1, %v4727_v15 }
0x2eb2   :  { %v4651_v57 = vpop.eup %4650  ;;  %v3401_v22 = vmul.f32 %v4649_v21, %v4633_v55  ;;  %4487 = vmatprep.subr.bf16.mxu1 %v4727_v15  ;;  %v3788_v55 = vpack.c.bf16 %v3785_v18, %v3784_v24 }
0x2eb3   :  { %v3403_v49 = vmul.f32 %v4651_v57, %v4635_v20 }
0x2eb4   :  { %v3414_v23 = vpack.c.bf16 %v3401_v22, %v3401_v22 }
0x2eb5   :  { %v3415_v59 = vpack.c.bf16 %v3403_v49, %v3403_v49 }
0x2eb6   :  { %4472 = vmatmul.mubr.msk.bf16.vlgmr.msra.gmra.mrb[56].mxu0 %vm3323_vm12, %v3414_v23  ;;  %v3392_v0 = vpop.xlane.xlu0 %3391 }
0x2eb7   :  { %4482 = vmatpush3.bf16.msra.mxu0 %v3603_v43  ;;  %4656 = vrcp.f32 %v3392_v0  ;;  %4478 = vmatmul.mubr.msk.bf16.vlgmr.msra.gmra.mrb[64].mxu1 %vm3323_vm12, %v3415_v59  ;;  %v3395_v8 = vpop.xlane.xlu1 %3394 }
0x2eb8   :  { %4488 = vmatpush3.bf16.msra.mxu1 %v3648_v34  ;;  %4658 = vrcp.f32 %v3395_v8  ;;  %4483 = vmatprep.mubr.msk.bf16.mxu0 %vm4728_vm1, %v4727_v15 }
0x2eb9   :  { %v4653_v60 = vpop.eup %4652  ;;  %4493 = vmatprep.subr.bf16.mxu0 %v4727_v15  ;;  %4489 = vmatprep.mubr.msk.bf16.mxu1 %vm4728_vm1, %v4727_v15 }
0x2eba   :  { %v4655_v2 = vpop.eup %4654  ;;  %v3405_v38 = vmul.f32 %v4653_v60, %v5893_v3  ;;  %4499 = vmatprep.subr.bf16.mxu1 %v4727_v15  ;;  %v3786_v3 = vld [vmem:[%s6027_s8 + $0x10] sm:$0xff]  ;;  %v3882_v0 = vpop.permute.xlu0 %3881 }
0x2ebb   :  { %v3407_v35 = vmul.f32 %v4655_v2, %v5895_v46  ;;  %v3787_v46 = vld [vmem:[%s6027_s8 + $0x18] sm:$0xff]  ;;  %v3884_v8 = vpop.permute.xlu1 %3883 }
0x2ebc   :  { %v3416_v44 = vpack.c.bf16 %v3405_v38, %v3405_v38  ;;  %v3789_v40 = vpack.c.bf16 %v3787_v46, %v3786_v3  ;;  %v3978_v38 = vld [vmem:[#allocation2] sm:$0xff] }
0x2ebd   :  { %v3417_v14 = vpack.c.bf16 %v3407_v35, %v3407_v35  ;;  %v3979_v35 = vld [vmem:[#allocation2 + $0x8] sm:$0xff] }
0x2ebe   :  { %4484 = vmatmul.mubr.msk.bf16.vlgmr.msra.gmra.mrb[60].mxu0 %vm3323_vm12, %v3416_v44  ;;  %v3888_v2 = vpop.permute.xlu0 %3887  ;;  %v3982_v44 = vpack.c.bf16 %v3979_v35, %v3978_v38 }
0x2ebf   :  { %4494 = vmatpush3.bf16.msra.mxu0 %v3693_v31  ;;  %4490 = vmatmul.mubr.msk.bf16.vlgmr.msra.gmra.mrb[68].mxu1 %vm3323_vm12, %v3417_v14  ;;  %v3886_v60 = vpop.permute.xlu1 %3885  ;;  %v3980_v14 = vld [vmem:[#allocation2 + $0x10] sm:$0xff]  ;;  %v3981_v31 = vld [vmem:[#allocation2 + $0x18] sm:$0xff] }
0x2ec0   :  { %4500 = vmatpush3.bf16.msra.mxu1 %v3738_v51  ;;  %4495 = vmatprep.mubr.msk.bf16.mxu0 %vm4728_vm1, %v4727_v15  ;;  %v3983_v51 = vpack.c.bf16 %v3981_v31, %v3980_v14 }
0x2ec1   :  { %v4657_v41 = vpop.eup %4656  ;;  %4501 = vmatprep.mubr.msk.bf16.mxu1 %vm4728_vm1, %v4727_v15  ;;  %v3798_v15 = vpack.c.bf16 %v3795_v4, %v3794_v32  ;;  %4529 = vmatprep.subr.bf16.mxu1 %v3982_v44 }
0x2ec2   :  { %v4659_v56 = vpop.eup %4658  ;;  %v3409_v11 = vmul.f32 %v4657_v41, %v5901_v37 }
0x2ec3   :  { %v3411_v6 = vmul.f32 %v4659_v56, %v5903_v30  ;;  %4505 = vmatprep.subr.bf16.mxu0 %v3798_v15 }
0x2ec4   :  { %v3418_v36 = vpack.c.bf16 %v3409_v11, %v3409_v11 }
0x2ec5   :  { %v3419_v62 = vpack.c.bf16 %v3411_v6, %v3411_v6 }
0x2ec6   :  { %4496 = vmatmul.mubr.msk.bf16.vlgmr.msra.gmra.mrb[64].mxu0 %vm3323_vm12, %v3418_v36 }
0x2ec7   :  { %4502 = vmatmul.mubr.msk.bf16.vlgmr.msra.gmra.mrb[72].mxu1 %vm3323_vm12, %v3419_v62  ;;  %4506 = vmatpush3.bf16.msra.mxu0 %v3798_v15 }
0x2ec8   :  { %4507 = vmatprep.subr.bf16.mxu0 %v3799_v28  ;;  %4530 = vmatpush3.bf16.msra.mxu1 %v3982_v44 }
0x2ec9   :  { %4531 = vmatprep.subr.bf16.mxu1 %v3983_v51 }
0x2ecb   :  { %4508 = vmatpush3.bf16.msra.mxu0 %v3799_v28 }
0x2ecc   :  { %4517 = vmatprep.subr.bf16.mxu0 %v3788_v55  ;;  %4532 = vmatpush3.bf16.msra.mxu1 %v3983_v51 }
0x2f81   :  { %v3459_v20 = vpop.f32.mrb[52].mxu0 }
0x2f82   :  { %v4461_v45 = vpop.f32.mrb[53].mxu0  ;;  %v3504_v26 = vpop.f32.mrb[60].mxu1 }
0x2f83   :  { %v3462_v53 = vpop.f32.mrb[54].mxu0  ;;  %v3790_v10 = vpack.c.bf16 %v3504_v26, %v3459_v20  ;;  %v4467_v50 = vpop.f32.mrb[61].mxu1 }
0x2f84   :  { %v4462_v47 = vpop.f32.mrb[55].mxu0  ;;  %v3507_v13 = vpop.f32.mrb[62].mxu1  ;;  %v4142_v50 = vld [vmem:[%s6030_s11] ss:$0 sm:$0xff]  ;;  %s4698_s11 = scalar_lea.vmem %s4082_s7, 1024 }
0x2f85   :  { %v4468_v1 = vpop.f32.mrb[63].mxu1  ;;  %4509 = vmatprep.mubr.msk.bf16.mxu0 %vm82_vm0, %v3790_v10  ;;  %p4699_p8 = scmp.ne.s32.totalorder %s4082_s7, %s4698_s11  ;;  %p4704_p10 = scmp.lt.s32.totalorder %s4698_s11, %s4698_s11 }
0x2f87   :  { %p4705_p11 = por %p4704_p10, %p4703_p9 }
0x2f89   :  { %v3549_v61 = vpop.f32.mrb[56].mxu0  ;;  %p4706_p12 = pnand %p4705_p11, %p4699_p8 }
0x2f8a   :  { %v4473_v48 = vpop.f32.mrb[57].mxu0  ;;  %v3594_v37 = vpop.f32.mrb[64].mxu1 }
0x2f8b   :  { %v3552_v30 = vpop.f32.mrb[58].mxu0  ;;  %v3791_v27 = vpack.c.bf16 %v3594_v37, %v3549_v61  ;;  %v4479_v17 = vpop.f32.mrb[65].mxu1 }
0x2f8c   :  { %v4474_v54 = vpop.f32.mrb[59].mxu0  ;;  %v3597_v52 = vpop.f32.mrb[66].mxu1 }
0x2f8d   :  { %v4480_v29 = vpop.f32.mrb[67].mxu1  ;;  %4510 = vmatmul.mubr.msk.bf16.vlgmr.msra.gmra.mrb[68].mxu0 %vm82_vm0, %v3791_v27 }
0x2f8e   :  { %4518 = vmatpush3.bf16.msra.mxu0 %v3788_v55 }
0x2f8f   :  { %4519 = vmatprep.subr.bf16.mxu0 %v3789_v40 }
0x2f91   :  { %v3639_v16 = vpop.f32.mrb[60].mxu0 }
0x2f92   :  { %v4485_v58 = vpop.f32.mrb[61].mxu0  ;;  %v3684_v12 = vpop.f32.mrb[68].mxu1  ;;  %4520 = vmatpush3.bf16.msra.mxu0 %v3789_v40 }
0x2f93   :  { %v3642_v19 = vpop.f32.mrb[62].mxu0  ;;  %v3792_v39 = vpack.c.bf16 %v3684_v12, %v3639_v16  ;;  %v4491_v63 = vpop.f32.mrb[69].mxu1 }
0x2f94   :  { %v4486_v5 = vpop.f32.mrb[63].mxu0  ;;  %v3687_v7 = vpop.f32.mrb[70].mxu1 }
0x2f95   :  { %v4492_v9 = vpop.f32.mrb[71].mxu1  ;;  %4513 = vmatprep.mubr.msk.bf16.mxu0 %vm82_vm0, %v3792_v39 }
0x2f99   :  { %v3729_v42 = vpop.f32.mrb[64].mxu0 }
0x2f9a   :  { %v4497_v21 = vpop.f32.mrb[65].mxu0  ;;  %v3774_v57 = vpop.f32.mrb[72].mxu1 }
0x2f9b   :  { %v3732_v22 = vpop.f32.mrb[66].mxu0  ;;  %v3793_v49 = vpack.c.bf16 %v3774_v57, %v3729_v42  ;;  %v4503_v23 = vpop.f32.mrb[73].mxu1 }
0x2f9c   :  { %v4498_v59 = vpop.f32.mrb[67].mxu0  ;;  %v3777_v43 = vpop.f32.mrb[74].mxu1 }
0x2f9d   :  { %v4504_v34 = vpop.f32.mrb[75].mxu1  ;;  %4514 = vmatmul.mubr.msk.bf16.gmra.mrb[72].mxu0 %vm82_vm0, %v3793_v49 }
0x2f9e   :  { %4521 = vmatprep.mubr.msk.bf16.mxu0 %vm82_vm0, %v3882_v0 }
0x2fa5   :  { %4522 = vmatmul.mubr.msk.bf16.vlgmr.msra.gmra.mrb[68].mxu0 %vm82_vm0, %v3884_v8 }
0x2fa6   :  { %4525 = vmatprep.mubr.msk.bf16.mxu0 %vm82_vm0, %v3886_v60 }
0x2fad   :  { %4526 = vmatmul.mubr.msk.bf16.gmra.mrb[72].mxu0 %vm82_vm0, %v3888_v2 }
0x3078   :  { %v4523_v41 = vpop.f32.mrb[68].mxu0 }
0x3079   :  { %4660 = vtanh.f32 %v4523_v41  ;;  %v3935_v56 = vpop.f32.mrb[69].mxu0 }
0x307a   :  { %4662 = vtanh.f32 %v3935_v56  ;;  %v4524_v11 = vpop.f32.mrb[70].mxu0 }
0x307b   :  { %4664 = vtanh.f32 %v4524_v11  ;;  %v3938_v6 = vpop.f32.mrb[71].mxu0 }
0x307c   :  { %4666 = vtanh.f32 %v3938_v6 }
0x3080   :  { %v4527_v36 = vpop.f32.mrb[72].mxu0 }
0x3081   :  { %4668 = vtanh.f32 %v4527_v36  ;;  %v3951_v62 = vpop.f32.mrb[73].mxu0 }
0x3082   :  { %4670 = vtanh.f32 %v3951_v62  ;;  %v4528_v32 = vpop.f32.mrb[74].mxu0 }
0x3083   :  { %v4661_v4 = vpop.eup %4660  ;;  %4672 = vtanh.f32 %v4528_v32  ;;  %v3954_v15 = vpop.f32.mrb[75].mxu0 }
0x3084   :  { %v4663_v33 = vpop.eup %4662  ;;  %4674 = vtanh.f32 %v3954_v15 }
0x3085   :  { %v4665_v25 = vpop.eup %4664 }
0x3086   :  { %v4667_v28 = vpop.eup %4666  ;;  %v3975_v24 = vpack.c.bf16 %v4665_v25, %v4661_v4 }
0x3087   :  { %v3974_v18 = vpack.c.bf16 %v4667_v28, %v4663_v33 }
0x3089   :  { %4533 = vmatprep.mubr.msk.bf16.mxu1 %vm82_vm0, %v3974_v18 }
0x308a   :  { %4534 = vmatmul.mubr.msk.bf16.vlgmr.msra.gmra.mrb[76].mxu1 %vm82_vm0, %v3975_v24 }
0x308b   :  { %v4669_v55 = vpop.eup %4668 }
0x308c   :  { %v4671_v20 = vpop.eup %4670 }
0x308d   :  { %v4673_v45 = vpop.eup %4672 }
0x308e   :  { %v4675_v26 = vpop.eup %4674  ;;  %v3977_v53 = vpack.c.bf16 %v4673_v45, %v4669_v55 }
0x308f   :  { %v3976_v10 = vpack.c.bf16 %v4675_v26, %v4671_v20 }
0x3091   :  { %4537 = vmatprep.mubr.msk.bf16.mxu1 %vm82_vm0, %v3976_v10 }
0x3092   :  { %4538 = vmatmul.mubr.msk.bf16.gmra.mrb[80].mxu1 %vm82_vm0, %v3977_v53 }
0x315d   :  { %v4535_v47 = vpop.f32.mrb[76].mxu1 }
0x315e   :  { %v4046_v13 = vadd.f32 %v4535_v47, %v4142_v50  ;;  %v4037_v1 = vpop.f32.mrb[77].mxu1 }
0x315f   :  { %v4038_v3 = vadd.f32 %v4142_v50, %v4037_v1  ;;  %v4536_v46 = vpop.f32.mrb[78].mxu1 }
0x3160   :  { %4070 = vst [vmem:[#allocation5 + $0x10] sm:$0xff] %v4046_v13  ;;  %v4049_v61 = vadd.f32 %v4536_v46, %v4142_v50  ;;  %v4040_v48 = vpop.f32.mrb[79].mxu1 }
0x3161   :  { %4068 = vst [vmem:[#allocation5] sm:$0xff] %v4038_v3  ;;  %v4041_v37 = vadd.f32 %v4142_v50, %v4040_v48 }
0x3162   :  { %4071 = vst [vmem:[#allocation5 + $0x18] sm:$0xff] %v4049_v61 }
0x3163   :  { %4069 = vst [vmem:[#allocation5 + $0x8] sm:$0xff] %v4041_v37 }
0x3165   :  { %v4539_v30 = vpop.f32.mrb[80].mxu1 }
0x3166   :  { %v4062_v27 = vadd.f32 %v4539_v30, %v4142_v50  ;;  %v4053_v17 = vpop.f32.mrb[81].mxu1 }
0x3167   :  { %v4054_v40 = vadd.f32 %v4142_v50, %v4053_v17  ;;  %v4540_v54 = vpop.f32.mrb[82].mxu1 }
0x3168   :  { %4074 = vst [vmem:[#allocation5 + $0x30] sm:$0xff] %v4062_v27  ;;  %v4065_v52 = vadd.f32 %v4540_v54, %v4142_v50  ;;  %v4056_v29 = vpop.f32.mrb[83].mxu1 }
0x3169   :  { %4072 = vst [vmem:[#allocation5 + $0x20] sm:$0xff] %v4054_v40  ;;  %v4057_v16 = vadd.f32 %v4142_v50, %v4056_v29 }
0x316a   :  { %4075 = vst [vmem:[#allocation5 + $0x38] sm:$0xff] %v4065_v52 }
0x316b   :  { %4073 = vst [vmem:[#allocation5 + $0x28] sm:$0xff] %v4057_v16 }
0x316c   :  { %4709 = shalt.err (!%p4706_p12)
}
0x316d   :  { %s4710_s23 = scalar_lea.hbm %s6031_s12, 1024 }
0x316e   :  { %p4711_p13 = scmp.ne.s32.totalorder %s6031_s12, %s4710_s23  ;;  %p4714_p0 = scmp.lt.u32.totalorder %s4710_s23, %s6031_s12 }
0x3170   :  { %p4716_p1 = pnand %p4714_p0, %p4711_p13 }
0x3172   :  { %4719 = shalt.err (!%p4716_p1)
}
0x3173   :  { %4087 = dma.vmem_to_hbm [thread:$0]  %s4082_s7, 1024, %s6031_s12, [#allocation4], %s4725_s13, %s4725_s13, %s4726_s14  }
0x3174   :  { %4722 = dma.done.wait [#allocation4], 1024  }
0x3175   :  { %4723 = vsyncadd [#allocation4], 4294966272 }
0x3176   :  { %4091 = vsyncpa [#allocation3], 1 }
0x3177   :  { %4092 = vsyncpa [#allocation4], 1 }

</bundles_post_ra>
